<compile_context>
chip_gen: v7x
topology: tpu7x:2x2x1
jax: 0.10.0
libtpu: 0.0.40
codegen_flags: <defaults>
</compile_context>

<pallas_src>
import functools

import jax
import jax.numpy as jnp
from jax.experimental import pallas as pl
from jax.experimental.pallas import tpu as pltpu

_KSIZE = 4     # all convs are 4x4
_LANE = 128    # padded Cout / lane width


def _round_up(x, m):
    return ((x + m - 1) // m) * m


def _encoder_channels(num_channels, latent_size):
    return [num_channels, latent_size // 8, latent_size // 4,
            latent_size // 2, latent_size, latent_size]


# ----------------------------------------------------------------------------
# Pallas kernel: fused matmul + bias + LeakyReLU (one call per conv layer).
# ----------------------------------------------------------------------------
def _mm_bias_act_kernel(x_ref, w_ref, b_ref, o_ref, *, negative_slope):
    # x_ref: (TM, Kp) bf16, w_ref: (Kp, Np) bf16, b_ref: (1, Np) f32.
    y = jnp.dot(x_ref[...], w_ref[...], preferred_element_type=jnp.float32)
    y = y + b_ref[...]
    if negative_slope is not None:
        y = jnp.where(y > 0, y, negative_slope * y)
    o_ref[...] = y


def _fused_matmul(col, w_kn, bias, negative_slope, n_blocks):
    Mp, Kp = col.shape
    _, Np = w_kn.shape
    TM = Mp // n_blocks

    flops = 2 * Mp * Kp * Np
    bytes_accessed = Mp * Kp * 2 + Kp * Np * 2 + Np * 4 + Mp * Np * 4

    kernel = functools.partial(_mm_bias_act_kernel, negative_slope=negative_slope)
    return pl.pallas_call(
        kernel,
        out_shape=jax.ShapeDtypeStruct((Mp, Np), jnp.float32),
        grid=(n_blocks,),
        in_specs=[
            pl.BlockSpec((TM, Kp), lambda i: (i, 0)),
            pl.BlockSpec((Kp, Np), lambda i: (0, 0)),
            pl.BlockSpec((1, Np), lambda i: (0, 0)),
        ],
        out_specs=pl.BlockSpec((TM, Np), lambda i: (i, 0)),
        compiler_params=pltpu.CompilerParams(
            dimension_semantics=("parallel",),
            vmem_limit_bytes=32 * 1024 * 1024,
        ),
        cost_estimate=pl.CostEstimate(
            flops=flops, transcendentals=0, bytes_accessed=bytes_accessed),
    )(col, w_kn, bias)


# ----------------------------------------------------------------------------
# XLA glue: NHWC im2col (pad + static strided slices + stack + reshape).
# K-axis ordering is (kh, kw, cin) to match the packed weights.
# ----------------------------------------------------------------------------
def _im2col_nhwc(x, stride, padding):
    B, H, W, C = x.shape
    xp = jnp.pad(x, ((0, 0), (padding, padding), (padding, padding), (0, 0)))
    Hp, Wp = H + 2 * padding, W + 2 * padding
    OH = (Hp - _KSIZE) // stride + 1
    OW = (Wp - _KSIZE) // stride + 1
    taps = []
    for kh in range(_KSIZE):
        for kw in range(_KSIZE):
            taps.append(
                xp[:, kh:kh + stride * (OH - 1) + 1:stride,
                      kw:kw + stride * (OW - 1) + 1:stride, :])
    col = jnp.stack(taps, axis=3)                        # (B, OH, OW, 16, C)
    col = col.reshape(B * OH * OW, _KSIZE * _KSIZE * C)  # (M, K)
    return col, OH, OW


# ----------------------------------------------------------------------------
# Parameters.
# ----------------------------------------------------------------------------
def init_encoder_params(key, num_channels=1, latent_size=64):
    """Raw PyTorch-layout params: list of (w (Cout,Cin,4,4) f32, b (Cout,) f32)."""
    chans = _encoder_channels(num_channels, latent_size)
    params = []
    for i in range(5):
        key, k_w, k_b = jax.random.split(key, 3)
        cin, cout = chans[i], chans[i + 1]
        fan_in = cin * _KSIZE * _KSIZE
        w = jax.random.normal(k_w, (cout, cin, _KSIZE, _KSIZE),
                              jnp.float32) / jnp.sqrt(fan_in)
        b = jax.random.normal(k_b, (cout,), jnp.float32) * 0.01
        params.append((w, b))
    return params


def pack_encoder_params(raw_params):
    """One-time repack (feedback item: no per-call weight transposes):
    (Cout,Cin,4,4) -> (Kp, 128) bf16 with K ordered (kh,kw,cin), plus
    (1, 128) f32 bias; zero padding on K and Cout."""
    packed = []
    for w, b in raw_params:
        cout, cin, kh, kw = w.shape
        K = kh * kw * cin
        w_kn = jnp.transpose(w, (2, 3, 1, 0)).reshape(K, cout)
        Kp = _round_up(K, _LANE)
        Np = _round_up(cout, _LANE)
        w_kn = jnp.pad(w_kn, ((0, Kp - K), (0, Np - cout))).astype(jnp.bfloat16)
        b_p = jnp.pad(b, (0, Np - cout)).reshape(1, Np).astype(jnp.float32)
        packed.append((w_kn, b_p))
    return packed


# ----------------------------------------------------------------------------
# Forward pass.
# ----------------------------------------------------------------------------
def make_encoder_forward(num_channels=1, latent_size=64):
    chans = _encoder_channels(num_channels, latent_size)
    pads = (2, 2, 2, 2, 0)
    slopes = (0.01, 0.01, 0.01, 0.01, None)

    def forward(packed_params, x):
        # x: (B, Cin, 64, 64) NCHW -> NHWC once; NHWC thereafter.
        B = x.shape[0]
        y = jnp.transpose(x, (0, 2, 3, 1))
        for layer in range(5):
            w_kn, b_p = packed_params[layer]
            cout = chans[layer + 1]
            col, OH, OW = _im2col_nhwc(y, stride=2, padding=pads[layer])
            M, K = col.shape
            Kp = w_kn.shape[0]
            n_blocks = 2 if M >= 2048 else 1      # let v7x's 2 TCs split conv1
            Mp = _round_up(M, 16 * n_blocks)
            col = jnp.pad(col, ((0, Mp - M), (0, Kp - K))).astype(jnp.bfloat16)
            out = _fused_matmul(col, w_kn, b_p, slopes[layer], n_blocks)
            y = out[:M, :cout].reshape(B, OH, OW, cout)
        return y.reshape(B, latent_size)

    return jax.jit(forward)


# ----------------------------------------------------------------------------
# Pure-XLA reference (NCHW).  compute_dtype=bf16 mirrors the kernel's MXU
# operand precision exactly (same cast points, f32 accumulation).
# ----------------------------------------------------------------------------
def encoder_reference(raw_params, x, compute_dtype=jnp.float32):
    def conv(v, w, b, stride, padding):
        y = jax.lax.conv_general_dilated(
            v.astype(compute_dtype), w.astype(compute_dtype),
            window_strides=(stride, stride),
            padding=[(padding, padding), (padding, padding)],
            dimension_numbers=("NCHW", "OIHW", "NCHW"),
            preferred_element_type=jnp.float32)
        return y + b.reshape(1, -1, 1, 1)

    lrelu = lambda v: jnp.where(v > 0, v, 0.01 * v)
    y = x
    for i in range(4):
        y = lrelu(conv(y, *raw_params[i], 2, 2))
    y = conv(y, *raw_params[4], 2, 0)
    return y.reshape(y.shape[0], -1)


if __name__ == "__main__":
    key = jax.random.PRNGKey(0)
    k_params, k_x = jax.random.split(key)

    # Spatial must be 64x64 so conv5 yields 1x1; small batch / channels / latent.
    batch, num_channels, latent_size = 2, 1, 64
    x = jax.random.normal(k_x, (batch, num_channels, 64, 64), jnp.float32)

    raw_params = init_encoder_params(k_params, num_channels, latent_size)
    packed_params = pack_encoder_params(raw_params)
    forward = make_encoder_forward(num_channels, latent_size)

    out = jax.block_until_ready(forward(packed_params, x))
    assert out.shape == (batch, latent_size)

    # Strict check against a reference with matched (bf16 operand) precision.
    ref_bf16 = jax.block_until_ready(
        encoder_reference(raw_params, x, compute_dtype=jnp.bfloat16))
    assert jnp.allclose(out, ref_bf16, rtol=2e-3, atol=2e-3), \
        "mismatch vs bf16-operand XLA reference"

    # Loose check against the full-f32 reference (bf16 MXU operand rounding).
    ref_f32 = jax.block_until_ready(
        encoder_reference(raw_params, x, compute_dtype=jnp.float32))
    assert jnp.allclose(out, ref_f32, rtol=5e-2, atol=5e-2), \
        "mismatch vs f32 XLA reference"

    print("KERNEL_OK")
</pallas_src>

<mosaic_0001>
module attributes {stable_mosaic.version = 11 : i64} {
  func.func @_mm_bias_act_kernel(%arg0: i32, %arg1: memref<1104x128xbf16, #tpu.memory_space<vmem>>, %arg2: memref<128x128xbf16, #tpu.memory_space<vmem>>, %arg3: memref<1x128xf32, #tpu.memory_space<vmem>>, %arg4: memref<1104x128xf32, #tpu.memory_space<vmem>>) attributes {dimension_semantics = [#tpu.dimension_semantics<parallel>], iteration_bounds = array<i64: 2>, scalar_prefetch = 0 : i64, scratch_operands = 0 : i64, tpu.core_type = #tpu.core_type<tc>, window_params = [{transform_indices = @transform_0, window_bounds = array<i64: 1104, 128>}, {pipeline_mode = #tpu.pipeline_mode<synchronous>, transform_indices = @transform_1, window_bounds = array<i64: 128, 128>}, {pipeline_mode = #tpu.pipeline_mode<synchronous>, transform_indices = @transform_2, window_bounds = array<i64: 1, 128>}, {transform_indices = @transform_3, window_bounds = array<i64: 1104, 128>}]} {
    %c0 = arith.constant 0 : index
    %c0_0 = arith.constant 0 : index
    %0 = vector.load %arg1[%c0, %c0_0] : memref<1104x128xbf16, #tpu.memory_space<vmem>>, vector<1104x128xbf16>
    %c0_1 = arith.constant 0 : index
    %c0_2 = arith.constant 0 : index
    %1 = vector.load %arg2[%c0_1, %c0_2] : memref<128x128xbf16, #tpu.memory_space<vmem>>, vector<128x128xbf16>
    %cst = arith.constant dense<0.000000e+00> : vector<1104x128xf32>
    %2 = tpu.matmul %0, %1, %cst {dimension_numbers = #tpu.dot_dimension_numbers<[1], [0], [0], [1], [0, 0, 1, 1], [], []>} : vector<1104x128xbf16>, vector<128x128xbf16>, vector<1104x128xf32> -> vector<1104x128xf32>
    %c0_3 = arith.constant 0 : index
    %c0_4 = arith.constant 0 : index
    %3 = vector.load %arg3[%c0_3, %c0_4] : memref<1x128xf32, #tpu.memory_space<vmem>>, vector<1x128xf32>
    %4 = vector.broadcast %3 : vector<1x128xf32> to vector<1104x128xf32>
    %5 = arith.addf %2, %4 : vector<1104x128xf32>
    %cst_5 = arith.constant 0.000000e+00 : f32
    %6 = vector.broadcast %cst_5 : f32 to vector<1104x128xf32>
    %7 = arith.cmpf ogt, %5, %6 : vector<1104x128xf32>
    %cst_6 = arith.constant 0.00999999977 : f32
    %8 = vector.broadcast %cst_6 : f32 to vector<1104x128xf32>
    %9 = arith.mulf %8, %5 : vector<1104x128xf32>
    %10 = arith.select %7, %5, %9 : vector<1104x128xi1>, vector<1104x128xf32>
    %c0_7 = arith.constant 0 : index
    %c0_8 = arith.constant 0 : index
    %11 = vector.load %arg4[%c0_7, %c0_8] : memref<1104x128xf32, #tpu.memory_space<vmem>>, vector<1104x128xf32>
    tpu.vector_store %arg4[%c0_7, %c0_8], %10 {strides = array<i32>} : memref<1104x128xf32, #tpu.memory_space<vmem>>, vector<1104x128xf32>,
    return
  }
  func.func @transform_0(%arg0: i32) -> (i32, i32) {
    %c0_i32 = arith.constant 0 : i32
    %c0_i32_0 = arith.constant 0 : i32
    return %arg0, %c0_i32 : i32, i32
  }
  func.func @transform_1(%arg0: i32) -> (i32, i32) {
    %c0_i32 = arith.constant 0 : i32
    %c0_i32_0 = arith.constant 0 : i32
    %c0_i32_1 = arith.constant 0 : i32
    return %c0_i32, %c0_i32_0 : i32, i32
  }
  func.func @transform_2(%arg0: i32) -> (i32, i32) {
    %c0_i32 = arith.constant 0 : i32
    %c0_i32_0 = arith.constant 0 : i32
    %c0_i32_1 = arith.constant 0 : i32
    return %c0_i32, %c0_i32_0 : i32, i32
  }
  func.func @transform_3(%arg0: i32) -> (i32, i32) {
    %c0_i32 = arith.constant 0 : i32
    %c0_i32_0 = arith.constant 0 : i32
    return %arg0, %c0_i32 : i32, i32
  }
}

module attributes {stable_mosaic.version = 11 : i64} {
  func.func @_mm_bias_act_kernel(%arg0: i32, %arg1: memref<592x128xbf16, #tpu.memory_space<vmem>>, %arg2: memref<128x128xbf16, #tpu.memory_space<vmem>>, %arg3: memref<1x128xf32, #tpu.memory_space<vmem>>, %arg4: memref<592x128xf32, #tpu.memory_space<vmem>>) attributes {dimension_semantics = [#tpu.dimension_semantics<parallel>], iteration_bounds = array<i64: 1>, scalar_prefetch = 0 : i64, scratch_operands = 0 : i64, tpu.core_type = #tpu.core_type<tc>, window_params = [{transform_indices = @transform_0, window_bounds = array<i64: 592, 128>}, {pipeline_mode = #tpu.pipeline_mode<synchronous>, transform_indices = @transform_1, window_bounds = array<i64: 128, 128>}, {pipeline_mode = #tpu.pipeline_mode<synchronous>, transform_indices = @transform_2, window_bounds = array<i64: 1, 128>}, {transform_indices = @transform_3, window_bounds = array<i64: 592, 128>}]} {
    %c0 = arith.constant 0 : index
    %c0_0 = arith.constant 0 : index
    %0 = vector.load %arg1[%c0, %c0_0] : memref<592x128xbf16, #tpu.memory_space<vmem>>, vector<592x128xbf16>
    %c0_1 = arith.constant 0 : index
    %c0_2 = arith.constant 0 : index
    %1 = vector.load %arg2[%c0_1, %c0_2] : memref<128x128xbf16, #tpu.memory_space<vmem>>, vector<128x128xbf16>
    %cst = arith.constant dense<0.000000e+00> : vector<592x128xf32>
    %2 = tpu.matmul %0, %1, %cst {dimension_numbers = #tpu.dot_dimension_numbers<[1], [0], [0], [1], [0, 0, 1, 1], [], []>} : vector<592x128xbf16>, vector<128x128xbf16>, vector<592x128xf32> -> vector<592x128xf32>
    %c0_3 = arith.constant 0 : index
    %c0_4 = arith.constant 0 : index
    %3 = vector.load %arg3[%c0_3, %c0_4] : memref<1x128xf32, #tpu.memory_space<vmem>>, vector<1x128xf32>
    %4 = vector.broadcast %3 : vector<1x128xf32> to vector<592x128xf32>
    %5 = arith.addf %2, %4 : vector<592x128xf32>
    %cst_5 = arith.constant 0.000000e+00 : f32
    %6 = vector.broadcast %cst_5 : f32 to vector<592x128xf32>
    %7 = arith.cmpf ogt, %5, %6 : vector<592x128xf32>
    %cst_6 = arith.constant 0.00999999977 : f32
    %8 = vector.broadcast %cst_6 : f32 to vector<592x128xf32>
    %9 = arith.mulf %8, %5 : vector<592x128xf32>
    %10 = arith.select %7, %5, %9 : vector<592x128xi1>, vector<592x128xf32>
    %c0_7 = arith.constant 0 : index
    %c0_8 = arith.constant 0 : index
    %11 = vector.load %arg4[%c0_7, %c0_8] : memref<592x128xf32, #tpu.memory_space<vmem>>, vector<592x128xf32>
    tpu.vector_store %arg4[%c0_7, %c0_8], %10 {strides = array<i32>} : memref<592x128xf32, #tpu.memory_space<vmem>>, vector<592x128xf32>,
    return
  }
  func.func @transform_0(%arg0: i32) -> (i32, i32) {
    %c0_i32 = arith.constant 0 : i32
    %c0_i32_0 = arith.constant 0 : i32
    return %arg0, %c0_i32 : i32, i32
  }
  func.func @transform_1(%arg0: i32) -> (i32, i32) {
    %c0_i32 = arith.constant 0 : i32
    %c0_i32_0 = arith.constant 0 : i32
    %c0_i32_1 = arith.constant 0 : i32
    return %c0_i32, %c0_i32_0 : i32, i32
  }
  func.func @transform_2(%arg0: i32) -> (i32, i32) {
    %c0_i32 = arith.constant 0 : i32
    %c0_i32_0 = arith.constant 0 : i32
    %c0_i32_1 = arith.constant 0 : i32
    return %c0_i32, %c0_i32_0 : i32, i32
  }
  func.func @transform_3(%arg0: i32) -> (i32, i32) {
    %c0_i32 = arith.constant 0 : i32
    %c0_i32_0 = arith.constant 0 : i32
    return %arg0, %c0_i32 : i32, i32
  }
}

module attributes {stable_mosaic.version = 11 : i64} {
  func.func @_mm_bias_act_kernel(%arg0: i32, %arg1: memref<176x256xbf16, #tpu.memory_space<vmem>>, %arg2: memref<256x128xbf16, #tpu.memory_space<vmem>>, %arg3: memref<1x128xf32, #tpu.memory_space<vmem>>, %arg4: memref<176x128xf32, #tpu.memory_space<vmem>>) attributes {dimension_semantics = [#tpu.dimension_semantics<parallel>], iteration_bounds = array<i64: 1>, scalar_prefetch = 0 : i64, scratch_operands = 0 : i64, tpu.core_type = #tpu.core_type<tc>, window_params = [{transform_indices = @transform_0, window_bounds = array<i64: 176, 256>}, {pipeline_mode = #tpu.pipeline_mode<synchronous>, transform_indices = @transform_1, window_bounds = array<i64: 256, 128>}, {pipeline_mode = #tpu.pipeline_mode<synchronous>, transform_indices = @transform_2, window_bounds = array<i64: 1, 128>}, {transform_indices = @transform_3, window_bounds = array<i64: 176, 128>}]} {
    %c0 = arith.constant 0 : index
    %c0_0 = arith.constant 0 : index
    %0 = vector.load %arg1[%c0, %c0_0] : memref<176x256xbf16, #tpu.memory_space<vmem>>, vector<176x256xbf16>
    %c0_1 = arith.constant 0 : index
    %c0_2 = arith.constant 0 : index
    %1 = vector.load %arg2[%c0_1, %c0_2] : memref<256x128xbf16, #tpu.memory_space<vmem>>, vector<256x128xbf16>
    %cst = arith.constant dense<0.000000e+00> : vector<176x128xf32>
    %2 = tpu.matmul %0, %1, %cst {dimension_numbers = #tpu.dot_dimension_numbers<[1], [0], [0], [1], [0, 0, 1, 1], [], []>} : vector<176x256xbf16>, vector<256x128xbf16>, vector<176x128xf32> -> vector<176x128xf32>
    %c0_3 = arith.constant 0 : index
    %c0_4 = arith.constant 0 : index
    %3 = vector.load %arg3[%c0_3, %c0_4] : memref<1x128xf32, #tpu.memory_space<vmem>>, vector<1x128xf32>
    %4 = vector.broadcast %3 : vector<1x128xf32> to vector<176x128xf32>
    %5 = arith.addf %2, %4 : vector<176x128xf32>
    %cst_5 = arith.constant 0.000000e+00 : f32
    %6 = vector.broadcast %cst_5 : f32 to vector<176x128xf32>
    %7 = arith.cmpf ogt, %5, %6 : vector<176x128xf32>
    %cst_6 = arith.constant 0.00999999977 : f32
    %8 = vector.broadcast %cst_6 : f32 to vector<176x128xf32>
    %9 = arith.mulf %8, %5 : vector<176x128xf32>
    %10 = arith.select %7, %5, %9 : vector<176x128xi1>, vector<176x128xf32>
    %c0_7 = arith.constant 0 : index
    %c0_8 = arith.constant 0 : index
    %11 = vector.load %arg4[%c0_7, %c0_8] : memref<176x128xf32, #tpu.memory_space<vmem>>, vector<176x128xf32>
    tpu.vector_store %arg4[%c0_7, %c0_8], %10 {strides = array<i32>} : memref<176x128xf32, #tpu.memory_space<vmem>>, vector<176x128xf32>,
    return
  }
  func.func @transform_0(%arg0: i32) -> (i32, i32) {
    %c0_i32 = arith.constant 0 : i32
    %c0_i32_0 = arith.constant 0 : i32
    return %arg0, %c0_i32 : i32, i32
  }
  func.func @transform_1(%arg0: i32) -> (i32, i32) {
    %c0_i32 = arith.constant 0 : i32
    %c0_i32_0 = arith.constant 0 : i32
    %c0_i32_1 = arith.constant 0 : i32
    return %c0_i32, %c0_i32_0 : i32, i32
  }
  func.func @transform_2(%arg0: i32) -> (i32, i32) {
    %c0_i32 = arith.constant 0 : i32
    %c0_i32_0 = arith.constant 0 : i32
    %c0_i32_1 = arith.constant 0 : i32
    return %c0_i32, %c0_i32_0 : i32, i32
  }
  func.func @transform_3(%arg0: i32) -> (i32, i32) {
    %c0_i32 = arith.constant 0 : i32
    %c0_i32_0 = arith.constant 0 : i32
    return %arg0, %c0_i32 : i32, i32
  }
}

module attributes {stable_mosaic.version = 11 : i64} {
  func.func @_mm_bias_act_kernel(%arg0: i32, %arg1: memref<64x512xbf16, #tpu.memory_space<vmem>>, %arg2: memref<512x128xbf16, #tpu.memory_space<vmem>>, %arg3: memref<1x128xf32, #tpu.memory_space<vmem>>, %arg4: memref<64x128xf32, #tpu.memory_space<vmem>>) attributes {dimension_semantics = [#tpu.dimension_semantics<parallel>], iteration_bounds = array<i64: 1>, scalar_prefetch = 0 : i64, scratch_operands = 0 : i64, tpu.core_type = #tpu.core_type<tc>, window_params = [{transform_indices = @transform_0, window_bounds = array<i64: 64, 512>}, {pipeline_mode = #tpu.pipeline_mode<synchronous>, transform_indices = @transform_1, window_bounds = array<i64: 512, 128>}, {pipeline_mode = #tpu.pipeline_mode<synchronous>, transform_indices = @transform_2, window_bounds = array<i64: 1, 128>}, {transform_indices = @transform_3, window_bounds = array<i64: 64, 128>}]} {
    %c0 = arith.constant 0 : index
    %c0_0 = arith.constant 0 : index
    %0 = vector.load %arg1[%c0, %c0_0] : memref<64x512xbf16, #tpu.memory_space<vmem>>, vector<64x512xbf16>
    %c0_1 = arith.constant 0 : index
    %c0_2 = arith.constant 0 : index
    %1 = vector.load %arg2[%c0_1, %c0_2] : memref<512x128xbf16, #tpu.memory_space<vmem>>, vector<512x128xbf16>
    %cst = arith.constant dense<0.000000e+00> : vector<64x128xf32>
    %2 = tpu.matmul %0, %1, %cst {dimension_numbers = #tpu.dot_dimension_numbers<[1], [0], [0], [1], [0, 0, 1, 1], [], []>} : vector<64x512xbf16>, vector<512x128xbf16>, vector<64x128xf32> -> vector<64x128xf32>
    %c0_3 = arith.constant 0 : index
    %c0_4 = arith.constant 0 : index
    %3 = vector.load %arg3[%c0_3, %c0_4] : memref<1x128xf32, #tpu.memory_space<vmem>>, vector<1x128xf32>
    %4 = vector.broadcast %3 : vector<1x128xf32> to vector<64x128xf32>
    %5 = arith.addf %2, %4 : vector<64x128xf32>
    %cst_5 = arith.constant 0.000000e+00 : f32
    %6 = vector.broadcast %cst_5 : f32 to vector<64x128xf32>
    %7 = arith.cmpf ogt, %5, %6 : vector<64x128xf32>
    %cst_6 = arith.constant 0.00999999977 : f32
    %8 = vector.broadcast %cst_6 : f32 to vector<64x128xf32>
    %9 = arith.mulf %8, %5 : vector<64x128xf32>
    %10 = arith.select %7, %5, %9 : vector<64x128xi1>, vector<64x128xf32>
    %c0_7 = arith.constant 0 : index
    %c0_8 = arith.constant 0 : index
    %11 = vector.load %arg4[%c0_7, %c0_8] : memref<64x128xf32, #tpu.memory_space<vmem>>, vector<64x128xf32>
    tpu.vector_store %arg4[%c0_7, %c0_8], %10 {strides = array<i32>} : memref<64x128xf32, #tpu.memory_space<vmem>>, vector<64x128xf32>,
    return
  }
  func.func @transform_0(%arg0: i32) -> (i32, i32) {
    %c0_i32 = arith.constant 0 : i32
    %c0_i32_0 = arith.constant 0 : i32
    return %arg0, %c0_i32 : i32, i32
  }
  func.func @transform_1(%arg0: i32) -> (i32, i32) {
    %c0_i32 = arith.constant 0 : i32
    %c0_i32_0 = arith.constant 0 : i32
    %c0_i32_1 = arith.constant 0 : i32
    return %c0_i32, %c0_i32_0 : i32, i32
  }
  func.func @transform_2(%arg0: i32) -> (i32, i32) {
    %c0_i32 = arith.constant 0 : i32
    %c0_i32_0 = arith.constant 0 : i32
    %c0_i32_1 = arith.constant 0 : i32
    return %c0_i32, %c0_i32_0 : i32, i32
  }
  func.func @transform_3(%arg0: i32) -> (i32, i32) {
    %c0_i32 = arith.constant 0 : i32
    %c0_i32_0 = arith.constant 0 : i32
    return %arg0, %c0_i32 : i32, i32
  }
}

module attributes {stable_mosaic.version = 11 : i64} {
  func.func @_mm_bias_act_kernel(%arg0: i32, %arg1: memref<16x1024xbf16, #tpu.memory_space<vmem>>, %arg2: memref<1024x128xbf16, #tpu.memory_space<vmem>>, %arg3: memref<1x128xf32, #tpu.memory_space<vmem>>, %arg4: memref<16x128xf32, #tpu.memory_space<vmem>>) attributes {dimension_semantics = [#tpu.dimension_semantics<parallel>], iteration_bounds = array<i64: 1>, scalar_prefetch = 0 : i64, scratch_operands = 0 : i64, tpu.core_type = #tpu.core_type<tc>, window_params = [{transform_indices = @transform_0, window_bounds = array<i64: 16, 1024>}, {pipeline_mode = #tpu.pipeline_mode<synchronous>, transform_indices = @transform_1, window_bounds = array<i64: 1024, 128>}, {pipeline_mode = #tpu.pipeline_mode<synchronous>, transform_indices = @transform_2, window_bounds = array<i64: 1, 128>}, {transform_indices = @transform_3, window_bounds = array<i64: 16, 128>}]} {
    %c0 = arith.constant 0 : index
    %c0_0 = arith.constant 0 : index
    %0 = vector.load %arg1[%c0, %c0_0] : memref<16x1024xbf16, #tpu.memory_space<vmem>>, vector<16x1024xbf16>
    %c0_1 = arith.constant 0 : index
    %c0_2 = arith.constant 0 : index
    %1 = vector.load %arg2[%c0_1, %c0_2] : memref<1024x128xbf16, #tpu.memory_space<vmem>>, vector<1024x128xbf16>
    %cst = arith.constant dense<0.000000e+00> : vector<16x128xf32>
    %2 = tpu.matmul %0, %1, %cst {dimension_numbers = #tpu.dot_dimension_numbers<[1], [0], [0], [1], [0, 0, 1, 1], [], []>} : vector<16x1024xbf16>, vector<1024x128xbf16>, vector<16x128xf32> -> vector<16x128xf32>
    %c0_3 = arith.constant 0 : index
    %c0_4 = arith.constant 0 : index
    %3 = vector.load %arg3[%c0_3, %c0_4] : memref<1x128xf32, #tpu.memory_space<vmem>>, vector<1x128xf32>
    %4 = vector.broadcast %3 : vector<1x128xf32> to vector<16x128xf32>
    %5 = arith.addf %2, %4 : vector<16x128xf32>
    %c0_5 = arith.constant 0 : index
    %c0_6 = arith.constant 0 : index
    %6 = vector.load %arg4[%c0_5, %c0_6] : memref<16x128xf32, #tpu.memory_space<vmem>>, vector<16x128xf32>
    tpu.vector_store %arg4[%c0_5, %c0_6], %5 {strides = array<i32>} : memref<16x128xf32, #tpu.memory_space<vmem>>, vector<16x128xf32>,
    return
  }
  func.func @transform_0(%arg0: i32) -> (i32, i32) {
    %c0_i32 = arith.constant 0 : i32
    %c0_i32_0 = arith.constant 0 : i32
    return %arg0, %c0_i32 : i32, i32
  }
  func.func @transform_1(%arg0: i32) -> (i32, i32) {
    %c0_i32 = arith.constant 0 : i32
    %c0_i32_0 = arith.constant 0 : i32
    %c0_i32_1 = arith.constant 0 : i32
    return %c0_i32, %c0_i32_0 : i32, i32
  }
  func.func @transform_2(%arg0: i32) -> (i32, i32) {
    %c0_i32 = arith.constant 0 : i32
    %c0_i32_0 = arith.constant 0 : i32
    %c0_i32_1 = arith.constant 0 : i32
    return %c0_i32, %c0_i32_0 : i32, i32
  }
  func.func @transform_3(%arg0: i32) -> (i32, i32) {
    %c0_i32 = arith.constant 0 : i32
    %c0_i32_0 = arith.constant 0 : i32
    return %arg0, %c0_i32 : i32, i32
  }
}

</mosaic_0001>

<bundles_post_ra>
// kernel: forward.5
= control target key start
LH: loop header
LB: loop body
LE: loop exit
PB: predicated region body
PF: predicated region fallthrough
CT: control target
= control target key end

     0   :  { %s2581_s12 = smov 0   ;;  %s3139_s0 = inlined_call_operand.vmem [shape: bf16[2208,128], index: 0, kind: input, shape index: {}]   ;;  %s3140_s1 = inlined_call_operand.vmem [shape: bf16[128,128], index: 1, kind: input, shape index: {}]   ;;  %s3141_s2 = inlined_call_operand.vmem [shape: f32[1,128], index: 2, kind: input, shape index: {}]   ;;  %s3142_s3 = inlined_call_operand.vmem [shape: f32[2208,128], index: 3, kind: output, shape index: {}]  }
   0x1 LB: > { %s1991_s13 = sadd.s32 4294967295, %s2557_s12   ;;  %p1995_p0 = scmp.ge.s32.totalorder %s2557_s12, 1  ;;  %s2557_s12 = sphi %s2581_s12, %s13_s12  }
   0x2   : > { %p138_p1 = scmp.lt.s32.totalorder %s2557_s12, 3 }
   0x4   : > { %p139_p2 = pnand %p1995_p0, %p138_p1 }
   0x5   : > { %v2473_v0 = vld [vmem:[%s3140_s1] sm:$0xff] (!%p139_p2)   ;;  %v2559_v1 = vmov (!%p139_p2), 0.0   ;;  %v2474_v2 = vld [vmem:[%s3140_s1 + $0x8] sm:$0xff] (!%p139_p2)   ;;  %s162_s18 = smul.u32 (!%p139_p2), 138, %s1991_s13  ;;  %vm2560_vm0 = vmmov (!%p139_p2), 0   ;;  %v2475_v3 = vld [vmem:[%s3140_s1 + $0x10] sm:$0xff] (!%p139_p2)  }
   0x6   : > { %142 = sbr.rel (%p139_p2) target bundleno = 530 (0x212), region = 32  ;;  %2155 = vmatprep.subr.bf16.mxu0 (!%p139_p2), %v2559_v1  ;;  %2447 = vmatprep.subr.bf16.mxu1 (!%p139_p2), %v2559_v1  ;;  %v2476_v4 = vld [vmem:[%s3140_s1 + $0x18] sm:$0xff] (!%p139_p2)   ;;  %v2477_v5 = vld [vmem:[%s3140_s1 + $0x20] sm:$0xff] (!%p139_p2)   ;;  %v2478_v6 = vld [vmem:[%s3140_s1 + $0x28] sm:$0xff] (!%p139_p2)  }
   0x7   : > { %2156 = vmatpush3.bf16.msra.mxu0 (!%p139_p2), %v2473_v0  ;;  %2455 = vmatpush3.bf16.msra.mxu1 (!%p139_p2), %v2473_v0  ;;  %p163_p3 = scmp.lt.s32.totalorder (!%p139_p2), %s162_s18, 275  ;;  %v2479_v7 = vld [vmem:[%s3140_s1 + $0x30] sm:$0xff] (!%p139_p2)   ;;  %v2480_v8 = vld [vmem:[%s3140_s1 + $0x38] sm:$0xff] (!%p139_p2)   ;;  %v2802_v63 = vld [vmem:[%s3141_s2] ss:$0 sm:$0xff] (!%p139_p2) }
   0x8   : > { %2157 = vmatprep.subr.bf16.mxu0 (!%p139_p2), %v2559_v1  ;;  %2448 = vmatprep.subr.bf16.mxu1 (!%p139_p2), %v2559_v1 }
   0x9   : > { %2171 = vmatprep.mubr.msk.bf16.mxu0 (!%p139_p2), %vm2560_vm0, %v2559_v1  ;;  %2311 = vmatprep.mubr.msk.bf16.mxu1 (!%p139_p2), %vm2560_vm0, %v2559_v1 }
   0xb   : > { %2158 = vmatpush3.bf16.msra.mxu0 (!%p139_p2), %v2474_v2  ;;  %2456 = vmatpush3.bf16.msra.mxu1 (!%p139_p2), %v2474_v2 }
   0xc   : > { %2159 = vmatprep.subr.bf16.mxu0 (!%p139_p2), %v2559_v1  ;;  %2449 = vmatprep.subr.bf16.mxu1 (!%p139_p2), %v2559_v1 }
   0xd   : > { %s3144_s18 = smov (!%p163_p3, %s162_s18), 275 }
   0xe   : > { %s1996_s21 = sshll.u32 %s3144_s18, 2  ;;  %s1997_s10 = sshll.u32 %s3144_s18, 3 }
   0xf   : > { %s2614_s24 = scalar_lea.vmem %s3139_s0, %s1996_s21  ;;  %2160 = vmatpush3.bf16.msra.mxu0 %v2475_v3  ;;  %2457 = vmatpush3.bf16.msra.mxu1 %v2475_v3  ;;  %s2816_s14 = scalar_lea.vmem %s3142_s3, %s1997_s10 }
  0x10   : > { %2161 = vmatprep.subr.bf16.mxu0 %v2559_v1  ;;  %2450 = vmatprep.subr.bf16.mxu1 %v2559_v1  ;;  %v2481_v9 = vld [vmem:[%s2614_s24] sm:$0xff]   ;;  %v2482_v10 = vld [vmem:[%s2614_s24 + $0x118] sm:$0xff]   ;;  %v2483_v11 = vld [vmem:[%s2614_s24 + $0x8] sm:$0xff]  }
  0x11   : > { %v2484_v12 = vld [vmem:[%s2614_s24 + $0x120] sm:$0xff]   ;;  %v2485_v13 = vld [vmem:[%s2614_s24 + $0x10] sm:$0xff]   ;;  %v2486_v14 = vld [vmem:[%s2614_s24 + $0x128] sm:$0xff]  }
  0x12   : > { %v2487_v15 = vld [vmem:[%s2614_s24 + $0x18] sm:$0xff]   ;;  %v2488_v16 = vld [vmem:[%s2614_s24 + $0x130] sm:$0xff]   ;;  %v2489_v17 = vld [vmem:[%s2614_s24 + $0x20] sm:$0xff]  }
  0x13   : > { %2162 = vmatpush3.bf16.msra.mxu0 %v2476_v4  ;;  %2458 = vmatpush3.bf16.msra.mxu1 %v2476_v4  ;;  %v2490_v18 = vld [vmem:[%s2614_s24 + $0x138] sm:$0xff]   ;;  %v2491_v19 = vld [vmem:[%s2614_s24 + $0x28] sm:$0xff]   ;;  %v2492_v20 = vld [vmem:[%s2614_s24 + $0x140] sm:$0xff]  }
  0x14   : > { %2163 = vmatprep.subr.bf16.mxu0 %v2559_v1  ;;  %2451 = vmatprep.subr.bf16.mxu1 %v2559_v1  ;;  %v2493_v21 = vld [vmem:[%s2614_s24 + $0x30] sm:$0xff]   ;;  %v2494_v22 = vld [vmem:[%s2614_s24 + $0x148] sm:$0xff]   ;;  %v2495_v23 = vld [vmem:[%s2614_s24 + $0x38] sm:$0xff]  }
  0x15   : > { %v2496_v24 = vld [vmem:[%s2614_s24 + $0x150] sm:$0xff]   ;;  %v2497_v25 = vld [vmem:[%s2614_s24 + $0x40] sm:$0xff]   ;;  %v2498_v26 = vld [vmem:[%s2614_s24 + $0x158] sm:$0xff]  }
  0x16   : > { %v2499_v27 = vld [vmem:[%s2614_s24 + $0x48] sm:$0xff]   ;;  %v2500_v28 = vld [vmem:[%s2614_s24 + $0x160] sm:$0xff]   ;;  %v2501_v29 = vld [vmem:[%s2614_s24 + $0x50] sm:$0xff]  }
  0x17   : > { %2164 = vmatpush3.bf16.msra.mxu0 %v2477_v5  ;;  %2459 = vmatpush3.bf16.msra.mxu1 %v2477_v5  ;;  %v2502_v30 = vld [vmem:[%s2614_s24 + $0x168] sm:$0xff]   ;;  %v2503_v31 = vld [vmem:[%s2614_s24 + $0x58] sm:$0xff]   ;;  %v2504_v32 = vld [vmem:[%s2614_s24 + $0x170] sm:$0xff]  }
  0x18   : > { %2165 = vmatprep.subr.bf16.mxu0 %v2559_v1  ;;  %2452 = vmatprep.subr.bf16.mxu1 %v2559_v1  ;;  %v2505_v33 = vld [vmem:[%s2614_s24 + $0x60] sm:$0xff]   ;;  %v2506_v34 = vld [vmem:[%s2614_s24 + $0x178] sm:$0xff]   ;;  %v2507_v35 = vld [vmem:[%s2614_s24 + $0x68] sm:$0xff]  }
  0x19   : > { %v2508_v36 = vld [vmem:[%s2614_s24 + $0x180] sm:$0xff]   ;;  %v2509_v37 = vld [vmem:[%s2614_s24 + $0x70] sm:$0xff]   ;;  %v2510_v38 = vld [vmem:[%s2614_s24 + $0x188] sm:$0xff]  }
  0x1a   : > { %v2511_v39 = vld [vmem:[%s2614_s24 + $0x78] sm:$0xff]   ;;  %v2512_v40 = vld [vmem:[%s2614_s24 + $0x190] sm:$0xff]   ;;  %v2513_v41 = vld [vmem:[%s2614_s24 + $0x80] sm:$0xff]  }
  0x1b   : > { %2166 = vmatpush3.bf16.msra.mxu0 %v2478_v6  ;;  %2460 = vmatpush3.bf16.msra.mxu1 %v2478_v6  ;;  %v2514_v42 = vld [vmem:[%s2614_s24 + $0x198] sm:$0xff]   ;;  %v2515_v43 = vld [vmem:[%s2614_s24 + $0x88] sm:$0xff]   ;;  %v2516_v44 = vld [vmem:[%s2614_s24 + $0x1a0] sm:$0xff]  }
  0x1c   : > { %2167 = vmatprep.subr.bf16.mxu0 %v2559_v1  ;;  %2453 = vmatprep.subr.bf16.mxu1 %v2559_v1  ;;  %v2517_v45 = vld [vmem:[%s2614_s24 + $0x90] sm:$0xff]   ;;  %v2518_v46 = vld [vmem:[%s2614_s24 + $0x1a8] sm:$0xff]   ;;  %v2519_v47 = vld [vmem:[%s2614_s24 + $0x98] sm:$0xff]  }
  0x1d   : > { %v2520_v48 = vld [vmem:[%s2614_s24 + $0x1b0] sm:$0xff]   ;;  %v2521_v49 = vld [vmem:[%s2614_s24 + $0xa0] sm:$0xff]   ;;  %v2522_v50 = vld [vmem:[%s2614_s24 + $0x1b8] sm:$0xff]  }
  0x1e   : > { %v2523_v51 = vld [vmem:[%s2614_s24 + $0xa8] sm:$0xff]   ;;  %v2524_v52 = vld [vmem:[%s2614_s24 + $0x1c0] sm:$0xff]   ;;  %v2525_v53 = vld [vmem:[%s2614_s24 + $0xb0] sm:$0xff]  }
  0x1f   : > { %2168 = vmatpush3.bf16.msra.mxu0 %v2479_v7  ;;  %2461 = vmatpush3.bf16.msra.mxu1 %v2479_v7  ;;  %v2526_v54 = vld [vmem:[%s2614_s24 + $0x1c8] sm:$0xff]   ;;  %v2527_v55 = vld [vmem:[%s2614_s24 + $0xb8] sm:$0xff]   ;;  %v2528_v56 = vld [vmem:[%s2614_s24 + $0x1d0] sm:$0xff]  }
  0x20   : > { %2169 = vmatprep.subr.bf16.mxu0 %v2559_v1  ;;  %2454 = vmatprep.subr.bf16.mxu1 %v2559_v1  ;;  %v2529_v57 = vld [vmem:[%s2614_s24 + $0xc0] sm:$0xff]   ;;  %v2530_v58 = vld [vmem:[%s2614_s24 + $0x1d8] sm:$0xff]   ;;  %v2531_v59 = vld [vmem:[%s2614_s24 + $0xc8] sm:$0xff]  }
  0x21   : > { %v2532_v60 = vld [vmem:[%s2614_s24 + $0x1e0] sm:$0xff]   ;;  %v2533_v61 = vld [vmem:[%s2614_s24 + $0xd0] sm:$0xff]   ;;  %v2534_v62 = vld [vmem:[%s2614_s24 + $0x1e8] sm:$0xff]  }
  0x22   : > { %v2535_v6 = vld [vmem:[%s2614_s24 + $0xd8] sm:$0xff]  }
  0x23   : > { %2170 = vmatpush3.bf16.msra.mxu0 %v2480_v8  ;;  %2462 = vmatpush3.bf16.msra.mxu1 %v2480_v8  ;;  %v2536_v8 = vld [vmem:[%s2614_s24 + $0x1f0] sm:$0xff]  }
  0x26   : > { %2172 = vmatmul.mubr.bf16.vlgmr.msra.gmra.mrb[0].mxu0 %v2481_v9  ;;  %2312 = vmatmul.mubr.bf16.vlgmr.msra.gmra.mrb[0].mxu1 %v2482_v10 }
  0x27   : > { %2175 = vmatprep.mubr.msk.bf16.mxu0 %vm2560_vm0, %v2559_v1  ;;  %2315 = vmatprep.mubr.msk.bf16.mxu1 %vm2560_vm0, %v2559_v1 }
  0x2e   : > { %2176 = vmatmul.mubr.bf16.gmra.mrb[4].mxu0 %v2483_v11  ;;  %2316 = vmatmul.mubr.bf16.gmra.mrb[4].mxu1 %v2484_v12 }
  0x2f   : > { %2179 = vmatprep.mubr.msk.bf16.mxu0 %vm2560_vm0, %v2559_v1  ;;  %2319 = vmatprep.mubr.msk.bf16.mxu1 %vm2560_vm0, %v2559_v1 }
  0x36   : > { %2180 = vmatmul.mubr.bf16.gmra.mrb[8].mxu0 %v2485_v13  ;;  %2320 = vmatmul.mubr.bf16.gmra.mrb[8].mxu1 %v2486_v14 }
  0x37   : > { %2183 = vmatprep.mubr.msk.bf16.mxu0 %vm2560_vm0, %v2559_v1  ;;  %2323 = vmatprep.mubr.msk.bf16.mxu1 %vm2560_vm0, %v2559_v1 }
  0x3e   : > { %2184 = vmatmul.mubr.bf16.gmra.mrb[12].mxu0 %v2487_v15  ;;  %2324 = vmatmul.mubr.bf16.gmra.mrb[12].mxu1 %v2488_v16 }
  0x3f   : > { %2187 = vmatprep.mubr.msk.bf16.mxu0 %vm2560_vm0, %v2559_v1  ;;  %2327 = vmatprep.mubr.msk.bf16.mxu1 %vm2560_vm0, %v2559_v1 }
  0x46   : > { %2188 = vmatmul.mubr.bf16.gmra.mrb[16].mxu0 %v2489_v17  ;;  %2328 = vmatmul.mubr.bf16.gmra.mrb[16].mxu1 %v2490_v18 }
  0x47   : > { %2191 = vmatprep.mubr.msk.bf16.mxu0 %vm2560_vm0, %v2559_v1  ;;  %2331 = vmatprep.mubr.msk.bf16.mxu1 %vm2560_vm0, %v2559_v1 }
  0x4e   : > { %2192 = vmatmul.mubr.bf16.gmra.mrb[20].mxu0 %v2491_v19  ;;  %2332 = vmatmul.mubr.bf16.gmra.mrb[20].mxu1 %v2492_v20 }
  0x4f   : > { %2195 = vmatprep.mubr.msk.bf16.mxu0 %vm2560_vm0, %v2559_v1  ;;  %2335 = vmatprep.mubr.msk.bf16.mxu1 %vm2560_vm0, %v2559_v1 }
  0x56   : > { %2196 = vmatmul.mubr.bf16.gmra.mrb[24].mxu0 %v2493_v21  ;;  %2336 = vmatmul.mubr.bf16.gmra.mrb[24].mxu1 %v2494_v22 }
  0x57   : > { %2199 = vmatprep.mubr.msk.bf16.mxu0 %vm2560_vm0, %v2559_v1  ;;  %2339 = vmatprep.mubr.msk.bf16.mxu1 %vm2560_vm0, %v2559_v1 }
  0x5e   : > { %2200 = vmatmul.mubr.bf16.gmra.mrb[28].mxu0 %v2495_v23  ;;  %2340 = vmatmul.mubr.bf16.gmra.mrb[28].mxu1 %v2496_v24 }
  0x5f   : > { %2203 = vmatprep.mubr.msk.bf16.mxu0 %vm2560_vm0, %v2559_v1  ;;  %2343 = vmatprep.mubr.msk.bf16.mxu1 %vm2560_vm0, %v2559_v1 }
  0x66   : > { %2204 = vmatmul.mubr.bf16.gmra.mrb[32].mxu0 %v2497_v25  ;;  %2344 = vmatmul.mubr.bf16.gmra.mrb[32].mxu1 %v2498_v26 }
  0x67   : > { %2207 = vmatprep.mubr.msk.bf16.mxu0 %vm2560_vm0, %v2559_v1  ;;  %2347 = vmatprep.mubr.msk.bf16.mxu1 %vm2560_vm0, %v2559_v1 }
  0x6e   : > { %2208 = vmatmul.mubr.bf16.gmra.mrb[36].mxu0 %v2499_v27  ;;  %2348 = vmatmul.mubr.bf16.gmra.mrb[36].mxu1 %v2500_v28  ;;  %v2537_v28 = vld [vmem:[%s2614_s24 + $0xe0] sm:$0xff]  }
  0x6f   : > { %2211 = vmatprep.mubr.msk.bf16.mxu0 %vm2560_vm0, %v2559_v1  ;;  %2351 = vmatprep.mubr.msk.bf16.mxu1 %vm2560_vm0, %v2559_v1 }
  0x76   : > { %2212 = vmatmul.mubr.bf16.gmra.mrb[40].mxu0 %v2501_v29  ;;  %2352 = vmatmul.mubr.bf16.gmra.mrb[40].mxu1 %v2502_v30  ;;  %v2538_v30 = vld [vmem:[%s2614_s24 + $0x1f8] sm:$0xff]  }
  0x77   : > { %2215 = vmatprep.mubr.msk.bf16.mxu0 %vm2560_vm0, %v2559_v1  ;;  %2355 = vmatprep.mubr.msk.bf16.mxu1 %vm2560_vm0, %v2559_v1 }
  0x7e   : > { %2216 = vmatmul.mubr.bf16.gmra.mrb[44].mxu0 %v2503_v31  ;;  %2356 = vmatmul.mubr.bf16.gmra.mrb[44].mxu1 %v2504_v32 }
  0x7f   : > { %2219 = vmatprep.mubr.msk.bf16.mxu0 %vm2560_vm0, %v2559_v1  ;;  %2359 = vmatprep.mubr.msk.bf16.mxu1 %vm2560_vm0, %v2559_v1 }
  0x86   : > { %2220 = vmatmul.mubr.bf16.gmra.mrb[48].mxu0 %v2505_v33  ;;  %2360 = vmatmul.mubr.bf16.gmra.mrb[48].mxu1 %v2506_v34 }
  0x87   : > { %2223 = vmatprep.mubr.msk.bf16.mxu0 %vm2560_vm0, %v2559_v1  ;;  %2363 = vmatprep.mubr.msk.bf16.mxu1 %vm2560_vm0, %v2559_v1 }
  0x8e   : > { %2224 = vmatmul.mubr.bf16.gmra.mrb[52].mxu0 %v2507_v35  ;;  %2364 = vmatmul.mubr.bf16.gmra.mrb[52].mxu1 %v2508_v36 }
  0x8f   : > { %2227 = vmatprep.mubr.msk.bf16.mxu0 %vm2560_vm0, %v2559_v1  ;;  %2367 = vmatprep.mubr.msk.bf16.mxu1 %vm2560_vm0, %v2559_v1 }
  0x96   : > { %2228 = vmatmul.mubr.bf16.gmra.mrb[56].mxu0 %v2509_v37  ;;  %2368 = vmatmul.mubr.bf16.gmra.mrb[56].mxu1 %v2510_v38 }
  0x97   : > { %2231 = vmatprep.mubr.msk.bf16.mxu0 %vm2560_vm0, %v2559_v1  ;;  %2371 = vmatprep.mubr.msk.bf16.mxu1 %vm2560_vm0, %v2559_v1 }
  0x9e   : > { %2232 = vmatmul.mubr.bf16.gmra.mrb[60].mxu0 %v2511_v39  ;;  %2372 = vmatmul.mubr.bf16.gmra.mrb[60].mxu1 %v2512_v40 }
  0x9f   : > { %2235 = vmatprep.mubr.msk.bf16.mxu0 %vm2560_vm0, %v2559_v1  ;;  %2375 = vmatprep.mubr.msk.bf16.mxu1 %vm2560_vm0, %v2559_v1 }
  0xa6   : > { %2236 = vmatmul.mubr.bf16.gmra.mrb[64].mxu0 %v2513_v41  ;;  %2376 = vmatmul.mubr.bf16.gmra.mrb[64].mxu1 %v2514_v42 }
  0xa7   : > { %2239 = vmatprep.mubr.msk.bf16.mxu0 %vm2560_vm0, %v2559_v1  ;;  %2379 = vmatprep.mubr.msk.bf16.mxu1 %vm2560_vm0, %v2559_v1 }
  0xae   : > { %2240 = vmatmul.mubr.bf16.gmra.mrb[68].mxu0 %v2515_v43  ;;  %2380 = vmatmul.mubr.bf16.gmra.mrb[68].mxu1 %v2516_v44 }
  0xaf   : > { %2243 = vmatprep.mubr.msk.bf16.mxu0 %vm2560_vm0, %v2559_v1  ;;  %2383 = vmatprep.mubr.msk.bf16.mxu1 %vm2560_vm0, %v2559_v1 }
  0xb6   : > { %2244 = vmatmul.mubr.bf16.gmra.mrb[72].mxu0 %v2517_v45  ;;  %2384 = vmatmul.mubr.bf16.gmra.mrb[72].mxu1 %v2518_v46 }
  0xb7   : > { %2247 = vmatprep.mubr.msk.bf16.mxu0 %vm2560_vm0, %v2559_v1  ;;  %2387 = vmatprep.mubr.msk.bf16.mxu1 %vm2560_vm0, %v2559_v1 }
  0xbe   : > { %2248 = vmatmul.mubr.bf16.gmra.mrb[76].mxu0 %v2519_v47  ;;  %2388 = vmatmul.mubr.bf16.gmra.mrb[76].mxu1 %v2520_v48 }
  0xbf   : > { %2251 = vmatprep.mubr.msk.bf16.mxu0 %vm2560_vm0, %v2559_v1  ;;  %2391 = vmatprep.mubr.msk.bf16.mxu1 %vm2560_vm0, %v2559_v1 }
  0xc6   : > { %2252 = vmatmul.mubr.bf16.gmra.mrb[80].mxu0 %v2521_v49  ;;  %2392 = vmatmul.mubr.bf16.gmra.mrb[80].mxu1 %v2522_v50  ;;  %v2539_v50 = vld [vmem:[%s2614_s24 + $0xe8] sm:$0xff]  }
  0xc7   : > { %2255 = vmatprep.mubr.msk.bf16.mxu0 %vm2560_vm0, %v2559_v1  ;;  %2395 = vmatprep.mubr.msk.bf16.mxu1 %vm2560_vm0, %v2559_v1 }
  0xce   : > { %2256 = vmatmul.mubr.bf16.gmra.mrb[84].mxu0 %v2523_v51  ;;  %2396 = vmatmul.mubr.bf16.gmra.mrb[84].mxu1 %v2524_v52  ;;  %v2540_v52 = vld [vmem:[%s2614_s24 + $0x200] sm:$0xff]  }
  0xcf   : > { %2259 = vmatprep.mubr.msk.bf16.mxu0 %vm2560_vm0, %v2559_v1  ;;  %2399 = vmatprep.mubr.msk.bf16.mxu1 %vm2560_vm0, %v2559_v1 }
  0xd6   : > { %2260 = vmatmul.mubr.bf16.gmra.mrb[88].mxu0 %v2525_v53  ;;  %2400 = vmatmul.mubr.bf16.gmra.mrb[88].mxu1 %v2526_v54 }
  0xd7   : > { %2263 = vmatprep.mubr.msk.bf16.mxu0 %vm2560_vm0, %v2559_v1  ;;  %2403 = vmatprep.mubr.msk.bf16.mxu1 %vm2560_vm0, %v2559_v1 }
  0xde   : > { %2264 = vmatmul.mubr.bf16.gmra.mrb[92].mxu0 %v2527_v55  ;;  %2404 = vmatmul.mubr.bf16.gmra.mrb[92].mxu1 %v2528_v56 }
  0xdf   : > { %2267 = vmatprep.mubr.msk.bf16.mxu0 %vm2560_vm0, %v2559_v1  ;;  %2407 = vmatprep.mubr.msk.bf16.mxu1 %vm2560_vm0, %v2559_v1 }
  0xe6   : > { %2268 = vmatmul.mubr.bf16.gmra.mrb[96].mxu0 %v2529_v57  ;;  %2408 = vmatmul.mubr.bf16.gmra.mrb[96].mxu1 %v2530_v58 }
  0xe7   : > { %2271 = vmatprep.mubr.msk.bf16.mxu0 %vm2560_vm0, %v2559_v1  ;;  %2411 = vmatprep.mubr.msk.bf16.mxu1 %vm2560_vm0, %v2559_v1 }
  0xee   : > { %2272 = vmatmul.mubr.bf16.gmra.mrb[100].mxu0 %v2531_v59  ;;  %2412 = vmatmul.mubr.bf16.gmra.mrb[100].mxu1 %v2532_v60 }
  0xef   : > { %2275 = vmatprep.mubr.msk.bf16.mxu0 %vm2560_vm0, %v2559_v1  ;;  %2415 = vmatprep.mubr.msk.bf16.mxu1 %vm2560_vm0, %v2559_v1 }
  0xf6   : > { %2276 = vmatmul.mubr.bf16.gmra.mrb[104].mxu0 %v2533_v61  ;;  %2416 = vmatmul.mubr.bf16.gmra.mrb[104].mxu1 %v2534_v62 }
  0xf7   : > { %2279 = vmatprep.mubr.msk.bf16.mxu0 %vm2560_vm0, %v2559_v1  ;;  %2419 = vmatprep.mubr.msk.bf16.mxu1 %vm2560_vm0, %v2559_v1 }
  0xf9   : > { %v832_v0 = vpop.f32.mrb[0].mxu0  ;;  %v1112_v2 = vpop.f32.mrb[0].mxu1 }
  0xfa   : > { %v833_v3 = vadd.f32 %v2802_v63, %v832_v0  ;;  %v2173_v4 = vpop.f32.mrb[1].mxu0  ;;  %v1113_v5 = vadd.f32 %v2802_v63, %v1112_v2  ;;  %v2313_v7 = vpop.f32.mrb[1].mxu1 }
  0xfb   : > { %v835_v9 = vpop.f32.mrb[2].mxu0  ;;  %v1115_v10 = vpop.f32.mrb[2].mxu1 }
  0xfc   : > { %vm1383_vm1 = vcmp.gt.f32.partialorder %v833_v3, 0.0  ;;  %v1521_v11 = vmul.f32 0.01, %v833_v3  ;;  %v836_v12 = vadd.f32 %v2802_v63, %v835_v9  ;;  %v2174_v13 = vpop.f32.mrb[3].mxu0  ;;  %vm1453_vm2 = vcmp.gt.f32.partialorder %v1113_v5, 0.0  ;;  %v2314_v14 = vpop.f32.mrb[3].mxu1 }
  0xfd   : > { %v1591_v15 = vmul.f32 0.01, %v1113_v5  ;;  %v1116_v16 = vadd.f32 %v2802_v63, %v1115_v10  ;;  %v2541_v10 = vld [vmem:[%s2614_s24 + $0xf0] sm:$0xff]  }
  0xfe   : > { %v1659_v17 = vsel %vm1383_vm1, %v833_v3, %v1521_v11  ;;  %vm1384_vm3 = vcmp.gt.f32.partialorder %v836_v12, 0.0  ;;  %v1522_v18 = vmul.f32 0.01, %v836_v12  ;;  %2280 = vmatmul.mubr.bf16.gmra.mrb[108].mxu0 %v2535_v6  ;;  %2420 = vmatmul.mubr.bf16.gmra.mrb[108].mxu1 %v2536_v8 }
  0xff   : > { %1797 = vst [vmem:[%s2816_s14] sm:$0xff] %v1659_v17  ;;  %v1729_v19 = vsel %vm1453_vm2, %v1113_v5, %v1591_v15  ;;  %vm1454_vm4 = vcmp.gt.f32.partialorder %v1116_v16, 0.0  ;;  %v1592_v20 = vmul.f32 0.01, %v1116_v16  ;;  %2283 = vmatprep.mubr.msk.bf16.mxu0 %vm2560_vm0, %v2559_v1  ;;  %2423 = vmatprep.mubr.msk.bf16.mxu1 %vm2560_vm0, %v2559_v1 }
 0x100   : > { %v1660_v21 = vsel %vm1384_vm3, %v836_v12, %v1522_v18  ;;  %1867 = vst [vmem:[%s2816_s14 + $0x230] sm:$0xff] %v1729_v19  ;;  %v2542_v12 = vld [vmem:[%s2614_s24 + $0x208] sm:$0xff]  }
 0x101   : > { %1798 = vst [vmem:[%s2816_s14 + $0x8] sm:$0xff] %v1660_v21  ;;  %v1730_v22 = vsel %vm1454_vm4, %v1116_v16, %v1592_v20  ;;  %v840_v23 = vpop.f32.mrb[4].mxu0  ;;  %v1120_v24 = vpop.f32.mrb[4].mxu1 }
 0x102   : > { %1868 = vst [vmem:[%s2816_s14 + $0x238] sm:$0xff] %v1730_v22  ;;  %v841_v25 = vadd.f32 %v2802_v63, %v840_v23  ;;  %v2177_v26 = vpop.f32.mrb[5].mxu0  ;;  %v1121_v27 = vadd.f32 %v2802_v63, %v1120_v24  ;;  %v2317_v29 = vpop.f32.mrb[5].mxu1 }
 0x103   : > { %v843_v31 = vpop.f32.mrb[6].mxu0  ;;  %v1123_v32 = vpop.f32.mrb[6].mxu1 }
 0x104   : > { %vm1385_vm5 = vcmp.gt.f32.partialorder %v841_v25, 0.0  ;;  %v1523_v33 = vmul.f32 0.01, %v841_v25  ;;  %v844_v34 = vadd.f32 %v2802_v63, %v843_v31  ;;  %v2178_v35 = vpop.f32.mrb[7].mxu0  ;;  %vm1455_vm6 = vcmp.gt.f32.partialorder %v1121_v27, 0.0  ;;  %v2318_v36 = vpop.f32.mrb[7].mxu1 }
 0x105   : > { %v1593_v37 = vmul.f32 0.01, %v1121_v27  ;;  %v1124_v38 = vadd.f32 %v2802_v63, %v1123_v32  ;;  %v2543_v32 = vld [vmem:[%s2614_s24 + $0xf8] sm:$0xff]  }
 0x106   : > { %v1661_v39 = vsel %vm1385_vm5, %v841_v25, %v1523_v33  ;;  %vm1386_vm7 = vcmp.gt.f32.partialorder %v844_v34, 0.0  ;;  %v1524_v40 = vmul.f32 0.01, %v844_v34  ;;  %2284 = vmatmul.mubr.bf16.gmra.mrb[112].mxu0 %v2537_v28  ;;  %2424 = vmatmul.mubr.bf16.gmra.mrb[112].mxu1 %v2538_v30 }
 0x107   : > { %1799 = vst [vmem:[%s2816_s14 + $0x10] sm:$0xff] %v1661_v39  ;;  %v1731_v41 = vsel %vm1455_vm6, %v1121_v27, %v1593_v37  ;;  %vm1456_vm8 = vcmp.gt.f32.partialorder %v1124_v38, 0.0  ;;  %v1594_v42 = vmul.f32 0.01, %v1124_v38  ;;  %2287 = vmatprep.mubr.msk.bf16.mxu0 %vm2560_vm0, %v2559_v1  ;;  %2427 = vmatprep.mubr.msk.bf16.mxu1 %vm2560_vm0, %v2559_v1 }
 0x108   : > { %v1662_v43 = vsel %vm1386_vm7, %v844_v34, %v1524_v40  ;;  %1869 = vst [vmem:[%s2816_s14 + $0x240] sm:$0xff] %v1731_v41  ;;  %v2544_v34 = vld [vmem:[%s2614_s24 + $0x210] sm:$0xff]  }
 0x109   : > { %1800 = vst [vmem:[%s2816_s14 + $0x18] sm:$0xff] %v1662_v43  ;;  %v1732_v44 = vsel %vm1456_vm8, %v1124_v38, %v1594_v42  ;;  %v848_v45 = vpop.f32.mrb[8].mxu0  ;;  %v1128_v46 = vpop.f32.mrb[8].mxu1 }
 0x10a   : > { %1870 = vst [vmem:[%s2816_s14 + $0x248] sm:$0xff] %v1732_v44  ;;  %v849_v47 = vadd.f32 %v2802_v63, %v848_v45  ;;  %v2181_v48 = vpop.f32.mrb[9].mxu0  ;;  %v1129_v49 = vadd.f32 %v2802_v63, %v1128_v46  ;;  %v2321_v51 = vpop.f32.mrb[9].mxu1 }
 0x10b   : > { %v851_v53 = vpop.f32.mrb[10].mxu0  ;;  %v1131_v54 = vpop.f32.mrb[10].mxu1 }
 0x10c   : > { %vm1387_vm9 = vcmp.gt.f32.partialorder %v849_v47, 0.0  ;;  %v1525_v55 = vmul.f32 0.01, %v849_v47  ;;  %v852_v56 = vadd.f32 %v2802_v63, %v851_v53  ;;  %v2182_v57 = vpop.f32.mrb[11].mxu0  ;;  %vm1457_vm10 = vcmp.gt.f32.partialorder %v1129_v49, 0.0  ;;  %v2322_v58 = vpop.f32.mrb[11].mxu1 }
 0x10d   : > { %v1595_v59 = vmul.f32 0.01, %v1129_v49  ;;  %v1132_v60 = vadd.f32 %v2802_v63, %v1131_v54  ;;  %v2545_v54 = vld [vmem:[%s2614_s24 + $0x100] sm:$0xff]  }
 0x10e   : > { %v1663_v61 = vsel %vm1387_vm9, %v849_v47, %v1525_v55  ;;  %vm1388_vm11 = vcmp.gt.f32.partialorder %v852_v56, 0.0  ;;  %v1526_v62 = vmul.f32 0.01, %v852_v56  ;;  %2288 = vmatmul.mubr.bf16.gmra.mrb[116].mxu0 %v2539_v50  ;;  %2428 = vmatmul.mubr.bf16.gmra.mrb[116].mxu1 %v2540_v52 }
 0x10f   : > { %1801 = vst [vmem:[%s2816_s14 + $0x20] sm:$0xff] %v1663_v61  ;;  %v1733_v0 = vsel %vm1457_vm10, %v1129_v49, %v1595_v59  ;;  %vm1458_vm12 = vcmp.gt.f32.partialorder %v1132_v60, 0.0  ;;  %v1596_v2 = vmul.f32 0.01, %v1132_v60  ;;  %2291 = vmatprep.mubr.msk.bf16.mxu0 %vm2560_vm0, %v2559_v1  ;;  %2431 = vmatprep.mubr.msk.bf16.mxu1 %vm2560_vm0, %v2559_v1 }
 0x110   : > { %v1664_v3 = vsel %vm1388_vm11, %v852_v56, %v1526_v62  ;;  %1871 = vst [vmem:[%s2816_s14 + $0x250] sm:$0xff] %v1733_v0  ;;  %v2546_v56 = vld [vmem:[%s2614_s24 + $0x218] sm:$0xff]  }
 0x111   : > { %1802 = vst [vmem:[%s2816_s14 + $0x28] sm:$0xff] %v1664_v3  ;;  %v1734_v4 = vsel %vm1458_vm12, %v1132_v60, %v1596_v2  ;;  %v856_v5 = vpop.f32.mrb[12].mxu0  ;;  %v1136_v6 = vpop.f32.mrb[12].mxu1 }
 0x112   : > { %1872 = vst [vmem:[%s2816_s14 + $0x258] sm:$0xff] %v1734_v4  ;;  %v857_v7 = vadd.f32 %v2802_v63, %v856_v5  ;;  %v2185_v8 = vpop.f32.mrb[13].mxu0  ;;  %v1137_v9 = vadd.f32 %v2802_v63, %v1136_v6  ;;  %v2325_v11 = vpop.f32.mrb[13].mxu1 }
 0x113   : > { %v859_v13 = vpop.f32.mrb[14].mxu0  ;;  %v1139_v14 = vpop.f32.mrb[14].mxu1 }
 0x114   : > { %vm1389_vm13 = vcmp.gt.f32.partialorder %v857_v7, 0.0  ;;  %v1527_v15 = vmul.f32 0.01, %v857_v7  ;;  %v860_v16 = vadd.f32 %v2802_v63, %v859_v13  ;;  %v2186_v17 = vpop.f32.mrb[15].mxu0  ;;  %vm1459_vm14 = vcmp.gt.f32.partialorder %v1137_v9, 0.0  ;;  %v2326_v18 = vpop.f32.mrb[15].mxu1 }
 0x115   : > { %v1597_v19 = vmul.f32 0.01, %v1137_v9  ;;  %v1140_v20 = vadd.f32 %v2802_v63, %v1139_v14  ;;  %v2547_v14 = vld [vmem:[%s2614_s24 + $0x108] sm:$0xff]  }
 0x116   : > { %v1665_v21 = vsel %vm1389_vm13, %v857_v7, %v1527_v15  ;;  %vm1390_vm15 = vcmp.gt.f32.partialorder %v860_v16, 0.0  ;;  %v1528_v22 = vmul.f32 0.01, %v860_v16  ;;  %2292 = vmatmul.mubr.bf16.gmra.mrb[120].mxu0 %v2541_v10  ;;  %2432 = vmatmul.mubr.bf16.gmra.mrb[120].mxu1 %v2542_v12 }
 0x117   : > { %1803 = vst [vmem:[%s2816_s14 + $0x30] sm:$0xff] %v1665_v21  ;;  %v1735_v23 = vsel %vm1459_vm14, %v1137_v9, %v1597_v19  ;;  %vm1460_vm1 = vcmp.gt.f32.partialorder %v1140_v20, 0.0  ;;  %v1598_v24 = vmul.f32 0.01, %v1140_v20  ;;  %2295 = vmatprep.mubr.msk.bf16.mxu0 %vm2560_vm0, %v2559_v1  ;;  %2435 = vmatprep.mubr.msk.bf16.mxu1 %vm2560_vm0, %v2559_v1 }
 0x118   : > { %v1666_v25 = vsel %vm1390_vm15, %v860_v16, %v1528_v22  ;;  %1873 = vst [vmem:[%s2816_s14 + $0x260] sm:$0xff] %v1735_v23  ;;  %v2548_v16 = vld [vmem:[%s2614_s24 + $0x220] sm:$0xff]  }
 0x119   : > { %1804 = vst [vmem:[%s2816_s14 + $0x38] sm:$0xff] %v1666_v25  ;;  %v1736_v26 = vsel %vm1460_vm1, %v1140_v20, %v1598_v24  ;;  %v864_v27 = vpop.f32.mrb[16].mxu0  ;;  %v1144_v28 = vpop.f32.mrb[16].mxu1 }
 0x11a   : > { %1874 = vst [vmem:[%s2816_s14 + $0x268] sm:$0xff] %v1736_v26  ;;  %v865_v29 = vadd.f32 %v2802_v63, %v864_v27  ;;  %v2189_v30 = vpop.f32.mrb[17].mxu0  ;;  %v1145_v31 = vadd.f32 %v2802_v63, %v1144_v28  ;;  %v2329_v33 = vpop.f32.mrb[17].mxu1 }
 0x11b   : > { %v867_v35 = vpop.f32.mrb[18].mxu0  ;;  %v1147_v36 = vpop.f32.mrb[18].mxu1 }
 0x11c   : > { %vm1391_vm2 = vcmp.gt.f32.partialorder %v865_v29, 0.0  ;;  %v1529_v37 = vmul.f32 0.01, %v865_v29  ;;  %v868_v38 = vadd.f32 %v2802_v63, %v867_v35  ;;  %v2190_v39 = vpop.f32.mrb[19].mxu0  ;;  %vm1461_vm3 = vcmp.gt.f32.partialorder %v1145_v31, 0.0  ;;  %v2330_v40 = vpop.f32.mrb[19].mxu1 }
 0x11d   : > { %v1599_v41 = vmul.f32 0.01, %v1145_v31  ;;  %v1148_v42 = vadd.f32 %v2802_v63, %v1147_v36  ;;  %v2549_v36 = vld [vmem:[%s2614_s24 + $0x110] sm:$0xff]  }
 0x11e   : > { %v1667_v43 = vsel %vm1391_vm2, %v865_v29, %v1529_v37  ;;  %vm1392_vm4 = vcmp.gt.f32.partialorder %v868_v38, 0.0  ;;  %v1530_v44 = vmul.f32 0.01, %v868_v38  ;;  %2296 = vmatmul.mubr.bf16.gmra.mrb[124].mxu0 %v2543_v32  ;;  %2436 = vmatmul.mubr.bf16.gmra.mrb[124].mxu1 %v2544_v34 }
 0x11f   : > { %1805 = vst [vmem:[%s2816_s14 + $0x40] sm:$0xff] %v1667_v43  ;;  %v1737_v45 = vsel %vm1461_vm3, %v1145_v31, %v1599_v41  ;;  %vm1462_vm5 = vcmp.gt.f32.partialorder %v1148_v42, 0.0  ;;  %v1600_v46 = vmul.f32 0.01, %v1148_v42  ;;  %2299 = vmatprep.mubr.msk.bf16.mxu0 %vm2560_vm0, %v2559_v1  ;;  %2439 = vmatprep.mubr.msk.bf16.mxu1 %vm2560_vm0, %v2559_v1 }
 0x120   : > { %v1668_v47 = vsel %vm1392_vm4, %v868_v38, %v1530_v44  ;;  %1875 = vst [vmem:[%s2816_s14 + $0x270] sm:$0xff] %v1737_v45 }
 0x121   : > { %1806 = vst [vmem:[%s2816_s14 + $0x48] sm:$0xff] %v1668_v47  ;;  %v1738_v48 = vsel %vm1462_vm5, %v1148_v42, %v1600_v46  ;;  %v872_v49 = vpop.f32.mrb[20].mxu0  ;;  %v1152_v50 = vpop.f32.mrb[20].mxu1 }
 0x122   : > { %1876 = vst [vmem:[%s2816_s14 + $0x278] sm:$0xff] %v1738_v48  ;;  %v873_v51 = vadd.f32 %v2802_v63, %v872_v49  ;;  %v2193_v52 = vpop.f32.mrb[21].mxu0  ;;  %v1153_v53 = vadd.f32 %v2802_v63, %v1152_v50  ;;  %v2333_v55 = vpop.f32.mrb[21].mxu1 }
 0x123   : > { %v875_v57 = vpop.f32.mrb[22].mxu0  ;;  %v1155_v58 = vpop.f32.mrb[22].mxu1 }
 0x124   : > { %vm1393_vm6 = vcmp.gt.f32.partialorder %v873_v51, 0.0  ;;  %v1531_v59 = vmul.f32 0.01, %v873_v51  ;;  %v876_v60 = vadd.f32 %v2802_v63, %v875_v57  ;;  %v2194_v61 = vpop.f32.mrb[23].mxu0  ;;  %vm1463_vm7 = vcmp.gt.f32.partialorder %v1153_v53, 0.0  ;;  %v2334_v62 = vpop.f32.mrb[23].mxu1 }
 0x125   : > { %v1601_v0 = vmul.f32 0.01, %v1153_v53  ;;  %v1156_v2 = vadd.f32 %v2802_v63, %v1155_v58 }
 0x126   : > { %v1669_v3 = vsel %vm1393_vm6, %v873_v51, %v1531_v59  ;;  %vm1394_vm8 = vcmp.gt.f32.partialorder %v876_v60, 0.0  ;;  %v1532_v4 = vmul.f32 0.01, %v876_v60  ;;  %2300 = vmatmul.mubr.bf16.gmra.mrb[128].mxu0 %v2545_v54  ;;  %2440 = vmatmul.mubr.bf16.gmra.mrb[128].mxu1 %v2546_v56 }
 0x127   : > { %1807 = vst [vmem:[%s2816_s14 + $0x50] sm:$0xff] %v1669_v3  ;;  %v1739_v5 = vsel %vm1463_vm7, %v1153_v53, %v1601_v0  ;;  %vm1464_vm9 = vcmp.gt.f32.partialorder %v1156_v2, 0.0  ;;  %v1602_v6 = vmul.f32 0.01, %v1156_v2  ;;  %2303 = vmatprep.mubr.msk.bf16.mxu0 %vm2560_vm0, %v2559_v1  ;;  %2443 = vmatprep.mubr.msk.bf16.mxu1 %vm2560_vm0, %v2559_v1 }
 0x128   : > { %v1670_v7 = vsel %vm1394_vm8, %v876_v60, %v1532_v4  ;;  %1877 = vst [vmem:[%s2816_s14 + $0x280] sm:$0xff] %v1739_v5 }
 0x129   : > { %1808 = vst [vmem:[%s2816_s14 + $0x58] sm:$0xff] %v1670_v7  ;;  %v1740_v8 = vsel %vm1464_vm9, %v1156_v2, %v1602_v6  ;;  %v880_v9 = vpop.f32.mrb[24].mxu0  ;;  %v1160_v10 = vpop.f32.mrb[24].mxu1 }
 0x12a   : > { %1878 = vst [vmem:[%s2816_s14 + $0x288] sm:$0xff] %v1740_v8  ;;  %v881_v11 = vadd.f32 %v2802_v63, %v880_v9  ;;  %v2197_v12 = vpop.f32.mrb[25].mxu0  ;;  %v1161_v13 = vadd.f32 %v2802_v63, %v1160_v10  ;;  %v2337_v15 = vpop.f32.mrb[25].mxu1 }
 0x12b   : > { %v883_v17 = vpop.f32.mrb[26].mxu0  ;;  %v1163_v18 = vpop.f32.mrb[26].mxu1 }
 0x12c   : > { %vm1395_vm10 = vcmp.gt.f32.partialorder %v881_v11, 0.0  ;;  %v1533_v19 = vmul.f32 0.01, %v881_v11  ;;  %v884_v20 = vadd.f32 %v2802_v63, %v883_v17  ;;  %v2198_v21 = vpop.f32.mrb[27].mxu0  ;;  %vm1465_vm11 = vcmp.gt.f32.partialorder %v1161_v13, 0.0  ;;  %v2338_v22 = vpop.f32.mrb[27].mxu1 }
 0x12d   : > { %v1603_v23 = vmul.f32 0.01, %v1161_v13  ;;  %v1164_v24 = vadd.f32 %v2802_v63, %v1163_v18 }
 0x12e   : > { %v1671_v25 = vsel %vm1395_vm10, %v881_v11, %v1533_v19  ;;  %vm1396_vm12 = vcmp.gt.f32.partialorder %v884_v20, 0.0  ;;  %v1534_v26 = vmul.f32 0.01, %v884_v20  ;;  %2304 = vmatmul.mubr.bf16.gmra.mrb[132].mxu0 %v2547_v14  ;;  %2444 = vmatmul.mubr.bf16.gmra.mrb[132].mxu1 %v2548_v16 }
 0x12f   : > { %1809 = vst [vmem:[%s2816_s14 + $0x60] sm:$0xff] %v1671_v25  ;;  %v1741_v27 = vsel %vm1465_vm11, %v1161_v13, %v1603_v23  ;;  %vm1466_vm13 = vcmp.gt.f32.partialorder %v1164_v24, 0.0  ;;  %v1604_v28 = vmul.f32 0.01, %v1164_v24  ;;  %2307 = vmatprep.mubr.msk.bf16.mxu0 %vm2560_vm0, %v2559_v1 }
 0x130   : > { %v1672_v29 = vsel %vm1396_vm12, %v884_v20, %v1534_v26  ;;  %1879 = vst [vmem:[%s2816_s14 + $0x290] sm:$0xff] %v1741_v27 }
 0x131   : > { %1810 = vst [vmem:[%s2816_s14 + $0x68] sm:$0xff] %v1672_v29  ;;  %v1742_v30 = vsel %vm1466_vm13, %v1164_v24, %v1604_v28  ;;  %v888_v31 = vpop.f32.mrb[28].mxu0  ;;  %v1168_v32 = vpop.f32.mrb[28].mxu1 }
 0x132   : > { %1880 = vst [vmem:[%s2816_s14 + $0x298] sm:$0xff] %v1742_v30  ;;  %v889_v33 = vadd.f32 %v2802_v63, %v888_v31  ;;  %v2201_v34 = vpop.f32.mrb[29].mxu0  ;;  %v1169_v35 = vadd.f32 %v2802_v63, %v1168_v32  ;;  %v2341_v37 = vpop.f32.mrb[29].mxu1 }
 0x133   : > { %v891_v38 = vpop.f32.mrb[30].mxu0  ;;  %v1171_v39 = vpop.f32.mrb[30].mxu1 }
 0x134   : > { %vm1397_vm14 = vcmp.gt.f32.partialorder %v889_v33, 0.0  ;;  %v1535_v40 = vmul.f32 0.01, %v889_v33  ;;  %v892_v1 = vadd.f32 %v2802_v63, %v891_v38  ;;  %v2202_v41 = vpop.f32.mrb[31].mxu0  ;;  %vm1467_vm0 = vcmp.gt.f32.partialorder %v1169_v35, 0.0  ;;  %v2342_v42 = vpop.f32.mrb[31].mxu1 }
 0x135   : > { %v1605_v43 = vmul.f32 0.01, %v1169_v35  ;;  %v1172_v44 = vadd.f32 %v2802_v63, %v1171_v39 }
 0x136   : > { %v1673_v45 = vsel %vm1397_vm14, %v889_v33, %v1535_v40  ;;  %vm1398_vm15 = vcmp.gt.f32.partialorder %v892_v1, 0.0  ;;  %v1536_v46 = vmul.f32 0.01, %v892_v1  ;;  %2308 = vmatmul.mubr.bf16.gmra.mrb[136].mxu0 %v2549_v36 }
 0x137   : > { %1811 = vst [vmem:[%s2816_s14 + $0x70] sm:$0xff] %v1673_v45  ;;  %v1743_v47 = vsel %vm1467_vm0, %v1169_v35, %v1605_v43  ;;  %vm1468_vm1 = vcmp.gt.f32.partialorder %v1172_v44, 0.0  ;;  %v1606_v48 = vmul.f32 0.01, %v1172_v44 }
 0x138   : > { %v1674_v49 = vsel %vm1398_vm15, %v892_v1, %v1536_v46  ;;  %1881 = vst [vmem:[%s2816_s14 + $0x2a0] sm:$0xff] %v1743_v47 }
 0x139   : > { %1812 = vst [vmem:[%s2816_s14 + $0x78] sm:$0xff] %v1674_v49  ;;  %v1744_v50 = vsel %vm1468_vm1, %v1172_v44, %v1606_v48  ;;  %v896_v51 = vpop.f32.mrb[32].mxu0  ;;  %v1176_v52 = vpop.f32.mrb[32].mxu1 }
 0x13a   : > { %1882 = vst [vmem:[%s2816_s14 + $0x2a8] sm:$0xff] %v1744_v50  ;;  %v897_v53 = vadd.f32 %v2802_v63, %v896_v51  ;;  %v2205_v54 = vpop.f32.mrb[33].mxu0  ;;  %v1177_v55 = vadd.f32 %v2802_v63, %v1176_v52  ;;  %v2345_v56 = vpop.f32.mrb[33].mxu1 }
 0x13b   : > { %v899_v57 = vpop.f32.mrb[34].mxu0  ;;  %v1179_v58 = vpop.f32.mrb[34].mxu1 }
 0x13c   : > { %vm1399_vm2 = vcmp.gt.f32.partialorder %v897_v53, 0.0  ;;  %v1537_v59 = vmul.f32 0.01, %v897_v53  ;;  %v900_v60 = vadd.f32 %v2802_v63, %v899_v57  ;;  %v2206_v61 = vpop.f32.mrb[35].mxu0  ;;  %vm1469_vm3 = vcmp.gt.f32.partialorder %v1177_v55, 0.0  ;;  %v2346_v62 = vpop.f32.mrb[35].mxu1 }
 0x13d   : > { %v1607_v0 = vmul.f32 0.01, %v1177_v55  ;;  %v1180_v2 = vadd.f32 %v2802_v63, %v1179_v58 }
 0x13e   : > { %v1675_v3 = vsel %vm1399_vm2, %v897_v53, %v1537_v59  ;;  %vm1400_vm4 = vcmp.gt.f32.partialorder %v900_v60, 0.0  ;;  %v1538_v4 = vmul.f32 0.01, %v900_v60 }
 0x13f   : > { %1813 = vst [vmem:[%s2816_s14 + $0x80] sm:$0xff] %v1675_v3  ;;  %v1745_v5 = vsel %vm1469_vm3, %v1177_v55, %v1607_v0  ;;  %vm1470_vm5 = vcmp.gt.f32.partialorder %v1180_v2, 0.0  ;;  %v1608_v6 = vmul.f32 0.01, %v1180_v2 }
 0x140   : > { %v1676_v7 = vsel %vm1400_vm4, %v900_v60, %v1538_v4  ;;  %1883 = vst [vmem:[%s2816_s14 + $0x2b0] sm:$0xff] %v1745_v5 }
 0x141   : > { %1814 = vst [vmem:[%s2816_s14 + $0x88] sm:$0xff] %v1676_v7  ;;  %v1746_v8 = vsel %vm1470_vm5, %v1180_v2, %v1608_v6  ;;  %v904_v9 = vpop.f32.mrb[36].mxu0  ;;  %v1184_v10 = vpop.f32.mrb[36].mxu1 }
 0x142   : > { %1884 = vst [vmem:[%s2816_s14 + $0x2b8] sm:$0xff] %v1746_v8  ;;  %v905_v11 = vadd.f32 %v2802_v63, %v904_v9  ;;  %v2209_v12 = vpop.f32.mrb[37].mxu0  ;;  %v1185_v13 = vadd.f32 %v2802_v63, %v1184_v10  ;;  %v2349_v14 = vpop.f32.mrb[37].mxu1 }
 0x143   : > { %v907_v15 = vpop.f32.mrb[38].mxu0  ;;  %v1187_v16 = vpop.f32.mrb[38].mxu1 }
 0x144   : > { %vm1401_vm6 = vcmp.gt.f32.partialorder %v905_v11, 0.0  ;;  %v1539_v17 = vmul.f32 0.01, %v905_v11  ;;  %v908_v18 = vadd.f32 %v2802_v63, %v907_v15  ;;  %v2210_v19 = vpop.f32.mrb[39].mxu0  ;;  %vm1471_vm7 = vcmp.gt.f32.partialorder %v1185_v13, 0.0  ;;  %v2350_v20 = vpop.f32.mrb[39].mxu1 }
 0x145   : > { %v1609_v21 = vmul.f32 0.01, %v1185_v13  ;;  %v1188_v22 = vadd.f32 %v2802_v63, %v1187_v16 }
 0x146   : > { %v1677_v23 = vsel %vm1401_vm6, %v905_v11, %v1539_v17  ;;  %vm1402_vm8 = vcmp.gt.f32.partialorder %v908_v18, 0.0  ;;  %v1540_v24 = vmul.f32 0.01, %v908_v18 }
 0x147   : > { %1815 = vst [vmem:[%s2816_s14 + $0x90] sm:$0xff] %v1677_v23  ;;  %v1747_v25 = vsel %vm1471_vm7, %v1185_v13, %v1609_v21  ;;  %vm1472_vm9 = vcmp.gt.f32.partialorder %v1188_v22, 0.0  ;;  %v1610_v26 = vmul.f32 0.01, %v1188_v22 }
 0x148   : > { %v1678_v27 = vsel %vm1402_vm8, %v908_v18, %v1540_v24  ;;  %1885 = vst [vmem:[%s2816_s14 + $0x2c0] sm:$0xff] %v1747_v25 }
 0x149   : > { %1816 = vst [vmem:[%s2816_s14 + $0x98] sm:$0xff] %v1678_v27  ;;  %v1748_v28 = vsel %vm1472_vm9, %v1188_v22, %v1610_v26  ;;  %v912_v29 = vpop.f32.mrb[40].mxu0  ;;  %v1192_v30 = vpop.f32.mrb[40].mxu1 }
 0x14a   : > { %1886 = vst [vmem:[%s2816_s14 + $0x2c8] sm:$0xff] %v1748_v28  ;;  %v913_v31 = vadd.f32 %v2802_v63, %v912_v29  ;;  %v2213_v32 = vpop.f32.mrb[41].mxu0  ;;  %v1193_v33 = vadd.f32 %v2802_v63, %v1192_v30  ;;  %v2353_v34 = vpop.f32.mrb[41].mxu1 }
 0x14b   : > { %v915_v35 = vpop.f32.mrb[42].mxu0  ;;  %v1195_v36 = vpop.f32.mrb[42].mxu1 }
 0x14c   : > { %vm1403_vm10 = vcmp.gt.f32.partialorder %v913_v31, 0.0  ;;  %v1541_v37 = vmul.f32 0.01, %v913_v31  ;;  %v916_v38 = vadd.f32 %v2802_v63, %v915_v35  ;;  %v2214_v39 = vpop.f32.mrb[43].mxu0  ;;  %vm1473_vm11 = vcmp.gt.f32.partialorder %v1193_v33, 0.0  ;;  %v2354_v40 = vpop.f32.mrb[43].mxu1 }
 0x14d   : > { %v1611_v1 = vmul.f32 0.01, %v1193_v33  ;;  %v1196_v41 = vadd.f32 %v2802_v63, %v1195_v36 }
 0x14e   : > { %v1679_v42 = vsel %vm1403_vm10, %v913_v31, %v1541_v37  ;;  %vm1404_vm12 = vcmp.gt.f32.partialorder %v916_v38, 0.0  ;;  %v1542_v43 = vmul.f32 0.01, %v916_v38 }
 0x14f   : > { %1817 = vst [vmem:[%s2816_s14 + $0xa0] sm:$0xff] %v1679_v42  ;;  %v1749_v44 = vsel %vm1473_vm11, %v1193_v33, %v1611_v1  ;;  %vm1474_vm13 = vcmp.gt.f32.partialorder %v1196_v41, 0.0  ;;  %v1612_v45 = vmul.f32 0.01, %v1196_v41 }
 0x150   : > { %v1680_v46 = vsel %vm1404_vm12, %v916_v38, %v1542_v43  ;;  %1887 = vst [vmem:[%s2816_s14 + $0x2d0] sm:$0xff] %v1749_v44 }
 0x151   : > { %1818 = vst [vmem:[%s2816_s14 + $0xa8] sm:$0xff] %v1680_v46  ;;  %v1750_v47 = vsel %vm1474_vm13, %v1196_v41, %v1612_v45  ;;  %v920_v48 = vpop.f32.mrb[44].mxu0  ;;  %v1200_v49 = vpop.f32.mrb[44].mxu1 }
 0x152   : > { %1888 = vst [vmem:[%s2816_s14 + $0x2d8] sm:$0xff] %v1750_v47  ;;  %v921_v50 = vadd.f32 %v2802_v63, %v920_v48  ;;  %v2217_v51 = vpop.f32.mrb[45].mxu0  ;;  %v1201_v52 = vadd.f32 %v2802_v63, %v1200_v49  ;;  %v2357_v53 = vpop.f32.mrb[45].mxu1 }
 0x153   : > { %v923_v54 = vpop.f32.mrb[46].mxu0  ;;  %v1203_v55 = vpop.f32.mrb[46].mxu1 }
 0x154   : > { %vm1405_vm14 = vcmp.gt.f32.partialorder %v921_v50, 0.0  ;;  %v1543_v56 = vmul.f32 0.01, %v921_v50  ;;  %v924_v57 = vadd.f32 %v2802_v63, %v923_v54  ;;  %v2218_v58 = vpop.f32.mrb[47].mxu0  ;;  %vm1475_vm0 = vcmp.gt.f32.partialorder %v1201_v52, 0.0  ;;  %v2358_v59 = vpop.f32.mrb[47].mxu1 }
 0x155   : > { %v1613_v60 = vmul.f32 0.01, %v1201_v52  ;;  %v1204_v61 = vadd.f32 %v2802_v63, %v1203_v55 }
 0x156   : > { %v1681_v62 = vsel %vm1405_vm14, %v921_v50, %v1543_v56  ;;  %vm1406_vm15 = vcmp.gt.f32.partialorder %v924_v57, 0.0  ;;  %v1544_v0 = vmul.f32 0.01, %v924_v57 }
 0x157   : > { %1819 = vst [vmem:[%s2816_s14 + $0xb0] sm:$0xff] %v1681_v62  ;;  %v1751_v2 = vsel %vm1475_vm0, %v1201_v52, %v1613_v60  ;;  %vm1476_vm1 = vcmp.gt.f32.partialorder %v1204_v61, 0.0  ;;  %v1614_v3 = vmul.f32 0.01, %v1204_v61 }
 0x158   : > { %v1682_v4 = vsel %vm1406_vm15, %v924_v57, %v1544_v0  ;;  %1889 = vst [vmem:[%s2816_s14 + $0x2e0] sm:$0xff] %v1751_v2 }
 0x159   : > { %1820 = vst [vmem:[%s2816_s14 + $0xb8] sm:$0xff] %v1682_v4  ;;  %v1752_v5 = vsel %vm1476_vm1, %v1204_v61, %v1614_v3  ;;  %v928_v6 = vpop.f32.mrb[48].mxu0  ;;  %v1208_v7 = vpop.f32.mrb[48].mxu1 }
 0x15a   : > { %1890 = vst [vmem:[%s2816_s14 + $0x2e8] sm:$0xff] %v1752_v5  ;;  %v929_v8 = vadd.f32 %v2802_v63, %v928_v6  ;;  %v2221_v9 = vpop.f32.mrb[49].mxu0  ;;  %v1209_v10 = vadd.f32 %v2802_v63, %v1208_v7  ;;  %v2361_v11 = vpop.f32.mrb[49].mxu1 }
 0x15b   : > { %v931_v12 = vpop.f32.mrb[50].mxu0  ;;  %v1211_v13 = vpop.f32.mrb[50].mxu1 }
 0x15c   : > { %vm1407_vm2 = vcmp.gt.f32.partialorder %v929_v8, 0.0  ;;  %v1545_v14 = vmul.f32 0.01, %v929_v8  ;;  %v932_v15 = vadd.f32 %v2802_v63, %v931_v12  ;;  %v2222_v16 = vpop.f32.mrb[51].mxu0  ;;  %vm1477_vm3 = vcmp.gt.f32.partialorder %v1209_v10, 0.0  ;;  %v2362_v17 = vpop.f32.mrb[51].mxu1 }
 0x15d   : > { %v1615_v18 = vmul.f32 0.01, %v1209_v10  ;;  %v1212_v19 = vadd.f32 %v2802_v63, %v1211_v13 }
 0x15e   : > { %v1683_v20 = vsel %vm1407_vm2, %v929_v8, %v1545_v14  ;;  %vm1408_vm4 = vcmp.gt.f32.partialorder %v932_v15, 0.0  ;;  %v1546_v21 = vmul.f32 0.01, %v932_v15 }
 0x15f   : > { %1821 = vst [vmem:[%s2816_s14 + $0xc0] sm:$0xff] %v1683_v20  ;;  %v1753_v22 = vsel %vm1477_vm3, %v1209_v10, %v1615_v18  ;;  %vm1478_vm5 = vcmp.gt.f32.partialorder %v1212_v19, 0.0  ;;  %v1616_v23 = vmul.f32 0.01, %v1212_v19 }
 0x160   : > { %v1684_v24 = vsel %vm1408_vm4, %v932_v15, %v1546_v21  ;;  %1891 = vst [vmem:[%s2816_s14 + $0x2f0] sm:$0xff] %v1753_v22 }
 0x161   : > { %1822 = vst [vmem:[%s2816_s14 + $0xc8] sm:$0xff] %v1684_v24  ;;  %v1754_v25 = vsel %vm1478_vm5, %v1212_v19, %v1616_v23  ;;  %v936_v26 = vpop.f32.mrb[52].mxu0  ;;  %v1216_v27 = vpop.f32.mrb[52].mxu1 }
 0x162   : > { %1892 = vst [vmem:[%s2816_s14 + $0x2f8] sm:$0xff] %v1754_v25  ;;  %v937_v28 = vadd.f32 %v2802_v63, %v936_v26  ;;  %v2225_v29 = vpop.f32.mrb[53].mxu0  ;;  %v1217_v30 = vadd.f32 %v2802_v63, %v1216_v27  ;;  %v2365_v31 = vpop.f32.mrb[53].mxu1 }
 0x163   : > { %v939_v32 = vpop.f32.mrb[54].mxu0  ;;  %v1219_v33 = vpop.f32.mrb[54].mxu1 }
 0x164   : > { %vm1409_vm6 = vcmp.gt.f32.partialorder %v937_v28, 0.0  ;;  %v1547_v34 = vmul.f32 0.01, %v937_v28  ;;  %v940_v35 = vadd.f32 %v2802_v63, %v939_v32  ;;  %v2226_v36 = vpop.f32.mrb[55].mxu0  ;;  %vm1479_vm7 = vcmp.gt.f32.partialorder %v1217_v30, 0.0  ;;  %v2366_v37 = vpop.f32.mrb[55].mxu1 }
 0x165   : > { %v1617_v38 = vmul.f32 0.01, %v1217_v30  ;;  %v1220_v39 = vadd.f32 %v2802_v63, %v1219_v33 }
 0x166   : > { %v1685_v40 = vsel %vm1409_vm6, %v937_v28, %v1547_v34  ;;  %vm1410_vm8 = vcmp.gt.f32.partialorder %v940_v35, 0.0  ;;  %v1548_v1 = vmul.f32 0.01, %v940_v35 }
 0x167   : > { %1823 = vst [vmem:[%s2816_s14 + $0xd0] sm:$0xff] %v1685_v40  ;;  %v1755_v41 = vsel %vm1479_vm7, %v1217_v30, %v1617_v38  ;;  %vm1480_vm9 = vcmp.gt.f32.partialorder %v1220_v39, 0.0  ;;  %v1618_v42 = vmul.f32 0.01, %v1220_v39 }
 0x168   : > { %v1686_v43 = vsel %vm1410_vm8, %v940_v35, %v1548_v1  ;;  %1893 = vst [vmem:[%s2816_s14 + $0x300] sm:$0xff] %v1755_v41 }
 0x169   : > { %1824 = vst [vmem:[%s2816_s14 + $0xd8] sm:$0xff] %v1686_v43  ;;  %v1756_v44 = vsel %vm1480_vm9, %v1220_v39, %v1618_v42  ;;  %v944_v45 = vpop.f32.mrb[56].mxu0  ;;  %v1224_v46 = vpop.f32.mrb[56].mxu1 }
 0x16a   : > { %1894 = vst [vmem:[%s2816_s14 + $0x308] sm:$0xff] %v1756_v44  ;;  %v945_v47 = vadd.f32 %v2802_v63, %v944_v45  ;;  %v2229_v48 = vpop.f32.mrb[57].mxu0  ;;  %v1225_v49 = vadd.f32 %v2802_v63, %v1224_v46  ;;  %v2369_v50 = vpop.f32.mrb[57].mxu1  ;;  %v2994_v44 = vld [vmem:[%s3141_s2] ss:$0 sm:$0xff] }
 0x16b   : > { %v947_v51 = vpop.f32.mrb[58].mxu0  ;;  %v1227_v52 = vpop.f32.mrb[58].mxu1 }
 0x16c   : > { %vm1411_vm10 = vcmp.gt.f32.partialorder %v945_v47, 0.0  ;;  %v1549_v53 = vmul.f32 0.01, %v945_v47  ;;  %v948_v54 = vadd.f32 %v2802_v63, %v947_v51  ;;  %v2230_v55 = vpop.f32.mrb[59].mxu0  ;;  %vm1481_vm11 = vcmp.gt.f32.partialorder %v1225_v49, 0.0  ;;  %v2370_v56 = vpop.f32.mrb[59].mxu1 }
 0x16d   : > { %v1619_v57 = vmul.f32 0.01, %v1225_v49  ;;  %v1228_v58 = vadd.f32 %v2802_v63, %v1227_v52 }
 0x16e   : > { %v1687_v59 = vsel %vm1411_vm10, %v945_v47, %v1549_v53  ;;  %vm1412_vm12 = vcmp.gt.f32.partialorder %v948_v54, 0.0  ;;  %v1550_v60 = vmul.f32 0.01, %v948_v54 }
 0x16f   : > { %1825 = vst [vmem:[%s2816_s14 + $0xe0] sm:$0xff] %v1687_v59  ;;  %v1757_v61 = vsel %vm1481_vm11, %v1225_v49, %v1619_v57  ;;  %vm1482_vm13 = vcmp.gt.f32.partialorder %v1228_v58, 0.0  ;;  %v1620_v62 = vmul.f32 0.01, %v1228_v58 }
 0x170   : > { %v1688_v0 = vsel %vm1412_vm12, %v948_v54, %v1550_v60  ;;  %1895 = vst [vmem:[%s2816_s14 + $0x310] sm:$0xff] %v1757_v61 }
 0x171   : > { %1826 = vst [vmem:[%s2816_s14 + $0xe8] sm:$0xff] %v1688_v0  ;;  %v1758_v2 = vsel %vm1482_vm13, %v1228_v58, %v1620_v62  ;;  %v952_v3 = vpop.f32.mrb[60].mxu0  ;;  %v1232_v4 = vpop.f32.mrb[60].mxu1 }
 0x172   : > { %1896 = vst [vmem:[%s2816_s14 + $0x318] sm:$0xff] %v1758_v2  ;;  %v953_v5 = vadd.f32 %v2802_v63, %v952_v3  ;;  %v2233_v6 = vpop.f32.mrb[61].mxu0  ;;  %v1233_v7 = vadd.f32 %v2802_v63, %v1232_v4  ;;  %v2373_v8 = vpop.f32.mrb[61].mxu1 }
 0x173   : > { %v955_v9 = vpop.f32.mrb[62].mxu0  ;;  %v1235_v10 = vpop.f32.mrb[62].mxu1 }
 0x174   : > { %vm1413_vm14 = vcmp.gt.f32.partialorder %v953_v5, 0.0  ;;  %v1551_v11 = vmul.f32 0.01, %v953_v5  ;;  %v956_v12 = vadd.f32 %v2802_v63, %v955_v9  ;;  %v2234_v13 = vpop.f32.mrb[63].mxu0  ;;  %vm1483_vm0 = vcmp.gt.f32.partialorder %v1233_v7, 0.0  ;;  %v2374_v14 = vpop.f32.mrb[63].mxu1 }
 0x175   : > { %v1621_v15 = vmul.f32 0.01, %v1233_v7  ;;  %v1236_v16 = vadd.f32 %v2802_v63, %v1235_v10 }
 0x176   : > { %v1689_v17 = vsel %vm1413_vm14, %v953_v5, %v1551_v11  ;;  %vm1414_vm15 = vcmp.gt.f32.partialorder %v956_v12, 0.0  ;;  %v1552_v18 = vmul.f32 0.01, %v956_v12 }
 0x177   : > { %1827 = vst [vmem:[%s2816_s14 + $0xf0] sm:$0xff] %v1689_v17  ;;  %v1759_v19 = vsel %vm1483_vm0, %v1233_v7, %v1621_v15  ;;  %vm1484_vm1 = vcmp.gt.f32.partialorder %v1236_v16, 0.0  ;;  %v1622_v20 = vmul.f32 0.01, %v1236_v16 }
 0x178   : > { %v1690_v21 = vsel %vm1414_vm15, %v956_v12, %v1552_v18  ;;  %1897 = vst [vmem:[%s2816_s14 + $0x320] sm:$0xff] %v1759_v19 }
 0x179   : > { %1828 = vst [vmem:[%s2816_s14 + $0xf8] sm:$0xff] %v1690_v21  ;;  %v1760_v22 = vsel %vm1484_vm1, %v1236_v16, %v1622_v20  ;;  %v960_v23 = vpop.f32.mrb[64].mxu0  ;;  %v1240_v24 = vpop.f32.mrb[64].mxu1 }
 0x17a   : > { %1898 = vst [vmem:[%s2816_s14 + $0x328] sm:$0xff] %v1760_v22  ;;  %v961_v25 = vadd.f32 %v2802_v63, %v960_v23  ;;  %v2237_v26 = vpop.f32.mrb[65].mxu0  ;;  %v1241_v27 = vadd.f32 %v2802_v63, %v1240_v24  ;;  %v2377_v28 = vpop.f32.mrb[65].mxu1 }
 0x17b   : > { %v963_v29 = vpop.f32.mrb[66].mxu0  ;;  %v1243_v30 = vpop.f32.mrb[66].mxu1 }
 0x17c   : > { %vm1415_vm2 = vcmp.gt.f32.partialorder %v961_v25, 0.0  ;;  %v1553_v31 = vmul.f32 0.01, %v961_v25  ;;  %v964_v32 = vadd.f32 %v2802_v63, %v963_v29  ;;  %v2238_v33 = vpop.f32.mrb[67].mxu0  ;;  %vm1485_vm3 = vcmp.gt.f32.partialorder %v1241_v27, 0.0  ;;  %v2378_v34 = vpop.f32.mrb[67].mxu1 }
 0x17d   : > { %v1623_v35 = vmul.f32 0.01, %v1241_v27  ;;  %v1244_v36 = vadd.f32 %v2802_v63, %v1243_v30 }
 0x17e   : > { %v1691_v37 = vsel %vm1415_vm2, %v961_v25, %v1553_v31  ;;  %vm1416_vm4 = vcmp.gt.f32.partialorder %v964_v32, 0.0  ;;  %v1554_v38 = vmul.f32 0.01, %v964_v32 }
 0x17f   : > { %1829 = vst [vmem:[%s2816_s14 + $0x100] sm:$0xff] %v1691_v37  ;;  %v1761_v39 = vsel %vm1485_vm3, %v1241_v27, %v1623_v35  ;;  %vm1486_vm5 = vcmp.gt.f32.partialorder %v1244_v36, 0.0  ;;  %v1624_v40 = vmul.f32 0.01, %v1244_v36 }
 0x180   : > { %v1692_v1 = vsel %vm1416_vm4, %v964_v32, %v1554_v38  ;;  %1899 = vst [vmem:[%s2816_s14 + $0x330] sm:$0xff] %v1761_v39 }
 0x181   : > { %1830 = vst [vmem:[%s2816_s14 + $0x108] sm:$0xff] %v1692_v1  ;;  %v1762_v41 = vsel %vm1486_vm5, %v1244_v36, %v1624_v40  ;;  %v968_v42 = vpop.f32.mrb[68].mxu0  ;;  %v1248_v43 = vpop.f32.mrb[68].mxu1 }
 0x182   : > { %1900 = vst [vmem:[%s2816_s14 + $0x338] sm:$0xff] %v1762_v41  ;;  %v969_v63 = vadd.f32 %v2994_v44, %v968_v42  ;;  %v2241_v45 = vpop.f32.mrb[69].mxu0  ;;  %v1249_v46 = vadd.f32 %v2994_v44, %v1248_v43  ;;  %v2381_v47 = vpop.f32.mrb[69].mxu1 }
 0x183   : > { %v971_v48 = vpop.f32.mrb[70].mxu0  ;;  %v1251_v49 = vpop.f32.mrb[70].mxu1 }
 0x184   : > { %vm1417_vm6 = vcmp.gt.f32.partialorder %v969_v63, 0.0  ;;  %v1555_v50 = vmul.f32 0.01, %v969_v63  ;;  %v972_v51 = vadd.f32 %v2994_v44, %v971_v48  ;;  %v2242_v52 = vpop.f32.mrb[71].mxu0  ;;  %vm1487_vm7 = vcmp.gt.f32.partialorder %v1249_v46, 0.0  ;;  %v2382_v53 = vpop.f32.mrb[71].mxu1 }
 0x185   : > { %v1625_v54 = vmul.f32 0.01, %v1249_v46  ;;  %v1252_v55 = vadd.f32 %v2994_v44, %v1251_v49 }
 0x186   : > { %v1693_v56 = vsel %vm1417_vm6, %v969_v63, %v1555_v50  ;;  %vm1418_vm8 = vcmp.gt.f32.partialorder %v972_v51, 0.0  ;;  %v1556_v57 = vmul.f32 0.01, %v972_v51 }
 0x187   : > { %1831 = vst [vmem:[%s2816_s14 + $0x110] sm:$0xff] %v1693_v56  ;;  %v1763_v58 = vsel %vm1487_vm7, %v1249_v46, %v1625_v54  ;;  %vm1488_vm9 = vcmp.gt.f32.partialorder %v1252_v55, 0.0  ;;  %v1626_v59 = vmul.f32 0.01, %v1252_v55 }
 0x188   : > { %v1694_v60 = vsel %vm1418_vm8, %v972_v51, %v1556_v57  ;;  %1901 = vst [vmem:[%s2816_s14 + $0x340] sm:$0xff] %v1763_v58 }
 0x189   : > { %1832 = vst [vmem:[%s2816_s14 + $0x118] sm:$0xff] %v1694_v60  ;;  %v1764_v61 = vsel %vm1488_vm9, %v1252_v55, %v1626_v59  ;;  %v976_v62 = vpop.f32.mrb[72].mxu0  ;;  %v1256_v0 = vpop.f32.mrb[72].mxu1 }
 0x18a   : > { %1902 = vst [vmem:[%s2816_s14 + $0x348] sm:$0xff] %v1764_v61  ;;  %v977_v2 = vadd.f32 %v2994_v44, %v976_v62  ;;  %v2245_v3 = vpop.f32.mrb[73].mxu0  ;;  %v1257_v4 = vadd.f32 %v2994_v44, %v1256_v0  ;;  %v2385_v5 = vpop.f32.mrb[73].mxu1 }
 0x18b   : > { %v979_v6 = vpop.f32.mrb[74].mxu0  ;;  %v1259_v7 = vpop.f32.mrb[74].mxu1 }
 0x18c   : > { %vm1419_vm10 = vcmp.gt.f32.partialorder %v977_v2, 0.0  ;;  %v1557_v8 = vmul.f32 0.01, %v977_v2  ;;  %v980_v9 = vadd.f32 %v2994_v44, %v979_v6  ;;  %v2246_v10 = vpop.f32.mrb[75].mxu0  ;;  %vm1489_vm11 = vcmp.gt.f32.partialorder %v1257_v4, 0.0  ;;  %v2386_v11 = vpop.f32.mrb[75].mxu1 }
 0x18d   : > { %v1627_v12 = vmul.f32 0.01, %v1257_v4  ;;  %v1260_v13 = vadd.f32 %v2994_v44, %v1259_v7 }
 0x18e   : > { %v1695_v14 = vsel %vm1419_vm10, %v977_v2, %v1557_v8  ;;  %vm1420_vm12 = vcmp.gt.f32.partialorder %v980_v9, 0.0  ;;  %v1558_v15 = vmul.f32 0.01, %v980_v9 }
 0x18f   : > { %1833 = vst [vmem:[%s2816_s14 + $0x120] sm:$0xff] %v1695_v14  ;;  %v1765_v16 = vsel %vm1489_vm11, %v1257_v4, %v1627_v12  ;;  %vm1490_vm13 = vcmp.gt.f32.partialorder %v1260_v13, 0.0  ;;  %v1628_v17 = vmul.f32 0.01, %v1260_v13 }
 0x190   : > { %v1696_v18 = vsel %vm1420_vm12, %v980_v9, %v1558_v15  ;;  %1903 = vst [vmem:[%s2816_s14 + $0x350] sm:$0xff] %v1765_v16 }
 0x191   : > { %1834 = vst [vmem:[%s2816_s14 + $0x128] sm:$0xff] %v1696_v18  ;;  %v1766_v19 = vsel %vm1490_vm13, %v1260_v13, %v1628_v17  ;;  %v984_v20 = vpop.f32.mrb[76].mxu0  ;;  %v1264_v21 = vpop.f32.mrb[76].mxu1 }
 0x192   : > { %1904 = vst [vmem:[%s2816_s14 + $0x358] sm:$0xff] %v1766_v19  ;;  %v985_v22 = vadd.f32 %v2994_v44, %v984_v20  ;;  %v2249_v23 = vpop.f32.mrb[77].mxu0  ;;  %v1265_v24 = vadd.f32 %v2994_v44, %v1264_v21  ;;  %v2389_v25 = vpop.f32.mrb[77].mxu1 }
 0x193   : > { %v987_v26 = vpop.f32.mrb[78].mxu0  ;;  %v1267_v27 = vpop.f32.mrb[78].mxu1 }
 0x194   : > { %vm1421_vm14 = vcmp.gt.f32.partialorder %v985_v22, 0.0  ;;  %v1559_v28 = vmul.f32 0.01, %v985_v22  ;;  %v988_v29 = vadd.f32 %v2994_v44, %v987_v26  ;;  %v2250_v30 = vpop.f32.mrb[79].mxu0  ;;  %vm1491_vm0 = vcmp.gt.f32.partialorder %v1265_v24, 0.0  ;;  %v2390_v31 = vpop.f32.mrb[79].mxu1 }
 0x195   : > { %v1629_v32 = vmul.f32 0.01, %v1265_v24  ;;  %v1268_v33 = vadd.f32 %v2994_v44, %v1267_v27 }
 0x196   : > { %v1697_v34 = vsel %vm1421_vm14, %v985_v22, %v1559_v28  ;;  %vm1422_vm15 = vcmp.gt.f32.partialorder %v988_v29, 0.0  ;;  %v1560_v35 = vmul.f32 0.01, %v988_v29 }
 0x197   : > { %1835 = vst [vmem:[%s2816_s14 + $0x130] sm:$0xff] %v1697_v34  ;;  %v1767_v36 = vsel %vm1491_vm0, %v1265_v24, %v1629_v32  ;;  %vm1492_vm1 = vcmp.gt.f32.partialorder %v1268_v33, 0.0  ;;  %v1630_v37 = vmul.f32 0.01, %v1268_v33 }
 0x198   : > { %v1698_v38 = vsel %vm1422_vm15, %v988_v29, %v1560_v35  ;;  %1905 = vst [vmem:[%s2816_s14 + $0x360] sm:$0xff] %v1767_v36 }
 0x199   : > { %1836 = vst [vmem:[%s2816_s14 + $0x138] sm:$0xff] %v1698_v38  ;;  %v1768_v39 = vsel %vm1492_vm1, %v1268_v33, %v1630_v37  ;;  %v992_v40 = vpop.f32.mrb[80].mxu0  ;;  %v1272_v1 = vpop.f32.mrb[80].mxu1 }
 0x19a   : > { %1906 = vst [vmem:[%s2816_s14 + $0x368] sm:$0xff] %v1768_v39  ;;  %v993_v41 = vadd.f32 %v2994_v44, %v992_v40  ;;  %v2253_v42 = vpop.f32.mrb[81].mxu0  ;;  %v1273_v43 = vadd.f32 %v2994_v44, %v1272_v1  ;;  %v2393_v63 = vpop.f32.mrb[81].mxu1 }
 0x19b   : > { %v995_v45 = vpop.f32.mrb[82].mxu0  ;;  %v1275_v46 = vpop.f32.mrb[82].mxu1 }
 0x19c   : > { %vm1423_vm2 = vcmp.gt.f32.partialorder %v993_v41, 0.0  ;;  %v1561_v47 = vmul.f32 0.01, %v993_v41  ;;  %v996_v48 = vadd.f32 %v2994_v44, %v995_v45  ;;  %v2254_v49 = vpop.f32.mrb[83].mxu0  ;;  %vm1493_vm3 = vcmp.gt.f32.partialorder %v1273_v43, 0.0  ;;  %v2394_v50 = vpop.f32.mrb[83].mxu1 }
 0x19d   : > { %v1631_v51 = vmul.f32 0.01, %v1273_v43  ;;  %v1276_v52 = vadd.f32 %v2994_v44, %v1275_v46 }
 0x19e   : > { %v1699_v53 = vsel %vm1423_vm2, %v993_v41, %v1561_v47  ;;  %vm1424_vm4 = vcmp.gt.f32.partialorder %v996_v48, 0.0  ;;  %v1562_v54 = vmul.f32 0.01, %v996_v48 }
 0x19f   : > { %1837 = vst [vmem:[%s2816_s14 + $0x140] sm:$0xff] %v1699_v53  ;;  %v1769_v55 = vsel %vm1493_vm3, %v1273_v43, %v1631_v51  ;;  %vm1494_vm5 = vcmp.gt.f32.partialorder %v1276_v52, 0.0  ;;  %v1632_v56 = vmul.f32 0.01, %v1276_v52 }
 0x1a0   : > { %v1700_v57 = vsel %vm1424_vm4, %v996_v48, %v1562_v54  ;;  %1907 = vst [vmem:[%s2816_s14 + $0x370] sm:$0xff] %v1769_v55 }
 0x1a1   : > { %1838 = vst [vmem:[%s2816_s14 + $0x148] sm:$0xff] %v1700_v57  ;;  %v1770_v58 = vsel %vm1494_vm5, %v1276_v52, %v1632_v56  ;;  %v1000_v59 = vpop.f32.mrb[84].mxu0  ;;  %v1280_v60 = vpop.f32.mrb[84].mxu1 }
 0x1a2   : > { %1908 = vst [vmem:[%s2816_s14 + $0x378] sm:$0xff] %v1770_v58  ;;  %v1001_v61 = vadd.f32 %v2994_v44, %v1000_v59  ;;  %v2257_v62 = vpop.f32.mrb[85].mxu0  ;;  %v1281_v0 = vadd.f32 %v2994_v44, %v1280_v60  ;;  %v2397_v2 = vpop.f32.mrb[85].mxu1 }
 0x1a3   : > { %v1003_v3 = vpop.f32.mrb[86].mxu0  ;;  %v1283_v4 = vpop.f32.mrb[86].mxu1 }
 0x1a4   : > { %vm1425_vm6 = vcmp.gt.f32.partialorder %v1001_v61, 0.0  ;;  %v1563_v5 = vmul.f32 0.01, %v1001_v61  ;;  %v1004_v6 = vadd.f32 %v2994_v44, %v1003_v3  ;;  %v2258_v7 = vpop.f32.mrb[87].mxu0  ;;  %vm1495_vm7 = vcmp.gt.f32.partialorder %v1281_v0, 0.0  ;;  %v2398_v8 = vpop.f32.mrb[87].mxu1 }
 0x1a5   : > { %v1633_v9 = vmul.f32 0.01, %v1281_v0  ;;  %v1284_v10 = vadd.f32 %v2994_v44, %v1283_v4 }
 0x1a6   : > { %v1701_v11 = vsel %vm1425_vm6, %v1001_v61, %v1563_v5  ;;  %vm1426_vm8 = vcmp.gt.f32.partialorder %v1004_v6, 0.0  ;;  %v1564_v12 = vmul.f32 0.01, %v1004_v6 }
 0x1a7   : > { %1839 = vst [vmem:[%s2816_s14 + $0x150] sm:$0xff] %v1701_v11  ;;  %v1771_v13 = vsel %vm1495_vm7, %v1281_v0, %v1633_v9  ;;  %vm1496_vm9 = vcmp.gt.f32.partialorder %v1284_v10, 0.0  ;;  %v1634_v14 = vmul.f32 0.01, %v1284_v10 }
 0x1a8   : > { %v1702_v15 = vsel %vm1426_vm8, %v1004_v6, %v1564_v12  ;;  %1909 = vst [vmem:[%s2816_s14 + $0x380] sm:$0xff] %v1771_v13 }
 0x1a9   : > { %1840 = vst [vmem:[%s2816_s14 + $0x158] sm:$0xff] %v1702_v15  ;;  %v1772_v16 = vsel %vm1496_vm9, %v1284_v10, %v1634_v14  ;;  %v1008_v17 = vpop.f32.mrb[88].mxu0  ;;  %v1288_v18 = vpop.f32.mrb[88].mxu1 }
 0x1aa   : > { %1910 = vst [vmem:[%s2816_s14 + $0x388] sm:$0xff] %v1772_v16  ;;  %v1009_v19 = vadd.f32 %v2994_v44, %v1008_v17  ;;  %v2261_v20 = vpop.f32.mrb[89].mxu0  ;;  %v1289_v21 = vadd.f32 %v2994_v44, %v1288_v18  ;;  %v2401_v22 = vpop.f32.mrb[89].mxu1 }
 0x1ab   : > { %v1011_v23 = vpop.f32.mrb[90].mxu0  ;;  %v1291_v24 = vpop.f32.mrb[90].mxu1 }
 0x1ac   : > { %vm1427_vm10 = vcmp.gt.f32.partialorder %v1009_v19, 0.0  ;;  %v1565_v25 = vmul.f32 0.01, %v1009_v19  ;;  %v1012_v26 = vadd.f32 %v2994_v44, %v1011_v23  ;;  %v2262_v27 = vpop.f32.mrb[91].mxu0  ;;  %vm1497_vm11 = vcmp.gt.f32.partialorder %v1289_v21, 0.0  ;;  %v2402_v28 = vpop.f32.mrb[91].mxu1 }
 0x1ad   : > { %v1635_v29 = vmul.f32 0.01, %v1289_v21  ;;  %v1292_v30 = vadd.f32 %v2994_v44, %v1291_v24 }
 0x1ae   : > { %v1703_v31 = vsel %vm1427_vm10, %v1009_v19, %v1565_v25  ;;  %vm1428_vm12 = vcmp.gt.f32.partialorder %v1012_v26, 0.0  ;;  %v1566_v32 = vmul.f32 0.01, %v1012_v26 }
 0x1af   : > { %1841 = vst [vmem:[%s2816_s14 + $0x160] sm:$0xff] %v1703_v31  ;;  %v1773_v33 = vsel %vm1497_vm11, %v1289_v21, %v1635_v29  ;;  %vm1498_vm13 = vcmp.gt.f32.partialorder %v1292_v30, 0.0  ;;  %v1636_v34 = vmul.f32 0.01, %v1292_v30 }
 0x1b0   : > { %v1704_v35 = vsel %vm1428_vm12, %v1012_v26, %v1566_v32  ;;  %1911 = vst [vmem:[%s2816_s14 + $0x390] sm:$0xff] %v1773_v33 }
 0x1b1   : > { %1842 = vst [vmem:[%s2816_s14 + $0x168] sm:$0xff] %v1704_v35  ;;  %v1774_v36 = vsel %vm1498_vm13, %v1292_v30, %v1636_v34  ;;  %v1016_v37 = vpop.f32.mrb[92].mxu0  ;;  %v1296_v38 = vpop.f32.mrb[92].mxu1 }
 0x1b2   : > { %1912 = vst [vmem:[%s2816_s14 + $0x398] sm:$0xff] %v1774_v36  ;;  %v1017_v39 = vadd.f32 %v2994_v44, %v1016_v37  ;;  %v2265_v40 = vpop.f32.mrb[93].mxu0  ;;  %v1297_v1 = vadd.f32 %v2994_v44, %v1296_v38  ;;  %v2405_v41 = vpop.f32.mrb[93].mxu1 }
 0x1b3   : > { %v1019_v42 = vpop.f32.mrb[94].mxu0  ;;  %v1299_v43 = vpop.f32.mrb[94].mxu1 }
 0x1b4   : > { %vm1429_vm14 = vcmp.gt.f32.partialorder %v1017_v39, 0.0  ;;  %v1567_v63 = vmul.f32 0.01, %v1017_v39  ;;  %v1020_v45 = vadd.f32 %v2994_v44, %v1019_v42  ;;  %v2266_v46 = vpop.f32.mrb[95].mxu0  ;;  %vm1499_vm0 = vcmp.gt.f32.partialorder %v1297_v1, 0.0  ;;  %v2406_v47 = vpop.f32.mrb[95].mxu1 }
 0x1b5   : > { %v1637_v48 = vmul.f32 0.01, %v1297_v1  ;;  %v1300_v49 = vadd.f32 %v2994_v44, %v1299_v43 }
 0x1b6   : > { %v1705_v50 = vsel %vm1429_vm14, %v1017_v39, %v1567_v63  ;;  %vm1430_vm15 = vcmp.gt.f32.partialorder %v1020_v45, 0.0  ;;  %v1568_v51 = vmul.f32 0.01, %v1020_v45 }
 0x1b7   : > { %1843 = vst [vmem:[%s2816_s14 + $0x170] sm:$0xff] %v1705_v50  ;;  %v1775_v52 = vsel %vm1499_vm0, %v1297_v1, %v1637_v48  ;;  %vm1500_vm1 = vcmp.gt.f32.partialorder %v1300_v49, 0.0  ;;  %v1638_v53 = vmul.f32 0.01, %v1300_v49 }
 0x1b8   : > { %v1706_v54 = vsel %vm1430_vm15, %v1020_v45, %v1568_v51  ;;  %1913 = vst [vmem:[%s2816_s14 + $0x3a0] sm:$0xff] %v1775_v52 }
 0x1b9   : > { %1844 = vst [vmem:[%s2816_s14 + $0x178] sm:$0xff] %v1706_v54  ;;  %v1776_v55 = vsel %vm1500_vm1, %v1300_v49, %v1638_v53  ;;  %v1024_v56 = vpop.f32.mrb[96].mxu0  ;;  %v1304_v57 = vpop.f32.mrb[96].mxu1 }
 0x1ba   : > { %1914 = vst [vmem:[%s2816_s14 + $0x3a8] sm:$0xff] %v1776_v55  ;;  %v1025_v58 = vadd.f32 %v2994_v44, %v1024_v56  ;;  %v2269_v59 = vpop.f32.mrb[97].mxu0  ;;  %v1305_v60 = vadd.f32 %v2994_v44, %v1304_v57  ;;  %v2409_v61 = vpop.f32.mrb[97].mxu1 }
 0x1bb   : > { %v1027_v62 = vpop.f32.mrb[98].mxu0  ;;  %v1307_v0 = vpop.f32.mrb[98].mxu1 }
 0x1bc   : > { %vm1431_vm2 = vcmp.gt.f32.partialorder %v1025_v58, 0.0  ;;  %v1569_v2 = vmul.f32 0.01, %v1025_v58  ;;  %v1028_v3 = vadd.f32 %v2994_v44, %v1027_v62  ;;  %v2270_v4 = vpop.f32.mrb[99].mxu0  ;;  %vm1501_vm3 = vcmp.gt.f32.partialorder %v1305_v60, 0.0  ;;  %v2410_v5 = vpop.f32.mrb[99].mxu1 }
 0x1bd   : > { %v1639_v6 = vmul.f32 0.01, %v1305_v60  ;;  %v1308_v7 = vadd.f32 %v2994_v44, %v1307_v0 }
 0x1be   : > { %v1707_v8 = vsel %vm1431_vm2, %v1025_v58, %v1569_v2  ;;  %vm1432_vm4 = vcmp.gt.f32.partialorder %v1028_v3, 0.0  ;;  %v1570_v9 = vmul.f32 0.01, %v1028_v3 }
 0x1bf   : > { %1845 = vst [vmem:[%s2816_s14 + $0x180] sm:$0xff] %v1707_v8  ;;  %v1777_v10 = vsel %vm1501_vm3, %v1305_v60, %v1639_v6  ;;  %vm1502_vm5 = vcmp.gt.f32.partialorder %v1308_v7, 0.0  ;;  %v1640_v11 = vmul.f32 0.01, %v1308_v7 }
 0x1c0   : > { %v1708_v12 = vsel %vm1432_vm4, %v1028_v3, %v1570_v9  ;;  %1915 = vst [vmem:[%s2816_s14 + $0x3b0] sm:$0xff] %v1777_v10 }
 0x1c1   : > { %1846 = vst [vmem:[%s2816_s14 + $0x188] sm:$0xff] %v1708_v12  ;;  %v1778_v13 = vsel %vm1502_vm5, %v1308_v7, %v1640_v11  ;;  %v1032_v14 = vpop.f32.mrb[100].mxu0  ;;  %v1312_v15 = vpop.f32.mrb[100].mxu1 }
 0x1c2   : > { %1916 = vst [vmem:[%s2816_s14 + $0x3b8] sm:$0xff] %v1778_v13  ;;  %v1033_v16 = vadd.f32 %v2994_v44, %v1032_v14  ;;  %v2273_v17 = vpop.f32.mrb[101].mxu0  ;;  %v1313_v18 = vadd.f32 %v2994_v44, %v1312_v15  ;;  %v2413_v19 = vpop.f32.mrb[101].mxu1 }
 0x1c3   : > { %v1035_v20 = vpop.f32.mrb[102].mxu0  ;;  %v1315_v21 = vpop.f32.mrb[102].mxu1 }
 0x1c4   : > { %vm1433_vm6 = vcmp.gt.f32.partialorder %v1033_v16, 0.0  ;;  %v1571_v22 = vmul.f32 0.01, %v1033_v16  ;;  %v1036_v23 = vadd.f32 %v2994_v44, %v1035_v20  ;;  %v2274_v24 = vpop.f32.mrb[103].mxu0  ;;  %vm1503_vm7 = vcmp.gt.f32.partialorder %v1313_v18, 0.0  ;;  %v2414_v25 = vpop.f32.mrb[103].mxu1 }
 0x1c5   : > { %v1641_v26 = vmul.f32 0.01, %v1313_v18  ;;  %v1316_v27 = vadd.f32 %v2994_v44, %v1315_v21 }
 0x1c6   : > { %v1709_v28 = vsel %vm1433_vm6, %v1033_v16, %v1571_v22  ;;  %vm1434_vm8 = vcmp.gt.f32.partialorder %v1036_v23, 0.0  ;;  %v1572_v29 = vmul.f32 0.01, %v1036_v23 }
 0x1c7   : > { %1847 = vst [vmem:[%s2816_s14 + $0x190] sm:$0xff] %v1709_v28  ;;  %v1779_v30 = vsel %vm1503_vm7, %v1313_v18, %v1641_v26  ;;  %vm1504_vm9 = vcmp.gt.f32.partialorder %v1316_v27, 0.0  ;;  %v1642_v31 = vmul.f32 0.01, %v1316_v27 }
 0x1c8   : > { %v1710_v32 = vsel %vm1434_vm8, %v1036_v23, %v1572_v29  ;;  %1917 = vst [vmem:[%s2816_s14 + $0x3c0] sm:$0xff] %v1779_v30 }
 0x1c9   : > { %1848 = vst [vmem:[%s2816_s14 + $0x198] sm:$0xff] %v1710_v32  ;;  %v1780_v33 = vsel %vm1504_vm9, %v1316_v27, %v1642_v31  ;;  %v1040_v34 = vpop.f32.mrb[104].mxu0  ;;  %v1320_v35 = vpop.f32.mrb[104].mxu1 }
 0x1ca   : > { %1918 = vst [vmem:[%s2816_s14 + $0x3c8] sm:$0xff] %v1780_v33  ;;  %v1041_v36 = vadd.f32 %v2994_v44, %v1040_v34  ;;  %v2277_v37 = vpop.f32.mrb[105].mxu0  ;;  %v1321_v38 = vadd.f32 %v2994_v44, %v1320_v35  ;;  %v2417_v39 = vpop.f32.mrb[105].mxu1 }
 0x1cb   : > { %v1043_v40 = vpop.f32.mrb[106].mxu0  ;;  %v1323_v1 = vpop.f32.mrb[106].mxu1 }
 0x1cc   : > { %vm1435_vm10 = vcmp.gt.f32.partialorder %v1041_v36, 0.0  ;;  %v1573_v41 = vmul.f32 0.01, %v1041_v36  ;;  %v1044_v42 = vadd.f32 %v2994_v44, %v1043_v40  ;;  %v2278_v43 = vpop.f32.mrb[107].mxu0  ;;  %vm1505_vm11 = vcmp.gt.f32.partialorder %v1321_v38, 0.0  ;;  %v2418_v63 = vpop.f32.mrb[107].mxu1 }
 0x1cd   : > { %v1643_v45 = vmul.f32 0.01, %v1321_v38  ;;  %v1324_v46 = vadd.f32 %v2994_v44, %v1323_v1 }
 0x1ce   : > { %v1711_v47 = vsel %vm1435_vm10, %v1041_v36, %v1573_v41  ;;  %vm1436_vm12 = vcmp.gt.f32.partialorder %v1044_v42, 0.0  ;;  %v1574_v48 = vmul.f32 0.01, %v1044_v42 }
 0x1cf   : > { %1849 = vst [vmem:[%s2816_s14 + $0x1a0] sm:$0xff] %v1711_v47  ;;  %v1781_v49 = vsel %vm1505_vm11, %v1321_v38, %v1643_v45  ;;  %vm1506_vm13 = vcmp.gt.f32.partialorder %v1324_v46, 0.0  ;;  %v1644_v50 = vmul.f32 0.01, %v1324_v46 }
 0x1d0   : > { %v1712_v51 = vsel %vm1436_vm12, %v1044_v42, %v1574_v48  ;;  %1919 = vst [vmem:[%s2816_s14 + $0x3d0] sm:$0xff] %v1781_v49 }
 0x1d1   : > { %1850 = vst [vmem:[%s2816_s14 + $0x1a8] sm:$0xff] %v1712_v51  ;;  %v1782_v52 = vsel %vm1506_vm13, %v1324_v46, %v1644_v50  ;;  %v1048_v53 = vpop.f32.mrb[108].mxu0  ;;  %v1328_v54 = vpop.f32.mrb[108].mxu1 }
 0x1d2   : > { %1920 = vst [vmem:[%s2816_s14 + $0x3d8] sm:$0xff] %v1782_v52  ;;  %v1049_v55 = vadd.f32 %v2994_v44, %v1048_v53  ;;  %v2281_v56 = vpop.f32.mrb[109].mxu0  ;;  %v1329_v57 = vadd.f32 %v2994_v44, %v1328_v54  ;;  %v2421_v58 = vpop.f32.mrb[109].mxu1 }
 0x1d3   : > { %v1051_v59 = vpop.f32.mrb[110].mxu0  ;;  %v1331_v60 = vpop.f32.mrb[110].mxu1 }
 0x1d4   : > { %vm1437_vm14 = vcmp.gt.f32.partialorder %v1049_v55, 0.0  ;;  %v1575_v61 = vmul.f32 0.01, %v1049_v55  ;;  %v1052_v62 = vadd.f32 %v2994_v44, %v1051_v59  ;;  %v2282_v0 = vpop.f32.mrb[111].mxu0  ;;  %vm1507_vm0 = vcmp.gt.f32.partialorder %v1329_v57, 0.0  ;;  %v2422_v2 = vpop.f32.mrb[111].mxu1 }
 0x1d5   : > { %v1645_v3 = vmul.f32 0.01, %v1329_v57  ;;  %v1332_v4 = vadd.f32 %v2994_v44, %v1331_v60 }
 0x1d6   : > { %v1713_v5 = vsel %vm1437_vm14, %v1049_v55, %v1575_v61  ;;  %vm1438_vm15 = vcmp.gt.f32.partialorder %v1052_v62, 0.0  ;;  %v1576_v6 = vmul.f32 0.01, %v1052_v62 }
 0x1d7   : > { %1851 = vst [vmem:[%s2816_s14 + $0x1b0] sm:$0xff] %v1713_v5  ;;  %v1783_v7 = vsel %vm1507_vm0, %v1329_v57, %v1645_v3  ;;  %vm1508_vm1 = vcmp.gt.f32.partialorder %v1332_v4, 0.0  ;;  %v1646_v8 = vmul.f32 0.01, %v1332_v4 }
 0x1d8   : > { %v1714_v9 = vsel %vm1438_vm15, %v1052_v62, %v1576_v6  ;;  %1921 = vst [vmem:[%s2816_s14 + $0x3e0] sm:$0xff] %v1783_v7 }
 0x1d9   : > { %1852 = vst [vmem:[%s2816_s14 + $0x1b8] sm:$0xff] %v1714_v9  ;;  %v1784_v10 = vsel %vm1508_vm1, %v1332_v4, %v1646_v8  ;;  %v1056_v11 = vpop.f32.mrb[112].mxu0  ;;  %v1336_v12 = vpop.f32.mrb[112].mxu1 }
 0x1da   : > { %1922 = vst [vmem:[%s2816_s14 + $0x3e8] sm:$0xff] %v1784_v10  ;;  %v1057_v13 = vadd.f32 %v2994_v44, %v1056_v11  ;;  %v2285_v14 = vpop.f32.mrb[113].mxu0  ;;  %v1337_v15 = vadd.f32 %v2994_v44, %v1336_v12  ;;  %v2425_v16 = vpop.f32.mrb[113].mxu1 }
 0x1db   : > { %v1059_v17 = vpop.f32.mrb[114].mxu0  ;;  %v1339_v18 = vpop.f32.mrb[114].mxu1 }
 0x1dc   : > { %vm1439_vm2 = vcmp.gt.f32.partialorder %v1057_v13, 0.0  ;;  %v1577_v19 = vmul.f32 0.01, %v1057_v13  ;;  %v1060_v20 = vadd.f32 %v2994_v44, %v1059_v17  ;;  %v2286_v21 = vpop.f32.mrb[115].mxu0  ;;  %vm1509_vm3 = vcmp.gt.f32.partialorder %v1337_v15, 0.0  ;;  %v2426_v22 = vpop.f32.mrb[115].mxu1 }
 0x1dd   : > { %v1647_v23 = vmul.f32 0.01, %v1337_v15  ;;  %v1340_v24 = vadd.f32 %v2994_v44, %v1339_v18 }
 0x1de   : > { %v1715_v25 = vsel %vm1439_vm2, %v1057_v13, %v1577_v19  ;;  %vm1440_vm4 = vcmp.gt.f32.partialorder %v1060_v20, 0.0  ;;  %v1578_v26 = vmul.f32 0.01, %v1060_v20 }
 0x1df   : > { %1853 = vst [vmem:[%s2816_s14 + $0x1c0] sm:$0xff] %v1715_v25  ;;  %v1785_v27 = vsel %vm1509_vm3, %v1337_v15, %v1647_v23  ;;  %vm1510_vm5 = vcmp.gt.f32.partialorder %v1340_v24, 0.0  ;;  %v1648_v28 = vmul.f32 0.01, %v1340_v24 }
 0x1e0   : > { %v1716_v29 = vsel %vm1440_vm4, %v1060_v20, %v1578_v26  ;;  %1923 = vst [vmem:[%s2816_s14 + $0x3f0] sm:$0xff] %v1785_v27 }
 0x1e1   : > { %1854 = vst [vmem:[%s2816_s14 + $0x1c8] sm:$0xff] %v1716_v29  ;;  %v1786_v30 = vsel %vm1510_vm5, %v1340_v24, %v1648_v28  ;;  %v1064_v31 = vpop.f32.mrb[116].mxu0  ;;  %v1344_v32 = vpop.f32.mrb[116].mxu1 }
 0x1e2   : > { %1924 = vst [vmem:[%s2816_s14 + $0x3f8] sm:$0xff] %v1786_v30  ;;  %v1065_v33 = vadd.f32 %v2994_v44, %v1064_v31  ;;  %v2289_v34 = vpop.f32.mrb[117].mxu0  ;;  %v1345_v35 = vadd.f32 %v2994_v44, %v1344_v32  ;;  %v2429_v36 = vpop.f32.mrb[117].mxu1 }
 0x1e3   : > { %v1067_v37 = vpop.f32.mrb[118].mxu0  ;;  %v1347_v38 = vpop.f32.mrb[118].mxu1 }
 0x1e4   : > { %vm1441_vm6 = vcmp.gt.f32.partialorder %v1065_v33, 0.0  ;;  %v1579_v39 = vmul.f32 0.01, %v1065_v33  ;;  %v1068_v40 = vadd.f32 %v2994_v44, %v1067_v37  ;;  %v2290_v1 = vpop.f32.mrb[119].mxu0  ;;  %vm1511_vm7 = vcmp.gt.f32.partialorder %v1345_v35, 0.0  ;;  %v2430_v41 = vpop.f32.mrb[119].mxu1 }
 0x1e5   : > { %v1649_v42 = vmul.f32 0.01, %v1345_v35  ;;  %v1348_v43 = vadd.f32 %v2994_v44, %v1347_v38 }
 0x1e6   : > { %v1717_v63 = vsel %vm1441_vm6, %v1065_v33, %v1579_v39  ;;  %vm1442_vm8 = vcmp.gt.f32.partialorder %v1068_v40, 0.0  ;;  %v1580_v45 = vmul.f32 0.01, %v1068_v40 }
 0x1e7   : > { %1855 = vst [vmem:[%s2816_s14 + $0x1d0] sm:$0xff] %v1717_v63  ;;  %v1787_v46 = vsel %vm1511_vm7, %v1345_v35, %v1649_v42  ;;  %vm1512_vm9 = vcmp.gt.f32.partialorder %v1348_v43, 0.0  ;;  %v1650_v47 = vmul.f32 0.01, %v1348_v43 }
 0x1e8   : > { %v1718_v48 = vsel %vm1442_vm8, %v1068_v40, %v1580_v45  ;;  %1925 = vst [vmem:[%s2816_s14 + $0x400] sm:$0xff] %v1787_v46 }
 0x1e9   : > { %1856 = vst [vmem:[%s2816_s14 + $0x1d8] sm:$0xff] %v1718_v48  ;;  %v1788_v49 = vsel %vm1512_vm9, %v1348_v43, %v1650_v47  ;;  %v1072_v50 = vpop.f32.mrb[120].mxu0  ;;  %v1352_v51 = vpop.f32.mrb[120].mxu1 }
 0x1ea   : > { %1926 = vst [vmem:[%s2816_s14 + $0x408] sm:$0xff] %v1788_v49  ;;  %v1073_v52 = vadd.f32 %v2994_v44, %v1072_v50  ;;  %v2293_v53 = vpop.f32.mrb[121].mxu0  ;;  %v1353_v54 = vadd.f32 %v2994_v44, %v1352_v51  ;;  %v2433_v55 = vpop.f32.mrb[121].mxu1 }
 0x1eb   : > { %v1075_v56 = vpop.f32.mrb[122].mxu0  ;;  %v1355_v57 = vpop.f32.mrb[122].mxu1 }
 0x1ec   : > { %vm1443_vm10 = vcmp.gt.f32.partialorder %v1073_v52, 0.0  ;;  %v1581_v58 = vmul.f32 0.01, %v1073_v52  ;;  %v1076_v59 = vadd.f32 %v2994_v44, %v1075_v56  ;;  %v2294_v60 = vpop.f32.mrb[123].mxu0  ;;  %vm1513_vm11 = vcmp.gt.f32.partialorder %v1353_v54, 0.0  ;;  %v2434_v61 = vpop.f32.mrb[123].mxu1 }
 0x1ed   : > { %v1651_v62 = vmul.f32 0.01, %v1353_v54  ;;  %v1356_v0 = vadd.f32 %v2994_v44, %v1355_v57 }
 0x1ee   : > { %v1719_v2 = vsel %vm1443_vm10, %v1073_v52, %v1581_v58  ;;  %vm1444_vm12 = vcmp.gt.f32.partialorder %v1076_v59, 0.0  ;;  %v1582_v3 = vmul.f32 0.01, %v1076_v59 }
 0x1ef   : > { %1857 = vst [vmem:[%s2816_s14 + $0x1e0] sm:$0xff] %v1719_v2  ;;  %v1789_v4 = vsel %vm1513_vm11, %v1353_v54, %v1651_v62  ;;  %vm1514_vm13 = vcmp.gt.f32.partialorder %v1356_v0, 0.0  ;;  %v1652_v5 = vmul.f32 0.01, %v1356_v0 }
 0x1f0   : > { %v1720_v6 = vsel %vm1444_vm12, %v1076_v59, %v1582_v3  ;;  %1927 = vst [vmem:[%s2816_s14 + $0x410] sm:$0xff] %v1789_v4 }
 0x1f1   : > { %1858 = vst [vmem:[%s2816_s14 + $0x1e8] sm:$0xff] %v1720_v6  ;;  %v1790_v7 = vsel %vm1514_vm13, %v1356_v0, %v1652_v5  ;;  %v1080_v8 = vpop.f32.mrb[124].mxu0  ;;  %v1360_v9 = vpop.f32.mrb[124].mxu1 }
 0x1f2   : > { %1928 = vst [vmem:[%s2816_s14 + $0x418] sm:$0xff] %v1790_v7  ;;  %v1081_v10 = vadd.f32 %v2994_v44, %v1080_v8  ;;  %v2297_v11 = vpop.f32.mrb[125].mxu0  ;;  %v1361_v12 = vadd.f32 %v2994_v44, %v1360_v9  ;;  %v2437_v13 = vpop.f32.mrb[125].mxu1 }
 0x1f3   : > { %v1083_v14 = vpop.f32.mrb[126].mxu0  ;;  %v1363_v15 = vpop.f32.mrb[126].mxu1 }
 0x1f4   : > { %vm1445_vm14 = vcmp.gt.f32.partialorder %v1081_v10, 0.0  ;;  %v1583_v16 = vmul.f32 0.01, %v1081_v10  ;;  %v1084_v17 = vadd.f32 %v2994_v44, %v1083_v14  ;;  %v2298_v18 = vpop.f32.mrb[127].mxu0  ;;  %vm1515_vm0 = vcmp.gt.f32.partialorder %v1361_v12, 0.0  ;;  %v2438_v19 = vpop.f32.mrb[127].mxu1 }
 0x1f5   : > { %v1653_v20 = vmul.f32 0.01, %v1361_v12  ;;  %v1364_v21 = vadd.f32 %v2994_v44, %v1363_v15 }
 0x1f6   : > { %v1721_v22 = vsel %vm1445_vm14, %v1081_v10, %v1583_v16  ;;  %vm1446_vm15 = vcmp.gt.f32.partialorder %v1084_v17, 0.0  ;;  %v1584_v23 = vmul.f32 0.01, %v1084_v17 }
 0x1f7   : > { %1859 = vst [vmem:[%s2816_s14 + $0x1f0] sm:$0xff] %v1721_v22  ;;  %v1791_v24 = vsel %vm1515_vm0, %v1361_v12, %v1653_v20  ;;  %vm1516_vm1 = vcmp.gt.f32.partialorder %v1364_v21, 0.0  ;;  %v1654_v25 = vmul.f32 0.01, %v1364_v21 }
 0x1f8   : > { %v1722_v26 = vsel %vm1446_vm15, %v1084_v17, %v1584_v23  ;;  %1929 = vst [vmem:[%s2816_s14 + $0x420] sm:$0xff] %v1791_v24 }
 0x1f9   : > { %1860 = vst [vmem:[%s2816_s14 + $0x1f8] sm:$0xff] %v1722_v26  ;;  %v1792_v27 = vsel %vm1516_vm1, %v1364_v21, %v1654_v25  ;;  %v1088_v28 = vpop.f32.mrb[128].mxu0  ;;  %v1368_v29 = vpop.f32.mrb[128].mxu1 }
 0x1fa   : > { %1930 = vst [vmem:[%s2816_s14 + $0x428] sm:$0xff] %v1792_v27  ;;  %v1089_v30 = vadd.f32 %v2994_v44, %v1088_v28  ;;  %v2301_v31 = vpop.f32.mrb[129].mxu0  ;;  %v1369_v32 = vadd.f32 %v2994_v44, %v1368_v29  ;;  %v2441_v33 = vpop.f32.mrb[129].mxu1 }
 0x1fb   : > { %v1091_v34 = vpop.f32.mrb[130].mxu0  ;;  %v1371_v35 = vpop.f32.mrb[130].mxu1 }
 0x1fc   : > { %vm1447_vm2 = vcmp.gt.f32.partialorder %v1089_v30, 0.0  ;;  %v1585_v36 = vmul.f32 0.01, %v1089_v30  ;;  %v1092_v37 = vadd.f32 %v2994_v44, %v1091_v34  ;;  %v2302_v38 = vpop.f32.mrb[131].mxu0  ;;  %vm1517_vm3 = vcmp.gt.f32.partialorder %v1369_v32, 0.0  ;;  %v2442_v39 = vpop.f32.mrb[131].mxu1 }
 0x1fd   : > { %v1655_v40 = vmul.f32 0.01, %v1369_v32  ;;  %v1372_v1 = vadd.f32 %v2994_v44, %v1371_v35 }
 0x1fe   : > { %v1723_v41 = vsel %vm1447_vm2, %v1089_v30, %v1585_v36  ;;  %vm1448_vm4 = vcmp.gt.f32.partialorder %v1092_v37, 0.0  ;;  %v1586_v42 = vmul.f32 0.01, %v1092_v37 }
 0x1ff   : > { %1861 = vst [vmem:[%s2816_s14 + $0x200] sm:$0xff] %v1723_v41  ;;  %v1793_v43 = vsel %vm1517_vm3, %v1369_v32, %v1655_v40  ;;  %vm1518_vm5 = vcmp.gt.f32.partialorder %v1372_v1, 0.0  ;;  %v1656_v63 = vmul.f32 0.01, %v1372_v1 }
 0x200   : > { %v1724_v45 = vsel %vm1448_vm4, %v1092_v37, %v1586_v42  ;;  %1931 = vst [vmem:[%s2816_s14 + $0x430] sm:$0xff] %v1793_v43 }
 0x201   : > { %1862 = vst [vmem:[%s2816_s14 + $0x208] sm:$0xff] %v1724_v45  ;;  %v1794_v46 = vsel %vm1518_vm5, %v1372_v1, %v1656_v63  ;;  %v1096_v47 = vpop.f32.mrb[132].mxu0  ;;  %v1376_v48 = vpop.f32.mrb[132].mxu1 }
 0x202   : > { %1932 = vst [vmem:[%s2816_s14 + $0x438] sm:$0xff] %v1794_v46  ;;  %v1097_v49 = vadd.f32 %v2994_v44, %v1096_v47  ;;  %v2305_v50 = vpop.f32.mrb[133].mxu0  ;;  %v1377_v51 = vadd.f32 %v2994_v44, %v1376_v48  ;;  %v2445_v52 = vpop.f32.mrb[133].mxu1 }
 0x203   : > { %v1099_v53 = vpop.f32.mrb[134].mxu0  ;;  %v1379_v54 = vpop.f32.mrb[134].mxu1 }
 0x204   : > { %vm1449_vm6 = vcmp.gt.f32.partialorder %v1097_v49, 0.0  ;;  %v1587_v55 = vmul.f32 0.01, %v1097_v49  ;;  %v1100_v56 = vadd.f32 %v2994_v44, %v1099_v53  ;;  %v2306_v57 = vpop.f32.mrb[135].mxu0  ;;  %vm1519_vm7 = vcmp.gt.f32.partialorder %v1377_v51, 0.0  ;;  %v2446_v58 = vpop.f32.mrb[135].mxu1 }
 0x205   : > { %v1657_v59 = vmul.f32 0.01, %v1377_v51  ;;  %v1380_v60 = vadd.f32 %v2994_v44, %v1379_v54 }
 0x206   : > { %v1725_v61 = vsel %vm1449_vm6, %v1097_v49, %v1587_v55  ;;  %vm1450_vm8 = vcmp.gt.f32.partialorder %v1100_v56, 0.0  ;;  %v1588_v62 = vmul.f32 0.01, %v1100_v56 }
 0x207   : > { %1863 = vst [vmem:[%s2816_s14 + $0x210] sm:$0xff] %v1725_v61  ;;  %v1795_v0 = vsel %vm1519_vm7, %v1377_v51, %v1657_v59  ;;  %vm1520_vm9 = vcmp.gt.f32.partialorder %v1380_v60, 0.0  ;;  %v1658_v2 = vmul.f32 0.01, %v1380_v60 }
 0x208   : > { %v1726_v3 = vsel %vm1450_vm8, %v1100_v56, %v1588_v62  ;;  %1933 = vst [vmem:[%s2816_s14 + $0x440] sm:$0xff] %v1795_v0 }
 0x209   : > { %1864 = vst [vmem:[%s2816_s14 + $0x218] sm:$0xff] %v1726_v3  ;;  %v1796_v4 = vsel %vm1520_vm9, %v1380_v60, %v1658_v2  ;;  %v1104_v5 = vpop.f32.mrb[136].mxu0 }
 0x20a   : > { %1934 = vst [vmem:[%s2816_s14 + $0x448] sm:$0xff] %v1796_v4  ;;  %v1105_v6 = vadd.f32 %v2994_v44, %v1104_v5  ;;  %v2309_v7 = vpop.f32.mrb[137].mxu0 }
 0x20b   : > { %v1107_v8 = vpop.f32.mrb[138].mxu0 }
 0x20c   : > { %vm1451_vm10 = vcmp.gt.f32.partialorder %v1105_v6, 0.0  ;;  %v1589_v9 = vmul.f32 0.01, %v1105_v6  ;;  %v1108_v10 = vadd.f32 %v2994_v44, %v1107_v8  ;;  %v2310_v11 = vpop.f32.mrb[139].mxu0 }
 0x20e   : > { %v1727_v12 = vsel %vm1451_vm10, %v1105_v6, %v1589_v9  ;;  %vm1452_vm11 = vcmp.gt.f32.partialorder %v1108_v10, 0.0  ;;  %v1590_v13 = vmul.f32 0.01, %v1108_v10 }
 0x20f   : > { %1865 = vst [vmem:[%s2816_s14 + $0x220] sm:$0xff] %v1727_v12 }
 0x210   : > { %v1728_v14 = vsel %vm1452_vm11, %v1108_v10, %v1590_v13 }
 0x211   : > { %1866 = vst [vmem:[%s2816_s14 + $0x228] sm:$0xff] %v1728_v14 }
 0x212 PF: > { %s13_s12 = sadd.s32 1, %s2557_s12  }
 0x213   : > { %p10_p4 = scmp.ge.s32.totalorder %s13_s12, 4  }
 0x215   :  { %12 = sbr.rel (!%p10_p4) target bundleno = 1 (0x1), region = 62 }

// kernel: forward.6
= control target key start
LH: loop header
LB: loop body
LE: loop exit
PB: predicated region body
PF: predicated region fallthrough
CT: control target
= control target key end

     0   :  { %v1330_v0 = vmov 0.0   ;;  %vm1331_vm0 = vmmov 0   ;;  %s1880_s1 = inlined_call_operand.vmem [shape: bf16[128,128], index: 1, kind: input, shape index: {}]   ;;  %s1881_s0 = inlined_call_operand.vmem [shape: bf16[592,128], index: 0, kind: input, shape index: {}]   ;;  %s1882_s2 = inlined_call_operand.vmem [shape: f32[1,128], index: 2, kind: input, shape index: {}]   ;;  %s1883_s3 = inlined_call_operand.vmem [shape: f32[592,128], index: 3, kind: output, shape index: {}]  }
   0x1   :  { %1102 = vmatprep.subr.bf16.mxu0 %v1330_v0  ;;  %v1284_v1 = vld [vmem:[%s1880_s1] sm:$0xff]   ;;  %1266 = vmatprep.subr.bf16.mxu1 %v1330_v0  ;;  %v1285_v2 = vld [vmem:[%s1880_s1 + $0x8] sm:$0xff]   ;;  %v1286_v3 = vld [vmem:[%s1880_s1 + $0x10] sm:$0xff]  }
   0x2   :  { %1118 = vmatprep.mubr.msk.bf16.mxu0 %vm1331_vm0, %v1330_v0  ;;  %1194 = vmatprep.mubr.msk.bf16.mxu1 %vm1331_vm0, %v1330_v0  ;;  %v1287_v4 = vld [vmem:[%s1880_s1 + $0x18] sm:$0xff]   ;;  %v1288_v5 = vld [vmem:[%s1880_s1 + $0x20] sm:$0xff]   ;;  %v1289_v6 = vld [vmem:[%s1880_s1 + $0x28] sm:$0xff]  }
   0x3   :  { %1103 = vmatpush3.bf16.msra.mxu0 %v1284_v1  ;;  %1274 = vmatpush3.bf16.msra.mxu1 %v1284_v1  ;;  %v1290_v7 = vld [vmem:[%s1880_s1 + $0x30] sm:$0xff]   ;;  %v1291_v8 = vld [vmem:[%s1880_s1 + $0x38] sm:$0xff]   ;;  %v1292_v9 = vld [vmem:[%s1881_s0] sm:$0xff]  }
   0x4   :  { %1104 = vmatprep.subr.bf16.mxu0 %v1330_v0  ;;  %1267 = vmatprep.subr.bf16.mxu1 %v1330_v0  ;;  %v1293_v10 = vld [vmem:[%s1881_s0 + $0x98] sm:$0xff]   ;;  %v1294_v11 = vld [vmem:[%s1881_s0 + $0x8] sm:$0xff]   ;;  %v1295_v12 = vld [vmem:[%s1881_s0 + $0xa0] sm:$0xff]  }
   0x5   :  { %v1296_v13 = vld [vmem:[%s1881_s0 + $0x10] sm:$0xff]   ;;  %v1297_v14 = vld [vmem:[%s1881_s0 + $0xa8] sm:$0xff]   ;;  %v1298_v15 = vld [vmem:[%s1881_s0 + $0x18] sm:$0xff]  }
   0x6   :  { %v1299_v16 = vld [vmem:[%s1881_s0 + $0xb0] sm:$0xff]   ;;  %v1300_v17 = vld [vmem:[%s1881_s0 + $0x20] sm:$0xff]   ;;  %v1301_v18 = vld [vmem:[%s1881_s0 + $0xb8] sm:$0xff]  }
   0x7   :  { %1105 = vmatpush3.bf16.msra.mxu0 %v1285_v2  ;;  %1275 = vmatpush3.bf16.msra.mxu1 %v1285_v2  ;;  %v1302_v19 = vld [vmem:[%s1881_s0 + $0x28] sm:$0xff]   ;;  %v1303_v20 = vld [vmem:[%s1881_s0 + $0xc0] sm:$0xff]   ;;  %v1304_v21 = vld [vmem:[%s1881_s0 + $0x30] sm:$0xff]  }
   0x8   :  { %1106 = vmatprep.subr.bf16.mxu0 %v1330_v0  ;;  %1268 = vmatprep.subr.bf16.mxu1 %v1330_v0  ;;  %v1305_v22 = vld [vmem:[%s1881_s0 + $0xc8] sm:$0xff]   ;;  %v1306_v23 = vld [vmem:[%s1881_s0 + $0x38] sm:$0xff]   ;;  %v1307_v24 = vld [vmem:[%s1881_s0 + $0xd0] sm:$0xff]  }
   0x9   :  { %v1308_v25 = vld [vmem:[%s1881_s0 + $0x40] sm:$0xff]   ;;  %v1309_v26 = vld [vmem:[%s1881_s0 + $0xd8] sm:$0xff]   ;;  %v1310_v27 = vld [vmem:[%s1881_s0 + $0x48] sm:$0xff]  }
   0xa   :  { %v1311_v28 = vld [vmem:[%s1881_s0 + $0xe0] sm:$0xff]   ;;  %v1312_v29 = vld [vmem:[%s1881_s0 + $0x50] sm:$0xff]   ;;  %v1313_v30 = vld [vmem:[%s1881_s0 + $0xe8] sm:$0xff]  }
   0xb   :  { %1107 = vmatpush3.bf16.msra.mxu0 %v1286_v3  ;;  %1276 = vmatpush3.bf16.msra.mxu1 %v1286_v3  ;;  %v1314_v31 = vld [vmem:[%s1881_s0 + $0x58] sm:$0xff]   ;;  %v1315_v32 = vld [vmem:[%s1881_s0 + $0xf0] sm:$0xff]   ;;  %v1316_v33 = vld [vmem:[%s1881_s0 + $0x60] sm:$0xff]  }
   0xc   :  { %1108 = vmatprep.subr.bf16.mxu0 %v1330_v0  ;;  %1269 = vmatprep.subr.bf16.mxu1 %v1330_v0  ;;  %v1317_v34 = vld [vmem:[%s1881_s0 + $0xf8] sm:$0xff]   ;;  %v1318_v35 = vld [vmem:[%s1881_s0 + $0x68] sm:$0xff]   ;;  %v1319_v36 = vld [vmem:[%s1881_s0 + $0x100] sm:$0xff]  }
   0xd   :  { %v1320_v37 = vld [vmem:[%s1881_s0 + $0x70] sm:$0xff]   ;;  %v1321_v38 = vld [vmem:[%s1881_s0 + $0x108] sm:$0xff]   ;;  %v1322_v39 = vld [vmem:[%s1881_s0 + $0x78] sm:$0xff]  }
   0xe   :  { %v1323_v40 = vld [vmem:[%s1881_s0 + $0x110] sm:$0xff]   ;;  %v1324_v41 = vld [vmem:[%s1881_s0 + $0x80] sm:$0xff]   ;;  %v1325_v42 = vld [vmem:[%s1881_s0 + $0x118] sm:$0xff]  }
   0xf   :  { %1109 = vmatpush3.bf16.msra.mxu0 %v1287_v4  ;;  %1277 = vmatpush3.bf16.msra.mxu1 %v1287_v4  ;;  %v1326_v43 = vld [vmem:[%s1881_s0 + $0x88] sm:$0xff]   ;;  %v1327_v44 = vld [vmem:[%s1881_s0 + $0x120] sm:$0xff]   ;;  %v1328_v45 = vld [vmem:[%s1881_s0 + $0x90] sm:$0xff]  }
  0x10   :  { %1110 = vmatprep.subr.bf16.mxu0 %v1330_v0  ;;  %1270 = vmatprep.subr.bf16.mxu1 %v1330_v0  ;;  %v1580_v46 = vld [vmem:[%s1882_s2] ss:$0 sm:$0xff] }
  0x13   :  { %1111 = vmatpush3.bf16.msra.mxu0 %v1288_v5  ;;  %1278 = vmatpush3.bf16.msra.mxu1 %v1288_v5 }
  0x14   :  { %1112 = vmatprep.subr.bf16.mxu0 %v1330_v0  ;;  %1271 = vmatprep.subr.bf16.mxu1 %v1330_v0 }
  0x17   :  { %1113 = vmatpush3.bf16.msra.mxu0 %v1289_v6  ;;  %1279 = vmatpush3.bf16.msra.mxu1 %v1289_v6 }
  0x18   :  { %1114 = vmatprep.subr.bf16.mxu0 %v1330_v0  ;;  %1272 = vmatprep.subr.bf16.mxu1 %v1330_v0 }
  0x1b   :  { %1115 = vmatpush3.bf16.msra.mxu0 %v1290_v7  ;;  %1280 = vmatpush3.bf16.msra.mxu1 %v1290_v7 }
  0x1c   :  { %1116 = vmatprep.subr.bf16.mxu0 %v1330_v0  ;;  %1273 = vmatprep.subr.bf16.mxu1 %v1330_v0 }
  0x1f   :  { %1117 = vmatpush3.bf16.msra.mxu0 %v1291_v8  ;;  %1281 = vmatpush3.bf16.msra.mxu1 %v1291_v8 }
  0x22   :  { %1119 = vmatmul.mubr.bf16.vlgmr.msra.gmra.mrb[0].mxu0 %v1292_v9  ;;  %1195 = vmatmul.mubr.bf16.vlgmr.msra.gmra.mrb[0].mxu1 %v1293_v10 }
  0x23   :  { %1122 = vmatprep.mubr.msk.bf16.mxu0 %vm1331_vm0, %v1330_v0  ;;  %1198 = vmatprep.mubr.msk.bf16.mxu1 %vm1331_vm0, %v1330_v0 }
  0x2a   :  { %1123 = vmatmul.mubr.bf16.gmra.mrb[4].mxu0 %v1294_v11  ;;  %1199 = vmatmul.mubr.bf16.gmra.mrb[4].mxu1 %v1295_v12 }
  0x2b   :  { %1126 = vmatprep.mubr.msk.bf16.mxu0 %vm1331_vm0, %v1330_v0  ;;  %1202 = vmatprep.mubr.msk.bf16.mxu1 %vm1331_vm0, %v1330_v0 }
  0x32   :  { %1127 = vmatmul.mubr.bf16.gmra.mrb[8].mxu0 %v1296_v13  ;;  %1203 = vmatmul.mubr.bf16.gmra.mrb[8].mxu1 %v1297_v14 }
  0x33   :  { %1130 = vmatprep.mubr.msk.bf16.mxu0 %vm1331_vm0, %v1330_v0  ;;  %1206 = vmatprep.mubr.msk.bf16.mxu1 %vm1331_vm0, %v1330_v0 }
  0x3a   :  { %1131 = vmatmul.mubr.bf16.gmra.mrb[12].mxu0 %v1298_v15  ;;  %1207 = vmatmul.mubr.bf16.gmra.mrb[12].mxu1 %v1299_v16 }
  0x3b   :  { %1134 = vmatprep.mubr.msk.bf16.mxu0 %vm1331_vm0, %v1330_v0  ;;  %1210 = vmatprep.mubr.msk.bf16.mxu1 %vm1331_vm0, %v1330_v0 }
  0x42   :  { %1135 = vmatmul.mubr.bf16.gmra.mrb[16].mxu0 %v1300_v17  ;;  %1211 = vmatmul.mubr.bf16.gmra.mrb[16].mxu1 %v1301_v18 }
  0x43   :  { %1138 = vmatprep.mubr.msk.bf16.mxu0 %vm1331_vm0, %v1330_v0  ;;  %1214 = vmatprep.mubr.msk.bf16.mxu1 %vm1331_vm0, %v1330_v0 }
  0x4a   :  { %1139 = vmatmul.mubr.bf16.gmra.mrb[20].mxu0 %v1302_v19  ;;  %1215 = vmatmul.mubr.bf16.gmra.mrb[20].mxu1 %v1303_v20 }
  0x4b   :  { %1142 = vmatprep.mubr.msk.bf16.mxu0 %vm1331_vm0, %v1330_v0  ;;  %1218 = vmatprep.mubr.msk.bf16.mxu1 %vm1331_vm0, %v1330_v0 }
  0x52   :  { %1143 = vmatmul.mubr.bf16.gmra.mrb[24].mxu0 %v1304_v21  ;;  %1219 = vmatmul.mubr.bf16.gmra.mrb[24].mxu1 %v1305_v22 }
  0x53   :  { %1146 = vmatprep.mubr.msk.bf16.mxu0 %vm1331_vm0, %v1330_v0  ;;  %1222 = vmatprep.mubr.msk.bf16.mxu1 %vm1331_vm0, %v1330_v0 }
  0x5a   :  { %1147 = vmatmul.mubr.bf16.gmra.mrb[28].mxu0 %v1306_v23  ;;  %1223 = vmatmul.mubr.bf16.gmra.mrb[28].mxu1 %v1307_v24 }
  0x5b   :  { %1150 = vmatprep.mubr.msk.bf16.mxu0 %vm1331_vm0, %v1330_v0  ;;  %1226 = vmatprep.mubr.msk.bf16.mxu1 %vm1331_vm0, %v1330_v0 }
  0x62   :  { %1151 = vmatmul.mubr.bf16.gmra.mrb[32].mxu0 %v1308_v25  ;;  %1227 = vmatmul.mubr.bf16.gmra.mrb[32].mxu1 %v1309_v26 }
  0x63   :  { %1154 = vmatprep.mubr.msk.bf16.mxu0 %vm1331_vm0, %v1330_v0  ;;  %1230 = vmatprep.mubr.msk.bf16.mxu1 %vm1331_vm0, %v1330_v0 }
  0x6a   :  { %1155 = vmatmul.mubr.bf16.gmra.mrb[36].mxu0 %v1310_v27  ;;  %1231 = vmatmul.mubr.bf16.gmra.mrb[36].mxu1 %v1311_v28 }
  0x6b   :  { %1158 = vmatprep.mubr.msk.bf16.mxu0 %vm1331_vm0, %v1330_v0  ;;  %1234 = vmatprep.mubr.msk.bf16.mxu1 %vm1331_vm0, %v1330_v0 }
  0x72   :  { %1159 = vmatmul.mubr.bf16.gmra.mrb[40].mxu0 %v1312_v29  ;;  %1235 = vmatmul.mubr.bf16.gmra.mrb[40].mxu1 %v1313_v30 }
  0x73   :  { %1162 = vmatprep.mubr.msk.bf16.mxu0 %vm1331_vm0, %v1330_v0  ;;  %1238 = vmatprep.mubr.msk.bf16.mxu1 %vm1331_vm0, %v1330_v0 }
  0x7a   :  { %1163 = vmatmul.mubr.bf16.gmra.mrb[44].mxu0 %v1314_v31  ;;  %1239 = vmatmul.mubr.bf16.gmra.mrb[44].mxu1 %v1315_v32 }
  0x7b   :  { %1166 = vmatprep.mubr.msk.bf16.mxu0 %vm1331_vm0, %v1330_v0  ;;  %1242 = vmatprep.mubr.msk.bf16.mxu1 %vm1331_vm0, %v1330_v0 }
  0x82   :  { %1167 = vmatmul.mubr.bf16.gmra.mrb[48].mxu0 %v1316_v33  ;;  %1243 = vmatmul.mubr.bf16.gmra.mrb[48].mxu1 %v1317_v34 }
  0x83   :  { %1170 = vmatprep.mubr.msk.bf16.mxu0 %vm1331_vm0, %v1330_v0  ;;  %1246 = vmatprep.mubr.msk.bf16.mxu1 %vm1331_vm0, %v1330_v0 }
  0x8a   :  { %1171 = vmatmul.mubr.bf16.gmra.mrb[52].mxu0 %v1318_v35  ;;  %1247 = vmatmul.mubr.bf16.gmra.mrb[52].mxu1 %v1319_v36 }
  0x8b   :  { %1174 = vmatprep.mubr.msk.bf16.mxu0 %vm1331_vm0, %v1330_v0  ;;  %1250 = vmatprep.mubr.msk.bf16.mxu1 %vm1331_vm0, %v1330_v0 }
  0x92   :  { %1175 = vmatmul.mubr.bf16.gmra.mrb[56].mxu0 %v1320_v37  ;;  %1251 = vmatmul.mubr.bf16.gmra.mrb[56].mxu1 %v1321_v38 }
  0x93   :  { %1178 = vmatprep.mubr.msk.bf16.mxu0 %vm1331_vm0, %v1330_v0  ;;  %1254 = vmatprep.mubr.msk.bf16.mxu1 %vm1331_vm0, %v1330_v0 }
  0x9a   :  { %1179 = vmatmul.mubr.bf16.gmra.mrb[60].mxu0 %v1322_v39  ;;  %1255 = vmatmul.mubr.bf16.gmra.mrb[60].mxu1 %v1323_v40 }
  0x9b   :  { %1182 = vmatprep.mubr.msk.bf16.mxu0 %vm1331_vm0, %v1330_v0  ;;  %1258 = vmatprep.mubr.msk.bf16.mxu1 %vm1331_vm0, %v1330_v0 }
  0xa2   :  { %1183 = vmatmul.mubr.bf16.gmra.mrb[64].mxu0 %v1324_v41  ;;  %1259 = vmatmul.mubr.bf16.gmra.mrb[64].mxu1 %v1325_v42 }
  0xa3   :  { %1186 = vmatprep.mubr.msk.bf16.mxu0 %vm1331_vm0, %v1330_v0  ;;  %1262 = vmatprep.mubr.msk.bf16.mxu1 %vm1331_vm0, %v1330_v0 }
  0xaa   :  { %1187 = vmatmul.mubr.bf16.gmra.mrb[68].mxu0 %v1326_v43  ;;  %1263 = vmatmul.mubr.bf16.gmra.mrb[68].mxu1 %v1327_v44 }
  0xab   :  { %1190 = vmatprep.mubr.msk.bf16.mxu0 %vm1331_vm0, %v1330_v0 }
  0xb2   :  { %1191 = vmatmul.mubr.bf16.gmra.mrb[72].mxu0 %v1328_v45 }
  0xf5   :  { %v416_v47 = vpop.f32.mrb[0].mxu0  ;;  %v568_v48 = vpop.f32.mrb[0].mxu1 }
  0xf6   :  { %v417_v49 = vadd.f32 %v1580_v46, %v416_v47  ;;  %v1120_v50 = vpop.f32.mrb[1].mxu0  ;;  %v569_v51 = vadd.f32 %v1580_v46, %v568_v48  ;;  %v1196_v52 = vpop.f32.mrb[1].mxu1 }
  0xf7   :  { %v419_v53 = vpop.f32.mrb[2].mxu0  ;;  %v571_v54 = vpop.f32.mrb[2].mxu1 }
  0xf8   :  { %vm711_vm1 = vcmp.gt.f32.partialorder %v417_v49, 0.0  ;;  %v785_v55 = vmul.f32 0.01, %v417_v49  ;;  %v420_v56 = vadd.f32 %v1580_v46, %v419_v53  ;;  %v1121_v57 = vpop.f32.mrb[3].mxu0  ;;  %vm749_vm2 = vcmp.gt.f32.partialorder %v569_v51, 0.0  ;;  %v1197_v58 = vpop.f32.mrb[3].mxu1 }
  0xf9   :  { %v823_v59 = vmul.f32 0.01, %v569_v51  ;;  %v572_v60 = vadd.f32 %v1580_v46, %v571_v54 }
  0xfa   :  { %v859_v61 = vsel %vm711_vm1, %v417_v49, %v785_v55  ;;  %vm712_vm3 = vcmp.gt.f32.partialorder %v420_v56, 0.0  ;;  %v786_v62 = vmul.f32 0.01, %v420_v56 }
  0xfb   :  { %933 = vst [vmem:[%s1883_s3] sm:$0xff] %v859_v61  ;;  %v897_v63 = vsel %vm749_vm2, %v569_v51, %v823_v59  ;;  %vm750_vm4 = vcmp.gt.f32.partialorder %v572_v60, 0.0  ;;  %v824_v0 = vmul.f32 0.01, %v572_v60 }
  0xfc   :  { %v860_v1 = vsel %vm712_vm3, %v420_v56, %v786_v62  ;;  %971 = vst [vmem:[%s1883_s3 + $0x130] sm:$0xff] %v897_v63 }
  0xfd   :  { %934 = vst [vmem:[%s1883_s3 + $0x8] sm:$0xff] %v860_v1  ;;  %v898_v2 = vsel %vm750_vm4, %v572_v60, %v824_v0  ;;  %v424_v3 = vpop.f32.mrb[4].mxu0  ;;  %v576_v4 = vpop.f32.mrb[4].mxu1 }
  0xfe   :  { %972 = vst [vmem:[%s1883_s3 + $0x138] sm:$0xff] %v898_v2  ;;  %v425_v5 = vadd.f32 %v1580_v46, %v424_v3  ;;  %v1124_v6 = vpop.f32.mrb[5].mxu0  ;;  %v577_v7 = vadd.f32 %v1580_v46, %v576_v4  ;;  %v1200_v8 = vpop.f32.mrb[5].mxu1 }
  0xff   :  { %v427_v9 = vpop.f32.mrb[6].mxu0  ;;  %v579_v10 = vpop.f32.mrb[6].mxu1 }
 0x100   :  { %vm713_vm5 = vcmp.gt.f32.partialorder %v425_v5, 0.0  ;;  %v787_v11 = vmul.f32 0.01, %v425_v5  ;;  %v428_v12 = vadd.f32 %v1580_v46, %v427_v9  ;;  %v1125_v13 = vpop.f32.mrb[7].mxu0  ;;  %vm751_vm6 = vcmp.gt.f32.partialorder %v577_v7, 0.0  ;;  %v1201_v14 = vpop.f32.mrb[7].mxu1 }
 0x101   :  { %v825_v15 = vmul.f32 0.01, %v577_v7  ;;  %v580_v16 = vadd.f32 %v1580_v46, %v579_v10 }
 0x102   :  { %v861_v17 = vsel %vm713_vm5, %v425_v5, %v787_v11  ;;  %vm714_vm7 = vcmp.gt.f32.partialorder %v428_v12, 0.0  ;;  %v788_v18 = vmul.f32 0.01, %v428_v12 }
 0x103   :  { %935 = vst [vmem:[%s1883_s3 + $0x10] sm:$0xff] %v861_v17  ;;  %v899_v19 = vsel %vm751_vm6, %v577_v7, %v825_v15  ;;  %vm752_vm8 = vcmp.gt.f32.partialorder %v580_v16, 0.0  ;;  %v826_v20 = vmul.f32 0.01, %v580_v16 }
 0x104   :  { %v862_v21 = vsel %vm714_vm7, %v428_v12, %v788_v18  ;;  %973 = vst [vmem:[%s1883_s3 + $0x140] sm:$0xff] %v899_v19 }
 0x105   :  { %936 = vst [vmem:[%s1883_s3 + $0x18] sm:$0xff] %v862_v21  ;;  %v900_v22 = vsel %vm752_vm8, %v580_v16, %v826_v20  ;;  %v432_v23 = vpop.f32.mrb[8].mxu0  ;;  %v584_v24 = vpop.f32.mrb[8].mxu1 }
 0x106   :  { %974 = vst [vmem:[%s1883_s3 + $0x148] sm:$0xff] %v900_v22  ;;  %v433_v25 = vadd.f32 %v1580_v46, %v432_v23  ;;  %v1128_v26 = vpop.f32.mrb[9].mxu0  ;;  %v585_v27 = vadd.f32 %v1580_v46, %v584_v24  ;;  %v1204_v28 = vpop.f32.mrb[9].mxu1 }
 0x107   :  { %v435_v29 = vpop.f32.mrb[10].mxu0  ;;  %v587_v30 = vpop.f32.mrb[10].mxu1 }
 0x108   :  { %vm715_vm9 = vcmp.gt.f32.partialorder %v433_v25, 0.0  ;;  %v789_v31 = vmul.f32 0.01, %v433_v25  ;;  %v436_v32 = vadd.f32 %v1580_v46, %v435_v29  ;;  %v1129_v33 = vpop.f32.mrb[11].mxu0  ;;  %vm753_vm10 = vcmp.gt.f32.partialorder %v585_v27, 0.0  ;;  %v1205_v34 = vpop.f32.mrb[11].mxu1 }
 0x109   :  { %v827_v35 = vmul.f32 0.01, %v585_v27  ;;  %v588_v36 = vadd.f32 %v1580_v46, %v587_v30 }
 0x10a   :  { %v863_v37 = vsel %vm715_vm9, %v433_v25, %v789_v31  ;;  %vm716_vm11 = vcmp.gt.f32.partialorder %v436_v32, 0.0  ;;  %v790_v38 = vmul.f32 0.01, %v436_v32 }
 0x10b   :  { %937 = vst [vmem:[%s1883_s3 + $0x20] sm:$0xff] %v863_v37  ;;  %v901_v39 = vsel %vm753_vm10, %v585_v27, %v827_v35  ;;  %vm754_vm12 = vcmp.gt.f32.partialorder %v588_v36, 0.0  ;;  %v828_v40 = vmul.f32 0.01, %v588_v36 }
 0x10c   :  { %v864_v41 = vsel %vm716_vm11, %v436_v32, %v790_v38  ;;  %975 = vst [vmem:[%s1883_s3 + $0x150] sm:$0xff] %v901_v39 }
 0x10d   :  { %938 = vst [vmem:[%s1883_s3 + $0x28] sm:$0xff] %v864_v41  ;;  %v902_v42 = vsel %vm754_vm12, %v588_v36, %v828_v40  ;;  %v440_v43 = vpop.f32.mrb[12].mxu0  ;;  %v592_v44 = vpop.f32.mrb[12].mxu1 }
 0x10e   :  { %976 = vst [vmem:[%s1883_s3 + $0x158] sm:$0xff] %v902_v42  ;;  %v441_v45 = vadd.f32 %v1580_v46, %v440_v43  ;;  %v1132_v47 = vpop.f32.mrb[13].mxu0  ;;  %v593_v48 = vadd.f32 %v1580_v46, %v592_v44  ;;  %v1208_v49 = vpop.f32.mrb[13].mxu1 }
 0x10f   :  { %v443_v50 = vpop.f32.mrb[14].mxu0  ;;  %v595_v51 = vpop.f32.mrb[14].mxu1 }
 0x110   :  { %vm717_vm13 = vcmp.gt.f32.partialorder %v441_v45, 0.0  ;;  %v791_v52 = vmul.f32 0.01, %v441_v45  ;;  %v444_v53 = vadd.f32 %v1580_v46, %v443_v50  ;;  %v1133_v54 = vpop.f32.mrb[15].mxu0  ;;  %vm755_vm14 = vcmp.gt.f32.partialorder %v593_v48, 0.0  ;;  %v1209_v55 = vpop.f32.mrb[15].mxu1 }
 0x111   :  { %v829_v56 = vmul.f32 0.01, %v593_v48  ;;  %v596_v57 = vadd.f32 %v1580_v46, %v595_v51 }
 0x112   :  { %v865_v58 = vsel %vm717_vm13, %v441_v45, %v791_v52  ;;  %vm718_vm15 = vcmp.gt.f32.partialorder %v444_v53, 0.0  ;;  %v792_v59 = vmul.f32 0.01, %v444_v53 }
 0x113   :  { %939 = vst [vmem:[%s1883_s3 + $0x30] sm:$0xff] %v865_v58  ;;  %v903_v60 = vsel %vm755_vm14, %v593_v48, %v829_v56  ;;  %vm756_vm0 = vcmp.gt.f32.partialorder %v596_v57, 0.0  ;;  %v830_v61 = vmul.f32 0.01, %v596_v57 }
 0x114   :  { %v866_v62 = vsel %vm718_vm15, %v444_v53, %v792_v59  ;;  %977 = vst [vmem:[%s1883_s3 + $0x160] sm:$0xff] %v903_v60 }
 0x115   :  { %940 = vst [vmem:[%s1883_s3 + $0x38] sm:$0xff] %v866_v62  ;;  %v904_v63 = vsel %vm756_vm0, %v596_v57, %v830_v61  ;;  %v448_v0 = vpop.f32.mrb[16].mxu0  ;;  %v600_v1 = vpop.f32.mrb[16].mxu1 }
 0x116   :  { %978 = vst [vmem:[%s1883_s3 + $0x168] sm:$0xff] %v904_v63  ;;  %v449_v2 = vadd.f32 %v1580_v46, %v448_v0  ;;  %v1136_v3 = vpop.f32.mrb[17].mxu0  ;;  %v601_v4 = vadd.f32 %v1580_v46, %v600_v1  ;;  %v1212_v5 = vpop.f32.mrb[17].mxu1 }
 0x117   :  { %v451_v6 = vpop.f32.mrb[18].mxu0  ;;  %v603_v7 = vpop.f32.mrb[18].mxu1 }
 0x118   :  { %vm719_vm1 = vcmp.gt.f32.partialorder %v449_v2, 0.0  ;;  %v793_v8 = vmul.f32 0.01, %v449_v2  ;;  %v452_v9 = vadd.f32 %v1580_v46, %v451_v6  ;;  %v1137_v10 = vpop.f32.mrb[19].mxu0  ;;  %vm757_vm2 = vcmp.gt.f32.partialorder %v601_v4, 0.0  ;;  %v1213_v11 = vpop.f32.mrb[19].mxu1 }
 0x119   :  { %v831_v12 = vmul.f32 0.01, %v601_v4  ;;  %v604_v13 = vadd.f32 %v1580_v46, %v603_v7 }
 0x11a   :  { %v867_v14 = vsel %vm719_vm1, %v449_v2, %v793_v8  ;;  %vm720_vm3 = vcmp.gt.f32.partialorder %v452_v9, 0.0  ;;  %v794_v15 = vmul.f32 0.01, %v452_v9 }
 0x11b   :  { %941 = vst [vmem:[%s1883_s3 + $0x40] sm:$0xff] %v867_v14  ;;  %v905_v16 = vsel %vm757_vm2, %v601_v4, %v831_v12  ;;  %vm758_vm4 = vcmp.gt.f32.partialorder %v604_v13, 0.0  ;;  %v832_v17 = vmul.f32 0.01, %v604_v13 }
 0x11c   :  { %v868_v18 = vsel %vm720_vm3, %v452_v9, %v794_v15  ;;  %979 = vst [vmem:[%s1883_s3 + $0x170] sm:$0xff] %v905_v16 }
 0x11d   :  { %942 = vst [vmem:[%s1883_s3 + $0x48] sm:$0xff] %v868_v18  ;;  %v906_v19 = vsel %vm758_vm4, %v604_v13, %v832_v17  ;;  %v456_v20 = vpop.f32.mrb[20].mxu0  ;;  %v608_v21 = vpop.f32.mrb[20].mxu1 }
 0x11e   :  { %980 = vst [vmem:[%s1883_s3 + $0x178] sm:$0xff] %v906_v19  ;;  %v457_v22 = vadd.f32 %v1580_v46, %v456_v20  ;;  %v1140_v23 = vpop.f32.mrb[21].mxu0  ;;  %v609_v24 = vadd.f32 %v1580_v46, %v608_v21  ;;  %v1216_v25 = vpop.f32.mrb[21].mxu1 }
 0x11f   :  { %v459_v26 = vpop.f32.mrb[22].mxu0  ;;  %v611_v27 = vpop.f32.mrb[22].mxu1 }
 0x120   :  { %vm721_vm5 = vcmp.gt.f32.partialorder %v457_v22, 0.0  ;;  %v795_v28 = vmul.f32 0.01, %v457_v22  ;;  %v460_v29 = vadd.f32 %v1580_v46, %v459_v26  ;;  %v1141_v30 = vpop.f32.mrb[23].mxu0  ;;  %vm759_vm6 = vcmp.gt.f32.partialorder %v609_v24, 0.0  ;;  %v1217_v31 = vpop.f32.mrb[23].mxu1 }
 0x121   :  { %v833_v32 = vmul.f32 0.01, %v609_v24  ;;  %v612_v33 = vadd.f32 %v1580_v46, %v611_v27 }
 0x122   :  { %v869_v34 = vsel %vm721_vm5, %v457_v22, %v795_v28  ;;  %vm722_vm7 = vcmp.gt.f32.partialorder %v460_v29, 0.0  ;;  %v796_v35 = vmul.f32 0.01, %v460_v29 }
 0x123   :  { %943 = vst [vmem:[%s1883_s3 + $0x50] sm:$0xff] %v869_v34  ;;  %v907_v36 = vsel %vm759_vm6, %v609_v24, %v833_v32  ;;  %vm760_vm8 = vcmp.gt.f32.partialorder %v612_v33, 0.0  ;;  %v834_v37 = vmul.f32 0.01, %v612_v33 }
 0x124   :  { %v870_v38 = vsel %vm722_vm7, %v460_v29, %v796_v35  ;;  %981 = vst [vmem:[%s1883_s3 + $0x180] sm:$0xff] %v907_v36 }
 0x125   :  { %944 = vst [vmem:[%s1883_s3 + $0x58] sm:$0xff] %v870_v38  ;;  %v908_v39 = vsel %vm760_vm8, %v612_v33, %v834_v37  ;;  %v464_v40 = vpop.f32.mrb[24].mxu0  ;;  %v616_v41 = vpop.f32.mrb[24].mxu1 }
 0x126   :  { %982 = vst [vmem:[%s1883_s3 + $0x188] sm:$0xff] %v908_v39  ;;  %v465_v42 = vadd.f32 %v1580_v46, %v464_v40  ;;  %v1144_v43 = vpop.f32.mrb[25].mxu0  ;;  %v617_v44 = vadd.f32 %v1580_v46, %v616_v41  ;;  %v1220_v45 = vpop.f32.mrb[25].mxu1 }
 0x127   :  { %v467_v47 = vpop.f32.mrb[26].mxu0  ;;  %v619_v48 = vpop.f32.mrb[26].mxu1 }
 0x128   :  { %vm723_vm9 = vcmp.gt.f32.partialorder %v465_v42, 0.0  ;;  %v797_v49 = vmul.f32 0.01, %v465_v42  ;;  %v468_v50 = vadd.f32 %v1580_v46, %v467_v47  ;;  %v1145_v51 = vpop.f32.mrb[27].mxu0  ;;  %vm761_vm10 = vcmp.gt.f32.partialorder %v617_v44, 0.0  ;;  %v1221_v52 = vpop.f32.mrb[27].mxu1 }
 0x129   :  { %v835_v53 = vmul.f32 0.01, %v617_v44  ;;  %v620_v54 = vadd.f32 %v1580_v46, %v619_v48 }
 0x12a   :  { %v871_v55 = vsel %vm723_vm9, %v465_v42, %v797_v49  ;;  %vm724_vm11 = vcmp.gt.f32.partialorder %v468_v50, 0.0  ;;  %v798_v56 = vmul.f32 0.01, %v468_v50 }
 0x12b   :  { %945 = vst [vmem:[%s1883_s3 + $0x60] sm:$0xff] %v871_v55  ;;  %v909_v57 = vsel %vm761_vm10, %v617_v44, %v835_v53  ;;  %vm762_vm12 = vcmp.gt.f32.partialorder %v620_v54, 0.0  ;;  %v836_v58 = vmul.f32 0.01, %v620_v54 }
 0x12c   :  { %v872_v59 = vsel %vm724_vm11, %v468_v50, %v798_v56  ;;  %983 = vst [vmem:[%s1883_s3 + $0x190] sm:$0xff] %v909_v57 }
 0x12d   :  { %946 = vst [vmem:[%s1883_s3 + $0x68] sm:$0xff] %v872_v59  ;;  %v910_v60 = vsel %vm762_vm12, %v620_v54, %v836_v58  ;;  %v472_v61 = vpop.f32.mrb[28].mxu0  ;;  %v624_v62 = vpop.f32.mrb[28].mxu1 }
 0x12e   :  { %984 = vst [vmem:[%s1883_s3 + $0x198] sm:$0xff] %v910_v60  ;;  %v473_v63 = vadd.f32 %v1580_v46, %v472_v61  ;;  %v1148_v0 = vpop.f32.mrb[29].mxu0  ;;  %v625_v1 = vadd.f32 %v1580_v46, %v624_v62  ;;  %v1224_v2 = vpop.f32.mrb[29].mxu1 }
 0x12f   :  { %v475_v3 = vpop.f32.mrb[30].mxu0  ;;  %v627_v4 = vpop.f32.mrb[30].mxu1 }
 0x130   :  { %vm725_vm13 = vcmp.gt.f32.partialorder %v473_v63, 0.0  ;;  %v799_v5 = vmul.f32 0.01, %v473_v63  ;;  %v476_v6 = vadd.f32 %v1580_v46, %v475_v3  ;;  %v1149_v7 = vpop.f32.mrb[31].mxu0  ;;  %vm763_vm14 = vcmp.gt.f32.partialorder %v625_v1, 0.0  ;;  %v1225_v8 = vpop.f32.mrb[31].mxu1 }
 0x131   :  { %v837_v9 = vmul.f32 0.01, %v625_v1  ;;  %v628_v10 = vadd.f32 %v1580_v46, %v627_v4 }
 0x132   :  { %v873_v11 = vsel %vm725_vm13, %v473_v63, %v799_v5  ;;  %vm726_vm15 = vcmp.gt.f32.partialorder %v476_v6, 0.0  ;;  %v800_v12 = vmul.f32 0.01, %v476_v6 }
 0x133   :  { %947 = vst [vmem:[%s1883_s3 + $0x70] sm:$0xff] %v873_v11  ;;  %v911_v13 = vsel %vm763_vm14, %v625_v1, %v837_v9  ;;  %vm764_vm0 = vcmp.gt.f32.partialorder %v628_v10, 0.0  ;;  %v838_v14 = vmul.f32 0.01, %v628_v10 }
 0x134   :  { %v874_v15 = vsel %vm726_vm15, %v476_v6, %v800_v12  ;;  %985 = vst [vmem:[%s1883_s3 + $0x1a0] sm:$0xff] %v911_v13 }
 0x135   :  { %948 = vst [vmem:[%s1883_s3 + $0x78] sm:$0xff] %v874_v15  ;;  %v912_v16 = vsel %vm764_vm0, %v628_v10, %v838_v14  ;;  %v480_v17 = vpop.f32.mrb[32].mxu0  ;;  %v632_v18 = vpop.f32.mrb[32].mxu1 }
 0x136   :  { %986 = vst [vmem:[%s1883_s3 + $0x1a8] sm:$0xff] %v912_v16  ;;  %v481_v19 = vadd.f32 %v1580_v46, %v480_v17  ;;  %v1152_v20 = vpop.f32.mrb[33].mxu0  ;;  %v633_v21 = vadd.f32 %v1580_v46, %v632_v18  ;;  %v1228_v22 = vpop.f32.mrb[33].mxu1 }
 0x137   :  { %v483_v23 = vpop.f32.mrb[34].mxu0  ;;  %v635_v24 = vpop.f32.mrb[34].mxu1 }
 0x138   :  { %vm727_vm1 = vcmp.gt.f32.partialorder %v481_v19, 0.0  ;;  %v801_v25 = vmul.f32 0.01, %v481_v19  ;;  %v484_v26 = vadd.f32 %v1580_v46, %v483_v23  ;;  %v1153_v27 = vpop.f32.mrb[35].mxu0  ;;  %vm765_vm2 = vcmp.gt.f32.partialorder %v633_v21, 0.0  ;;  %v1229_v28 = vpop.f32.mrb[35].mxu1 }
 0x139   :  { %v839_v29 = vmul.f32 0.01, %v633_v21  ;;  %v636_v30 = vadd.f32 %v1580_v46, %v635_v24 }
 0x13a   :  { %v875_v31 = vsel %vm727_vm1, %v481_v19, %v801_v25  ;;  %vm728_vm3 = vcmp.gt.f32.partialorder %v484_v26, 0.0  ;;  %v802_v32 = vmul.f32 0.01, %v484_v26 }
 0x13b   :  { %949 = vst [vmem:[%s1883_s3 + $0x80] sm:$0xff] %v875_v31  ;;  %v913_v33 = vsel %vm765_vm2, %v633_v21, %v839_v29  ;;  %vm766_vm4 = vcmp.gt.f32.partialorder %v636_v30, 0.0  ;;  %v840_v34 = vmul.f32 0.01, %v636_v30 }
 0x13c   :  { %v876_v35 = vsel %vm728_vm3, %v484_v26, %v802_v32  ;;  %987 = vst [vmem:[%s1883_s3 + $0x1b0] sm:$0xff] %v913_v33 }
 0x13d   :  { %950 = vst [vmem:[%s1883_s3 + $0x88] sm:$0xff] %v876_v35  ;;  %v914_v36 = vsel %vm766_vm4, %v636_v30, %v840_v34  ;;  %v488_v37 = vpop.f32.mrb[36].mxu0  ;;  %v640_v38 = vpop.f32.mrb[36].mxu1 }
 0x13e   :  { %988 = vst [vmem:[%s1883_s3 + $0x1b8] sm:$0xff] %v914_v36  ;;  %v489_v39 = vadd.f32 %v1580_v46, %v488_v37  ;;  %v1156_v40 = vpop.f32.mrb[37].mxu0  ;;  %v641_v41 = vadd.f32 %v1580_v46, %v640_v38  ;;  %v1232_v42 = vpop.f32.mrb[37].mxu1 }
 0x13f   :  { %v491_v43 = vpop.f32.mrb[38].mxu0  ;;  %v643_v44 = vpop.f32.mrb[38].mxu1 }
 0x140   :  { %vm729_vm5 = vcmp.gt.f32.partialorder %v489_v39, 0.0  ;;  %v803_v45 = vmul.f32 0.01, %v489_v39  ;;  %v492_v47 = vadd.f32 %v1580_v46, %v491_v43  ;;  %v1157_v48 = vpop.f32.mrb[39].mxu0  ;;  %vm767_vm6 = vcmp.gt.f32.partialorder %v641_v41, 0.0  ;;  %v1233_v49 = vpop.f32.mrb[39].mxu1 }
 0x141   :  { %v841_v50 = vmul.f32 0.01, %v641_v41  ;;  %v644_v51 = vadd.f32 %v1580_v46, %v643_v44 }
 0x142   :  { %v877_v52 = vsel %vm729_vm5, %v489_v39, %v803_v45  ;;  %vm730_vm7 = vcmp.gt.f32.partialorder %v492_v47, 0.0  ;;  %v804_v53 = vmul.f32 0.01, %v492_v47 }
 0x143   :  { %951 = vst [vmem:[%s1883_s3 + $0x90] sm:$0xff] %v877_v52  ;;  %v915_v54 = vsel %vm767_vm6, %v641_v41, %v841_v50  ;;  %vm768_vm8 = vcmp.gt.f32.partialorder %v644_v51, 0.0  ;;  %v842_v55 = vmul.f32 0.01, %v644_v51 }
 0x144   :  { %v878_v56 = vsel %vm730_vm7, %v492_v47, %v804_v53  ;;  %989 = vst [vmem:[%s1883_s3 + $0x1c0] sm:$0xff] %v915_v54 }
 0x145   :  { %952 = vst [vmem:[%s1883_s3 + $0x98] sm:$0xff] %v878_v56  ;;  %v916_v57 = vsel %vm768_vm8, %v644_v51, %v842_v55  ;;  %v496_v58 = vpop.f32.mrb[40].mxu0  ;;  %v648_v59 = vpop.f32.mrb[40].mxu1 }
 0x146   :  { %990 = vst [vmem:[%s1883_s3 + $0x1c8] sm:$0xff] %v916_v57  ;;  %v497_v60 = vadd.f32 %v1580_v46, %v496_v58  ;;  %v1160_v61 = vpop.f32.mrb[41].mxu0  ;;  %v649_v62 = vadd.f32 %v1580_v46, %v648_v59  ;;  %v1236_v63 = vpop.f32.mrb[41].mxu1 }
 0x147   :  { %v499_v0 = vpop.f32.mrb[42].mxu0  ;;  %v651_v1 = vpop.f32.mrb[42].mxu1 }
 0x148   :  { %vm731_vm9 = vcmp.gt.f32.partialorder %v497_v60, 0.0  ;;  %v805_v2 = vmul.f32 0.01, %v497_v60  ;;  %v500_v3 = vadd.f32 %v1580_v46, %v499_v0  ;;  %v1161_v4 = vpop.f32.mrb[43].mxu0  ;;  %vm769_vm10 = vcmp.gt.f32.partialorder %v649_v62, 0.0  ;;  %v1237_v5 = vpop.f32.mrb[43].mxu1 }
 0x149   :  { %v843_v6 = vmul.f32 0.01, %v649_v62  ;;  %v652_v7 = vadd.f32 %v1580_v46, %v651_v1 }
 0x14a   :  { %v879_v8 = vsel %vm731_vm9, %v497_v60, %v805_v2  ;;  %vm732_vm11 = vcmp.gt.f32.partialorder %v500_v3, 0.0  ;;  %v806_v9 = vmul.f32 0.01, %v500_v3 }
 0x14b   :  { %953 = vst [vmem:[%s1883_s3 + $0xa0] sm:$0xff] %v879_v8  ;;  %v917_v10 = vsel %vm769_vm10, %v649_v62, %v843_v6  ;;  %vm770_vm12 = vcmp.gt.f32.partialorder %v652_v7, 0.0  ;;  %v844_v11 = vmul.f32 0.01, %v652_v7 }
 0x14c   :  { %v880_v12 = vsel %vm732_vm11, %v500_v3, %v806_v9  ;;  %991 = vst [vmem:[%s1883_s3 + $0x1d0] sm:$0xff] %v917_v10 }
 0x14d   :  { %954 = vst [vmem:[%s1883_s3 + $0xa8] sm:$0xff] %v880_v12  ;;  %v918_v13 = vsel %vm770_vm12, %v652_v7, %v844_v11  ;;  %v504_v14 = vpop.f32.mrb[44].mxu0  ;;  %v656_v15 = vpop.f32.mrb[44].mxu1 }
 0x14e   :  { %992 = vst [vmem:[%s1883_s3 + $0x1d8] sm:$0xff] %v918_v13  ;;  %v505_v16 = vadd.f32 %v1580_v46, %v504_v14  ;;  %v1164_v17 = vpop.f32.mrb[45].mxu0  ;;  %v657_v18 = vadd.f32 %v1580_v46, %v656_v15  ;;  %v1240_v19 = vpop.f32.mrb[45].mxu1 }
 0x14f   :  { %v507_v20 = vpop.f32.mrb[46].mxu0  ;;  %v659_v21 = vpop.f32.mrb[46].mxu1 }
 0x150   :  { %vm733_vm13 = vcmp.gt.f32.partialorder %v505_v16, 0.0  ;;  %v807_v22 = vmul.f32 0.01, %v505_v16  ;;  %v508_v23 = vadd.f32 %v1580_v46, %v507_v20  ;;  %v1165_v24 = vpop.f32.mrb[47].mxu0  ;;  %vm771_vm14 = vcmp.gt.f32.partialorder %v657_v18, 0.0  ;;  %v1241_v25 = vpop.f32.mrb[47].mxu1 }
 0x151   :  { %v845_v26 = vmul.f32 0.01, %v657_v18  ;;  %v660_v27 = vadd.f32 %v1580_v46, %v659_v21 }
 0x152   :  { %v881_v28 = vsel %vm733_vm13, %v505_v16, %v807_v22  ;;  %vm734_vm15 = vcmp.gt.f32.partialorder %v508_v23, 0.0  ;;  %v808_v29 = vmul.f32 0.01, %v508_v23 }
 0x153   :  { %955 = vst [vmem:[%s1883_s3 + $0xb0] sm:$0xff] %v881_v28  ;;  %v919_v30 = vsel %vm771_vm14, %v657_v18, %v845_v26  ;;  %vm772_vm0 = vcmp.gt.f32.partialorder %v660_v27, 0.0  ;;  %v846_v31 = vmul.f32 0.01, %v660_v27 }
 0x154   :  { %v882_v32 = vsel %vm734_vm15, %v508_v23, %v808_v29  ;;  %993 = vst [vmem:[%s1883_s3 + $0x1e0] sm:$0xff] %v919_v30 }
 0x155   :  { %956 = vst [vmem:[%s1883_s3 + $0xb8] sm:$0xff] %v882_v32  ;;  %v920_v33 = vsel %vm772_vm0, %v660_v27, %v846_v31  ;;  %v512_v34 = vpop.f32.mrb[48].mxu0  ;;  %v664_v35 = vpop.f32.mrb[48].mxu1 }
 0x156   :  { %994 = vst [vmem:[%s1883_s3 + $0x1e8] sm:$0xff] %v920_v33  ;;  %v513_v36 = vadd.f32 %v1580_v46, %v512_v34  ;;  %v1168_v37 = vpop.f32.mrb[49].mxu0  ;;  %v665_v38 = vadd.f32 %v1580_v46, %v664_v35  ;;  %v1244_v39 = vpop.f32.mrb[49].mxu1 }
 0x157   :  { %v515_v40 = vpop.f32.mrb[50].mxu0  ;;  %v667_v41 = vpop.f32.mrb[50].mxu1 }
 0x158   :  { %vm735_vm1 = vcmp.gt.f32.partialorder %v513_v36, 0.0  ;;  %v809_v42 = vmul.f32 0.01, %v513_v36  ;;  %v516_v43 = vadd.f32 %v1580_v46, %v515_v40  ;;  %v1169_v44 = vpop.f32.mrb[51].mxu0  ;;  %vm773_vm2 = vcmp.gt.f32.partialorder %v665_v38, 0.0  ;;  %v1245_v45 = vpop.f32.mrb[51].mxu1 }
 0x159   :  { %v847_v47 = vmul.f32 0.01, %v665_v38  ;;  %v668_v48 = vadd.f32 %v1580_v46, %v667_v41 }
 0x15a   :  { %v883_v49 = vsel %vm735_vm1, %v513_v36, %v809_v42  ;;  %vm736_vm3 = vcmp.gt.f32.partialorder %v516_v43, 0.0  ;;  %v810_v50 = vmul.f32 0.01, %v516_v43 }
 0x15b   :  { %957 = vst [vmem:[%s1883_s3 + $0xc0] sm:$0xff] %v883_v49  ;;  %v921_v51 = vsel %vm773_vm2, %v665_v38, %v847_v47  ;;  %vm774_vm4 = vcmp.gt.f32.partialorder %v668_v48, 0.0  ;;  %v848_v52 = vmul.f32 0.01, %v668_v48 }
 0x15c   :  { %v884_v53 = vsel %vm736_vm3, %v516_v43, %v810_v50  ;;  %995 = vst [vmem:[%s1883_s3 + $0x1f0] sm:$0xff] %v921_v51 }
 0x15d   :  { %958 = vst [vmem:[%s1883_s3 + $0xc8] sm:$0xff] %v884_v53  ;;  %v922_v54 = vsel %vm774_vm4, %v668_v48, %v848_v52  ;;  %v520_v55 = vpop.f32.mrb[52].mxu0  ;;  %v672_v56 = vpop.f32.mrb[52].mxu1 }
 0x15e   :  { %996 = vst [vmem:[%s1883_s3 + $0x1f8] sm:$0xff] %v922_v54  ;;  %v521_v57 = vadd.f32 %v1580_v46, %v520_v55  ;;  %v1172_v58 = vpop.f32.mrb[53].mxu0  ;;  %v673_v59 = vadd.f32 %v1580_v46, %v672_v56  ;;  %v1248_v60 = vpop.f32.mrb[53].mxu1 }
 0x15f   :  { %v523_v61 = vpop.f32.mrb[54].mxu0  ;;  %v675_v62 = vpop.f32.mrb[54].mxu1 }
 0x160   :  { %vm737_vm5 = vcmp.gt.f32.partialorder %v521_v57, 0.0  ;;  %v811_v63 = vmul.f32 0.01, %v521_v57  ;;  %v524_v0 = vadd.f32 %v1580_v46, %v523_v61  ;;  %v1173_v1 = vpop.f32.mrb[55].mxu0  ;;  %vm775_vm6 = vcmp.gt.f32.partialorder %v673_v59, 0.0  ;;  %v1249_v2 = vpop.f32.mrb[55].mxu1 }
 0x161   :  { %v849_v3 = vmul.f32 0.01, %v673_v59  ;;  %v676_v4 = vadd.f32 %v1580_v46, %v675_v62 }
 0x162   :  { %v885_v5 = vsel %vm737_vm5, %v521_v57, %v811_v63  ;;  %vm738_vm7 = vcmp.gt.f32.partialorder %v524_v0, 0.0  ;;  %v812_v6 = vmul.f32 0.01, %v524_v0 }
 0x163   :  { %959 = vst [vmem:[%s1883_s3 + $0xd0] sm:$0xff] %v885_v5  ;;  %v923_v7 = vsel %vm775_vm6, %v673_v59, %v849_v3  ;;  %vm776_vm8 = vcmp.gt.f32.partialorder %v676_v4, 0.0  ;;  %v850_v8 = vmul.f32 0.01, %v676_v4 }
 0x164   :  { %v886_v9 = vsel %vm738_vm7, %v524_v0, %v812_v6  ;;  %997 = vst [vmem:[%s1883_s3 + $0x200] sm:$0xff] %v923_v7 }
 0x165   :  { %960 = vst [vmem:[%s1883_s3 + $0xd8] sm:$0xff] %v886_v9  ;;  %v924_v10 = vsel %vm776_vm8, %v676_v4, %v850_v8  ;;  %v528_v11 = vpop.f32.mrb[56].mxu0  ;;  %v680_v12 = vpop.f32.mrb[56].mxu1 }
 0x166   :  { %998 = vst [vmem:[%s1883_s3 + $0x208] sm:$0xff] %v924_v10  ;;  %v529_v13 = vadd.f32 %v1580_v46, %v528_v11  ;;  %v1176_v14 = vpop.f32.mrb[57].mxu0  ;;  %v681_v15 = vadd.f32 %v1580_v46, %v680_v12  ;;  %v1252_v16 = vpop.f32.mrb[57].mxu1 }
 0x167   :  { %v531_v17 = vpop.f32.mrb[58].mxu0  ;;  %v683_v18 = vpop.f32.mrb[58].mxu1 }
 0x168   :  { %vm739_vm9 = vcmp.gt.f32.partialorder %v529_v13, 0.0  ;;  %v813_v19 = vmul.f32 0.01, %v529_v13  ;;  %v532_v20 = vadd.f32 %v1580_v46, %v531_v17  ;;  %v1177_v21 = vpop.f32.mrb[59].mxu0  ;;  %vm777_vm10 = vcmp.gt.f32.partialorder %v681_v15, 0.0  ;;  %v1253_v22 = vpop.f32.mrb[59].mxu1 }
 0x169   :  { %v851_v23 = vmul.f32 0.01, %v681_v15  ;;  %v684_v24 = vadd.f32 %v1580_v46, %v683_v18 }
 0x16a   :  { %v887_v25 = vsel %vm739_vm9, %v529_v13, %v813_v19  ;;  %vm740_vm11 = vcmp.gt.f32.partialorder %v532_v20, 0.0  ;;  %v814_v26 = vmul.f32 0.01, %v532_v20 }
 0x16b   :  { %961 = vst [vmem:[%s1883_s3 + $0xe0] sm:$0xff] %v887_v25  ;;  %v925_v27 = vsel %vm777_vm10, %v681_v15, %v851_v23  ;;  %vm778_vm12 = vcmp.gt.f32.partialorder %v684_v24, 0.0  ;;  %v852_v28 = vmul.f32 0.01, %v684_v24 }
 0x16c   :  { %v888_v29 = vsel %vm740_vm11, %v532_v20, %v814_v26  ;;  %999 = vst [vmem:[%s1883_s3 + $0x210] sm:$0xff] %v925_v27 }
 0x16d   :  { %962 = vst [vmem:[%s1883_s3 + $0xe8] sm:$0xff] %v888_v29  ;;  %v926_v30 = vsel %vm778_vm12, %v684_v24, %v852_v28  ;;  %v536_v31 = vpop.f32.mrb[60].mxu0  ;;  %v688_v32 = vpop.f32.mrb[60].mxu1 }
 0x16e   :  { %1000 = vst [vmem:[%s1883_s3 + $0x218] sm:$0xff] %v926_v30  ;;  %v537_v33 = vadd.f32 %v1580_v46, %v536_v31  ;;  %v1180_v34 = vpop.f32.mrb[61].mxu0  ;;  %v689_v35 = vadd.f32 %v1580_v46, %v688_v32  ;;  %v1256_v36 = vpop.f32.mrb[61].mxu1 }
 0x16f   :  { %v539_v37 = vpop.f32.mrb[62].mxu0  ;;  %v691_v38 = vpop.f32.mrb[62].mxu1 }
 0x170   :  { %vm741_vm13 = vcmp.gt.f32.partialorder %v537_v33, 0.0  ;;  %v815_v39 = vmul.f32 0.01, %v537_v33  ;;  %v540_v40 = vadd.f32 %v1580_v46, %v539_v37  ;;  %v1181_v41 = vpop.f32.mrb[63].mxu0  ;;  %vm779_vm14 = vcmp.gt.f32.partialorder %v689_v35, 0.0  ;;  %v1257_v42 = vpop.f32.mrb[63].mxu1 }
 0x171   :  { %v853_v43 = vmul.f32 0.01, %v689_v35  ;;  %v692_v44 = vadd.f32 %v1580_v46, %v691_v38 }
 0x172   :  { %v889_v45 = vsel %vm741_vm13, %v537_v33, %v815_v39  ;;  %vm742_vm15 = vcmp.gt.f32.partialorder %v540_v40, 0.0  ;;  %v816_v47 = vmul.f32 0.01, %v540_v40  ;;  %v1329_v33 = vld [vmem:[%s1882_s2] ss:$0 sm:$0xff] }
 0x173   :  { %963 = vst [vmem:[%s1883_s3 + $0xf0] sm:$0xff] %v889_v45  ;;  %v927_v48 = vsel %vm779_vm14, %v689_v35, %v853_v43  ;;  %vm780_vm0 = vcmp.gt.f32.partialorder %v692_v44, 0.0  ;;  %v854_v49 = vmul.f32 0.01, %v692_v44 }
 0x174   :  { %v890_v50 = vsel %vm742_vm15, %v540_v40, %v816_v47  ;;  %1001 = vst [vmem:[%s1883_s3 + $0x220] sm:$0xff] %v927_v48 }
 0x175   :  { %964 = vst [vmem:[%s1883_s3 + $0xf8] sm:$0xff] %v890_v50  ;;  %v928_v51 = vsel %vm780_vm0, %v692_v44, %v854_v49  ;;  %v544_v52 = vpop.f32.mrb[64].mxu0  ;;  %v696_v53 = vpop.f32.mrb[64].mxu1 }
 0x176   :  { %1002 = vst [vmem:[%s1883_s3 + $0x228] sm:$0xff] %v928_v51  ;;  %v545_v54 = vadd.f32 %v1580_v46, %v544_v52  ;;  %v1184_v55 = vpop.f32.mrb[65].mxu0  ;;  %v697_v56 = vadd.f32 %v1580_v46, %v696_v53  ;;  %v1260_v57 = vpop.f32.mrb[65].mxu1 }
 0x177   :  { %v547_v58 = vpop.f32.mrb[66].mxu0  ;;  %v699_v59 = vpop.f32.mrb[66].mxu1 }
 0x178   :  { %vm743_vm1 = vcmp.gt.f32.partialorder %v545_v54, 0.0  ;;  %v817_v60 = vmul.f32 0.01, %v545_v54  ;;  %v548_v61 = vadd.f32 %v1580_v46, %v547_v58  ;;  %v1185_v62 = vpop.f32.mrb[67].mxu0  ;;  %vm781_vm2 = vcmp.gt.f32.partialorder %v697_v56, 0.0  ;;  %v1261_v63 = vpop.f32.mrb[67].mxu1 }
 0x179   :  { %v855_v0 = vmul.f32 0.01, %v697_v56  ;;  %v700_v1 = vadd.f32 %v1580_v46, %v699_v59 }
 0x17a   :  { %v891_v2 = vsel %vm743_vm1, %v545_v54, %v817_v60  ;;  %vm744_vm3 = vcmp.gt.f32.partialorder %v548_v61, 0.0  ;;  %v818_v3 = vmul.f32 0.01, %v548_v61 }
 0x17b   :  { %965 = vst [vmem:[%s1883_s3 + $0x100] sm:$0xff] %v891_v2  ;;  %v929_v4 = vsel %vm781_vm2, %v697_v56, %v855_v0  ;;  %vm782_vm4 = vcmp.gt.f32.partialorder %v700_v1, 0.0  ;;  %v856_v5 = vmul.f32 0.01, %v700_v1 }
 0x17c   :  { %v892_v6 = vsel %vm744_vm3, %v548_v61, %v818_v3  ;;  %1003 = vst [vmem:[%s1883_s3 + $0x230] sm:$0xff] %v929_v4 }
 0x17d   :  { %966 = vst [vmem:[%s1883_s3 + $0x108] sm:$0xff] %v892_v6  ;;  %v930_v7 = vsel %vm782_vm4, %v700_v1, %v856_v5  ;;  %v552_v8 = vpop.f32.mrb[68].mxu0  ;;  %v704_v9 = vpop.f32.mrb[68].mxu1 }
 0x17e   :  { %1004 = vst [vmem:[%s1883_s3 + $0x238] sm:$0xff] %v930_v7  ;;  %v553_v10 = vadd.f32 %v1580_v46, %v552_v8  ;;  %v1188_v11 = vpop.f32.mrb[69].mxu0  ;;  %v705_v12 = vadd.f32 %v1580_v46, %v704_v9  ;;  %v1264_v13 = vpop.f32.mrb[69].mxu1 }
 0x17f   :  { %v555_v14 = vpop.f32.mrb[70].mxu0  ;;  %v707_v15 = vpop.f32.mrb[70].mxu1 }
 0x180   :  { %vm745_vm5 = vcmp.gt.f32.partialorder %v553_v10, 0.0  ;;  %v819_v16 = vmul.f32 0.01, %v553_v10  ;;  %v556_v17 = vadd.f32 %v1580_v46, %v555_v14  ;;  %v1189_v18 = vpop.f32.mrb[71].mxu0  ;;  %vm783_vm6 = vcmp.gt.f32.partialorder %v705_v12, 0.0  ;;  %v1265_v19 = vpop.f32.mrb[71].mxu1 }
 0x181   :  { %v857_v20 = vmul.f32 0.01, %v705_v12  ;;  %v708_v21 = vadd.f32 %v1580_v46, %v707_v15 }
 0x182   :  { %v893_v22 = vsel %vm745_vm5, %v553_v10, %v819_v16  ;;  %vm746_vm7 = vcmp.gt.f32.partialorder %v556_v17, 0.0  ;;  %v820_v23 = vmul.f32 0.01, %v556_v17 }
 0x183   :  { %967 = vst [vmem:[%s1883_s3 + $0x110] sm:$0xff] %v893_v22  ;;  %v931_v24 = vsel %vm783_vm6, %v705_v12, %v857_v20  ;;  %vm784_vm8 = vcmp.gt.f32.partialorder %v708_v21, 0.0  ;;  %v858_v25 = vmul.f32 0.01, %v708_v21 }
 0x184   :  { %v894_v26 = vsel %vm746_vm7, %v556_v17, %v820_v23  ;;  %1005 = vst [vmem:[%s1883_s3 + $0x240] sm:$0xff] %v931_v24 }
 0x185   :  { %968 = vst [vmem:[%s1883_s3 + $0x118] sm:$0xff] %v894_v26  ;;  %v932_v27 = vsel %vm784_vm8, %v708_v21, %v858_v25  ;;  %v560_v28 = vpop.f32.mrb[72].mxu0 }
 0x186   :  { %1006 = vst [vmem:[%s1883_s3 + $0x248] sm:$0xff] %v932_v27  ;;  %v561_v29 = vadd.f32 %v1580_v46, %v560_v28  ;;  %v1192_v30 = vpop.f32.mrb[73].mxu0 }
 0x187   :  { %v563_v31 = vpop.f32.mrb[74].mxu0 }
 0x188   :  { %vm747_vm9 = vcmp.gt.f32.partialorder %v561_v29, 0.0  ;;  %v821_v32 = vmul.f32 0.01, %v561_v29  ;;  %v564_v34 = vadd.f32 %v1329_v33, %v563_v31  ;;  %v1193_v35 = vpop.f32.mrb[75].mxu0 }
 0x18a   :  { %v895_v36 = vsel %vm747_vm9, %v561_v29, %v821_v32  ;;  %vm748_vm10 = vcmp.gt.f32.partialorder %v564_v34, 0.0  ;;  %v822_v37 = vmul.f32 0.01, %v564_v34 }
 0x18b   :  { %969 = vst [vmem:[%s1883_s3 + $0x120] sm:$0xff] %v895_v36 }
 0x18c   :  { %v896_v38 = vsel %vm748_vm10, %v564_v34, %v822_v37 }
 0x18d   :  { %970 = vst [vmem:[%s1883_s3 + $0x128] sm:$0xff] %v896_v38 }

// kernel: forward.7
= control target key start
LH: loop header
LB: loop body
LE: loop exit
PB: predicated region body
PF: predicated region fallthrough
CT: control target
= control target key end

     0   :  { %s908_s1 = inlined_call_operand.vmem [shape: bf16[256,128], index: 1, kind: input, shape index: {}]   ;;  %s909_s0 = inlined_call_operand.vmem [shape: bf16[176,256], index: 0, kind: input, shape index: {}]   ;;  %s910_s2 = inlined_call_operand.vmem [shape: f32[1,128], index: 2, kind: input, shape index: {}]   ;;  %s911_s3 = inlined_call_operand.vmem [shape: f32[176,128], index: 3, kind: output, shape index: {}]  }
   0x1   :  { %v632_v0 = vld [vmem:[%s908_s1 + $0x40] sm:$0xff]   ;;  %v634_v2 = vld [vmem:[%s908_s1 + $0x48] sm:$0xff]   ;;  %v636_v4 = vld [vmem:[%s908_s1 + $0x50] sm:$0xff]  }
   0x2   :  { %v633_v1 = vld [vmem:[%s908_s1] sm:$0xff]   ;;  %534 = vmatprep.subr.bf16.mxu0 %v632_v0  ;;  %616 = vmatprep.subr.bf16.mxu1 %v632_v0  ;;  %v635_v3 = vld [vmem:[%s908_s1 + $0x8] sm:$0xff]   ;;  %v637_v5 = vld [vmem:[%s908_s1 + $0x10] sm:$0xff]  }
   0x3   :  { %535 = vmatpush3.bf16.msra.mxu0 %v633_v1  ;;  %624 = vmatpush3.bf16.msra.mxu1 %v633_v1  ;;  %v638_v6 = vld [vmem:[%s908_s1 + $0x58] sm:$0xff]   ;;  %v640_v8 = vld [vmem:[%s908_s1 + $0x60] sm:$0xff]   ;;  %v642_v10 = vld [vmem:[%s908_s1 + $0x68] sm:$0xff]  }
   0x4   :  { %536 = vmatprep.subr.bf16.mxu0 %v634_v2  ;;  %617 = vmatprep.subr.bf16.mxu1 %v634_v2  ;;  %v639_v7 = vld [vmem:[%s908_s1 + $0x18] sm:$0xff]   ;;  %v641_v9 = vld [vmem:[%s908_s1 + $0x20] sm:$0xff]   ;;  %v643_v13 = vld [vmem:[%s908_s1 + $0x28] sm:$0xff]  }
   0x5   :  { %v650_v11 = vld [vmem:[%s909_s0 + $0x4] ss:$8 sps:$4 sm:$0xff]   ;;  %v644_v14 = vld [vmem:[%s908_s1 + $0x70] sm:$0xff]   ;;  %v646_v16 = vld [vmem:[%s908_s1 + $0x78] sm:$0xff]  }
   0x6   :  { %v653_v12 = vld [vmem:[%s909_s0 + $0x64] ss:$8 sps:$4 sm:$0xff]   ;;  %314 = vmatprep.mubr.bf16.mxu0 %v650_v11  ;;  %v645_v15 = vld [vmem:[%s908_s1 + $0x30] sm:$0xff]   ;;  %v647_v17 = vld [vmem:[%s908_s1 + $0x38] sm:$0xff]  }
   0x7   :  { %537 = vmatpush3.bf16.msra.mxu0 %v635_v3  ;;  %625 = vmatpush3.bf16.msra.mxu1 %v635_v3  ;;  %v648_v18 = vld [vmem:[%s909_s0] ss:$8 sps:$4 sm:$0xff]   ;;  %v654_v20 = vld [vmem:[%s909_s0 + $0x14] ss:$8 sps:$4 sm:$0xff]   ;;  %v656_v22 = vld [vmem:[%s909_s0 + $0x10] ss:$8 sps:$4 sm:$0xff]  }
   0x8   :  { %538 = vmatprep.subr.bf16.mxu0 %v636_v4  ;;  %618 = vmatprep.subr.bf16.mxu1 %v636_v4  ;;  %v651_v19 = vld [vmem:[%s909_s0 + $0x60] ss:$8 sps:$4 sm:$0xff]   ;;  %v657_v21 = vld [vmem:[%s909_s0 + $0x74] ss:$8 sps:$4 sm:$0xff]   ;;  %v659_v23 = vld [vmem:[%s909_s0 + $0x70] ss:$8 sps:$4 sm:$0xff]  }
   0x9   :  { %362 = vmatprep.mubr.bf16.mxu1 %v653_v12  ;;  %v660_v24 = vld [vmem:[%s909_s0 + $0x24] ss:$8 sps:$4 sm:$0xff]   ;;  %v662_v26 = vld [vmem:[%s909_s0 + $0x20] ss:$8 sps:$4 sm:$0xff]   ;;  %v666_v28 = vld [vmem:[%s909_s0 + $0x34] ss:$8 sps:$4 sm:$0xff]  }
   0xa   :  { %v663_v25 = vld [vmem:[%s909_s0 + $0x84] ss:$8 sps:$4 sm:$0xff]   ;;  %v665_v27 = vld [vmem:[%s909_s0 + $0x80] ss:$8 sps:$4 sm:$0xff]   ;;  %v669_v29 = vld [vmem:[%s909_s0 + $0x94] ss:$8 sps:$4 sm:$0xff]  }
   0xb   :  { %539 = vmatpush3.bf16.msra.mxu0 %v637_v5  ;;  %626 = vmatpush3.bf16.msra.mxu1 %v637_v5  ;;  %v668_v30 = vld [vmem:[%s909_s0 + $0x30] ss:$8 sps:$4 sm:$0xff]   ;;  %v672_v32 = vld [vmem:[%s909_s0 + $0x44] ss:$8 sps:$4 sm:$0xff]   ;;  %v674_v34 = vld [vmem:[%s909_s0 + $0x40] ss:$8 sps:$4 sm:$0xff]  }
   0xc   :  { %540 = vmatprep.subr.bf16.mxu0 %v638_v6  ;;  %619 = vmatprep.subr.bf16.mxu1 %v638_v6  ;;  %v671_v31 = vld [vmem:[%s909_s0 + $0x90] ss:$8 sps:$4 sm:$0xff]   ;;  %v675_v33 = vld [vmem:[%s909_s0 + $0xa4] ss:$8 sps:$4 sm:$0xff]   ;;  %v677_v35 = vld [vmem:[%s909_s0 + $0xa0] ss:$8 sps:$4 sm:$0xff]  }
   0xd   :  { %v678_v36 = vld [vmem:[%s909_s0 + $0x54] ss:$8 sps:$4 sm:$0xff]   ;;  %v680_v37 = vld [vmem:[%s909_s0 + $0x50] ss:$8 sps:$4 sm:$0xff]   ;;  %v818_v40 = vld [vmem:[%s910_s2] ss:$0 sm:$0xff] }
   0xf   :  { %541 = vmatpush3.bf16.msra.mxu0 %v639_v7  ;;  %627 = vmatpush3.bf16.msra.mxu1 %v639_v7 }
  0x10   :  { %542 = vmatprep.subr.bf16.mxu0 %v640_v8  ;;  %620 = vmatprep.subr.bf16.mxu1 %v640_v8 }
  0x13   :  { %543 = vmatpush3.bf16.msra.mxu0 %v641_v9  ;;  %628 = vmatpush3.bf16.msra.mxu1 %v641_v9 }
  0x14   :  { %544 = vmatprep.subr.bf16.mxu0 %v642_v10  ;;  %621 = vmatprep.subr.bf16.mxu1 %v642_v10 }
  0x17   :  { %545 = vmatpush3.bf16.msra.mxu0 %v643_v13  ;;  %629 = vmatpush3.bf16.msra.mxu1 %v643_v13 }
  0x18   :  { %546 = vmatprep.subr.bf16.mxu0 %v644_v14  ;;  %622 = vmatprep.subr.bf16.mxu1 %v644_v14 }
  0x1b   :  { %547 = vmatpush3.bf16.msra.mxu0 %v645_v15  ;;  %630 = vmatpush3.bf16.msra.mxu1 %v645_v15 }
  0x1c   :  { %548 = vmatprep.subr.bf16.mxu0 %v646_v16  ;;  %623 = vmatprep.subr.bf16.mxu1 %v646_v16 }
  0x1f   :  { %549 = vmatpush3.bf16.msra.mxu0 %v647_v17  ;;  %631 = vmatpush3.bf16.msra.mxu1 %v647_v17 }
  0x22   :  { %315 = vmatmul.mubr.bf16.vlgmr.msra.gmra.mrb[0].mxu0 %v648_v18  ;;  %363 = vmatmul.mubr.bf16.vlgmr.msra.gmra.mrb[0].mxu1 %v651_v19 }
  0x23   :  { %322 = vmatprep.mubr.bf16.mxu0 %v654_v20  ;;  %370 = vmatprep.mubr.bf16.mxu1 %v657_v21 }
  0x2a   :  { %323 = vmatmul.mubr.bf16.gmra.mrb[4].mxu0 %v656_v22  ;;  %371 = vmatmul.mubr.bf16.gmra.mrb[4].mxu1 %v659_v23 }
  0x2b   :  { %330 = vmatprep.mubr.bf16.mxu0 %v660_v24  ;;  %378 = vmatprep.mubr.bf16.mxu1 %v663_v25 }
  0x32   :  { %331 = vmatmul.mubr.bf16.gmra.mrb[8].mxu0 %v662_v26  ;;  %379 = vmatmul.mubr.bf16.gmra.mrb[8].mxu1 %v665_v27 }
  0x33   :  { %338 = vmatprep.mubr.bf16.mxu0 %v666_v28  ;;  %386 = vmatprep.mubr.bf16.mxu1 %v669_v29 }
  0x3a   :  { %339 = vmatmul.mubr.bf16.gmra.mrb[12].mxu0 %v668_v30  ;;  %387 = vmatmul.mubr.bf16.gmra.mrb[12].mxu1 %v671_v31 }
  0x3b   :  { %346 = vmatprep.mubr.bf16.mxu0 %v672_v32  ;;  %394 = vmatprep.mubr.bf16.mxu1 %v675_v33 }
  0x42   :  { %347 = vmatmul.mubr.bf16.gmra.mrb[16].mxu0 %v674_v34  ;;  %395 = vmatmul.mubr.bf16.gmra.mrb[16].mxu1 %v677_v35 }
  0x43   :  { %354 = vmatprep.mubr.bf16.mxu0 %v678_v36 }
  0x4a   :  { %355 = vmatmul.mubr.bf16.gmra.mrb[20].mxu0 %v680_v37 }
  0xf5   :  { %v550_v38 = vpop.f32.mrb[0].mxu0  ;;  %v586_v39 = vpop.f32.mrb[0].mxu1 }
  0xf6   :  { %v551_v41 = vpop.f32.mrb[1].mxu0  ;;  %v587_v42 = vpop.f32.mrb[1].mxu1 }
  0xf7   :  { %v552_v43 = vadd.f32 %v551_v41, %v550_v38  ;;  %v553_v44 = vpop.f32.mrb[2].mxu0  ;;  %v588_v45 = vadd.f32 %v587_v42, %v586_v39  ;;  %v589_v46 = vpop.f32.mrb[2].mxu1 }
  0xf8   :  { %v554_v47 = vpop.f32.mrb[3].mxu0  ;;  %v590_v48 = vpop.f32.mrb[3].mxu1 }
  0xf9   :  { %v317_v49 = vadd.f32 %v552_v43, %v818_v40  ;;  %v555_v50 = vadd.f32 %v554_v47, %v553_v44  ;;  %v365_v51 = vadd.f32 %v588_v45, %v818_v40  ;;  %v591_v52 = vadd.f32 %v590_v48, %v589_v46 }
  0xfb   :  { %vm403_vm0 = vcmp.gt.f32.partialorder %v317_v49, 0.0  ;;  %v425_v53 = vmul.f32 0.01, %v317_v49  ;;  %v320_v54 = vadd.f32 %v555_v50, %v818_v40  ;;  %vm415_vm1 = vcmp.gt.f32.partialorder %v365_v51, 0.0 }
  0xfc   :  { %v437_v55 = vmul.f32 0.01, %v365_v51  ;;  %v368_v56 = vadd.f32 %v591_v52, %v818_v40 }
  0xfd   :  { %v447_v57 = vsel %vm403_vm0, %v317_v49, %v425_v53  ;;  %vm404_vm2 = vcmp.gt.f32.partialorder %v320_v54, 0.0  ;;  %v426_v58 = vmul.f32 0.01, %v320_v54  ;;  %v556_v59 = vpop.f32.mrb[4].mxu0  ;;  %v592_v60 = vpop.f32.mrb[4].mxu1 }
  0xfe   :  { %469 = vst [vmem:[%s911_s3] sm:$0xff] %v447_v57  ;;  %v459_v61 = vsel %vm415_vm1, %v365_v51, %v437_v55  ;;  %vm416_vm3 = vcmp.gt.f32.partialorder %v368_v56, 0.0  ;;  %v438_v62 = vmul.f32 0.01, %v368_v56  ;;  %v557_v63 = vpop.f32.mrb[5].mxu0  ;;  %v593_v0 = vpop.f32.mrb[5].mxu1 }
  0xff   :  { %v448_v1 = vsel %vm404_vm2, %v320_v54, %v426_v58  ;;  %481 = vst [vmem:[%s911_s3 + $0x60] sm:$0xff] %v459_v61  ;;  %v558_v2 = vadd.f32 %v557_v63, %v556_v59  ;;  %v559_v3 = vpop.f32.mrb[6].mxu0  ;;  %v594_v4 = vadd.f32 %v593_v0, %v592_v60  ;;  %v595_v5 = vpop.f32.mrb[6].mxu1 }
 0x100   :  { %470 = vst [vmem:[%s911_s3 + $0x8] sm:$0xff] %v448_v1  ;;  %v460_v6 = vsel %vm416_vm3, %v368_v56, %v438_v62  ;;  %v560_v7 = vpop.f32.mrb[7].mxu0  ;;  %v596_v8 = vpop.f32.mrb[7].mxu1 }
 0x101   :  { %482 = vst [vmem:[%s911_s3 + $0x68] sm:$0xff] %v460_v6  ;;  %v325_v9 = vadd.f32 %v558_v2, %v818_v40  ;;  %v561_v10 = vadd.f32 %v560_v7, %v559_v3  ;;  %v373_v11 = vadd.f32 %v594_v4, %v818_v40  ;;  %v597_v12 = vadd.f32 %v596_v8, %v595_v5 }
 0x103   :  { %vm405_vm4 = vcmp.gt.f32.partialorder %v325_v9, 0.0  ;;  %v427_v13 = vmul.f32 0.01, %v325_v9  ;;  %v328_v14 = vadd.f32 %v561_v10, %v818_v40  ;;  %vm417_vm5 = vcmp.gt.f32.partialorder %v373_v11, 0.0 }
 0x104   :  { %v439_v15 = vmul.f32 0.01, %v373_v11  ;;  %v376_v16 = vadd.f32 %v597_v12, %v818_v40 }
 0x105   :  { %v449_v17 = vsel %vm405_vm4, %v325_v9, %v427_v13  ;;  %vm406_vm6 = vcmp.gt.f32.partialorder %v328_v14, 0.0  ;;  %v428_v18 = vmul.f32 0.01, %v328_v14  ;;  %v562_v19 = vpop.f32.mrb[8].mxu0  ;;  %v598_v20 = vpop.f32.mrb[8].mxu1 }
 0x106   :  { %471 = vst [vmem:[%s911_s3 + $0x10] sm:$0xff] %v449_v17  ;;  %v461_v21 = vsel %vm417_vm5, %v373_v11, %v439_v15  ;;  %vm418_vm7 = vcmp.gt.f32.partialorder %v376_v16, 0.0  ;;  %v440_v22 = vmul.f32 0.01, %v376_v16  ;;  %v563_v23 = vpop.f32.mrb[9].mxu0  ;;  %v599_v24 = vpop.f32.mrb[9].mxu1 }
 0x107   :  { %v450_v25 = vsel %vm406_vm6, %v328_v14, %v428_v18  ;;  %483 = vst [vmem:[%s911_s3 + $0x70] sm:$0xff] %v461_v21  ;;  %v564_v26 = vadd.f32 %v563_v23, %v562_v19  ;;  %v565_v27 = vpop.f32.mrb[10].mxu0  ;;  %v600_v28 = vadd.f32 %v599_v24, %v598_v20  ;;  %v601_v29 = vpop.f32.mrb[10].mxu1 }
 0x108   :  { %472 = vst [vmem:[%s911_s3 + $0x18] sm:$0xff] %v450_v25  ;;  %v462_v30 = vsel %vm418_vm7, %v376_v16, %v440_v22  ;;  %v566_v31 = vpop.f32.mrb[11].mxu0  ;;  %v602_v32 = vpop.f32.mrb[11].mxu1 }
 0x109   :  { %484 = vst [vmem:[%s911_s3 + $0x78] sm:$0xff] %v462_v30  ;;  %v333_v33 = vadd.f32 %v564_v26, %v818_v40  ;;  %v567_v34 = vadd.f32 %v566_v31, %v565_v27  ;;  %v381_v35 = vadd.f32 %v600_v28, %v818_v40  ;;  %v603_v36 = vadd.f32 %v602_v32, %v601_v29 }
 0x10b   :  { %vm407_vm8 = vcmp.gt.f32.partialorder %v333_v33, 0.0  ;;  %v429_v37 = vmul.f32 0.01, %v333_v33  ;;  %v336_v38 = vadd.f32 %v567_v34, %v818_v40  ;;  %vm419_vm9 = vcmp.gt.f32.partialorder %v381_v35, 0.0 }
 0x10c   :  { %v441_v39 = vmul.f32 0.01, %v381_v35  ;;  %v384_v41 = vadd.f32 %v603_v36, %v818_v40 }
 0x10d   :  { %v451_v42 = vsel %vm407_vm8, %v333_v33, %v429_v37  ;;  %vm408_vm10 = vcmp.gt.f32.partialorder %v336_v38, 0.0  ;;  %v430_v43 = vmul.f32 0.01, %v336_v38  ;;  %v568_v44 = vpop.f32.mrb[12].mxu0  ;;  %v604_v45 = vpop.f32.mrb[12].mxu1 }
 0x10e   :  { %473 = vst [vmem:[%s911_s3 + $0x20] sm:$0xff] %v451_v42  ;;  %v463_v46 = vsel %vm419_vm9, %v381_v35, %v441_v39  ;;  %vm420_vm11 = vcmp.gt.f32.partialorder %v384_v41, 0.0  ;;  %v442_v47 = vmul.f32 0.01, %v384_v41  ;;  %v569_v48 = vpop.f32.mrb[13].mxu0  ;;  %v605_v49 = vpop.f32.mrb[13].mxu1 }
 0x10f   :  { %v452_v50 = vsel %vm408_vm10, %v336_v38, %v430_v43  ;;  %485 = vst [vmem:[%s911_s3 + $0x80] sm:$0xff] %v463_v46  ;;  %v570_v51 = vadd.f32 %v569_v48, %v568_v44  ;;  %v571_v52 = vpop.f32.mrb[14].mxu0  ;;  %v606_v53 = vadd.f32 %v605_v49, %v604_v45  ;;  %v607_v54 = vpop.f32.mrb[14].mxu1 }
 0x110   :  { %474 = vst [vmem:[%s911_s3 + $0x28] sm:$0xff] %v452_v50  ;;  %v464_v55 = vsel %vm420_vm11, %v384_v41, %v442_v47  ;;  %v572_v56 = vpop.f32.mrb[15].mxu0  ;;  %v608_v57 = vpop.f32.mrb[15].mxu1 }
 0x111   :  { %486 = vst [vmem:[%s911_s3 + $0x88] sm:$0xff] %v464_v55  ;;  %v341_v58 = vadd.f32 %v570_v51, %v818_v40  ;;  %v573_v59 = vadd.f32 %v572_v56, %v571_v52  ;;  %v389_v60 = vadd.f32 %v606_v53, %v818_v40  ;;  %v609_v61 = vadd.f32 %v608_v57, %v607_v54 }
 0x113   :  { %vm409_vm12 = vcmp.gt.f32.partialorder %v341_v58, 0.0  ;;  %v431_v62 = vmul.f32 0.01, %v341_v58  ;;  %v344_v63 = vadd.f32 %v573_v59, %v818_v40  ;;  %vm421_vm13 = vcmp.gt.f32.partialorder %v389_v60, 0.0 }
 0x114   :  { %v443_v0 = vmul.f32 0.01, %v389_v60  ;;  %v392_v1 = vadd.f32 %v609_v61, %v818_v40 }
 0x115   :  { %v453_v2 = vsel %vm409_vm12, %v341_v58, %v431_v62  ;;  %vm410_vm14 = vcmp.gt.f32.partialorder %v344_v63, 0.0  ;;  %v432_v3 = vmul.f32 0.01, %v344_v63  ;;  %v574_v4 = vpop.f32.mrb[16].mxu0  ;;  %v610_v5 = vpop.f32.mrb[16].mxu1 }
 0x116   :  { %475 = vst [vmem:[%s911_s3 + $0x30] sm:$0xff] %v453_v2  ;;  %v465_v6 = vsel %vm421_vm13, %v389_v60, %v443_v0  ;;  %vm422_vm15 = vcmp.gt.f32.partialorder %v392_v1, 0.0  ;;  %v444_v7 = vmul.f32 0.01, %v392_v1  ;;  %v575_v8 = vpop.f32.mrb[17].mxu0  ;;  %v611_v9 = vpop.f32.mrb[17].mxu1 }
 0x117   :  { %v454_v10 = vsel %vm410_vm14, %v344_v63, %v432_v3  ;;  %487 = vst [vmem:[%s911_s3 + $0x90] sm:$0xff] %v465_v6  ;;  %v576_v11 = vadd.f32 %v575_v8, %v574_v4  ;;  %v577_v12 = vpop.f32.mrb[18].mxu0  ;;  %v612_v13 = vadd.f32 %v611_v9, %v610_v5  ;;  %v613_v14 = vpop.f32.mrb[18].mxu1 }
 0x118   :  { %476 = vst [vmem:[%s911_s3 + $0x38] sm:$0xff] %v454_v10  ;;  %v466_v15 = vsel %vm422_vm15, %v392_v1, %v444_v7  ;;  %v578_v16 = vpop.f32.mrb[19].mxu0  ;;  %v614_v17 = vpop.f32.mrb[19].mxu1 }
 0x119   :  { %488 = vst [vmem:[%s911_s3 + $0x98] sm:$0xff] %v466_v15  ;;  %v349_v18 = vadd.f32 %v576_v11, %v818_v40  ;;  %v579_v19 = vadd.f32 %v578_v16, %v577_v12  ;;  %v397_v20 = vadd.f32 %v612_v13, %v818_v40  ;;  %v615_v21 = vadd.f32 %v614_v17, %v613_v14 }
 0x11b   :  { %vm411_vm0 = vcmp.gt.f32.partialorder %v349_v18, 0.0  ;;  %v433_v22 = vmul.f32 0.01, %v349_v18  ;;  %v352_v23 = vadd.f32 %v579_v19, %v818_v40  ;;  %vm423_vm1 = vcmp.gt.f32.partialorder %v397_v20, 0.0 }
 0x11c   :  { %v445_v24 = vmul.f32 0.01, %v397_v20  ;;  %v400_v25 = vadd.f32 %v615_v21, %v818_v40 }
 0x11d   :  { %v455_v26 = vsel %vm411_vm0, %v349_v18, %v433_v22  ;;  %vm412_vm2 = vcmp.gt.f32.partialorder %v352_v23, 0.0  ;;  %v434_v27 = vmul.f32 0.01, %v352_v23  ;;  %v580_v28 = vpop.f32.mrb[20].mxu0 }
 0x11e   :  { %477 = vst [vmem:[%s911_s3 + $0x40] sm:$0xff] %v455_v26  ;;  %v467_v29 = vsel %vm423_vm1, %v397_v20, %v445_v24  ;;  %vm424_vm3 = vcmp.gt.f32.partialorder %v400_v25, 0.0  ;;  %v446_v30 = vmul.f32 0.01, %v400_v25  ;;  %v581_v31 = vpop.f32.mrb[21].mxu0 }
 0x11f   :  { %v456_v32 = vsel %vm412_vm2, %v352_v23, %v434_v27  ;;  %489 = vst [vmem:[%s911_s3 + $0xa0] sm:$0xff] %v467_v29  ;;  %v582_v33 = vadd.f32 %v581_v31, %v580_v28  ;;  %v583_v34 = vpop.f32.mrb[22].mxu0 }
 0x120   :  { %478 = vst [vmem:[%s911_s3 + $0x48] sm:$0xff] %v456_v32  ;;  %v468_v35 = vsel %vm424_vm3, %v400_v25, %v446_v30  ;;  %v584_v36 = vpop.f32.mrb[23].mxu0 }
 0x121   :  { %490 = vst [vmem:[%s911_s3 + $0xa8] sm:$0xff] %v468_v35  ;;  %v357_v37 = vadd.f32 %v582_v33, %v818_v40  ;;  %v585_v38 = vadd.f32 %v584_v36, %v583_v34 }
 0x123   :  { %vm413_vm4 = vcmp.gt.f32.partialorder %v357_v37, 0.0  ;;  %v435_v39 = vmul.f32 0.01, %v357_v37  ;;  %v360_v41 = vadd.f32 %v585_v38, %v818_v40 }
 0x125   :  { %v457_v42 = vsel %vm413_vm4, %v357_v37, %v435_v39  ;;  %vm414_vm5 = vcmp.gt.f32.partialorder %v360_v41, 0.0  ;;  %v436_v43 = vmul.f32 0.01, %v360_v41 }
 0x126   :  { %479 = vst [vmem:[%s911_s3 + $0x50] sm:$0xff] %v457_v42 }
 0x127   :  { %v458_v44 = vsel %vm414_vm5, %v360_v41, %v436_v43 }
 0x128   :  { %480 = vst [vmem:[%s911_s3 + $0x58] sm:$0xff] %v458_v44 }

// kernel: forward.8
= control target key start
LH: loop header
LB: loop body
LE: loop exit
PB: predicated region body
PF: predicated region fallthrough
CT: control target
= control target key end

     0   :  { %s926_s1 = inlined_call_operand.vmem [shape: bf16[512,128], index: 1, kind: input, shape index: {}]   ;;  %s927_s0 = inlined_call_operand.vmem [shape: bf16[64,512], index: 0, kind: input, shape index: {}]   ;;  %s928_s2 = inlined_call_operand.vmem [shape: f32[1,128], index: 2, kind: input, shape index: {}]   ;;  %s929_s3 = inlined_call_operand.vmem [shape: f32[64,128], index: 3, kind: output, shape index: {}]  }
   0x1   :  { %v669_v0 = vld [vmem:[%s926_s1 + $0x40] sm:$0xff]   ;;  %v673_v4 = vld [vmem:[%s926_s1 + $0x48] sm:$0xff]   ;;  %v677_v8 = vld [vmem:[%s926_s1 + $0x50] sm:$0xff]  }
   0x2   :  { %v670_v1 = vld [vmem:[%s926_s1 + $0xc0] sm:$0xff]   ;;  %589 = vmatprep.subr.bf16.mxu0 %v669_v0  ;;  %v674_v5 = vld [vmem:[%s926_s1 + $0xc8] sm:$0xff]   ;;  %v678_v9 = vld [vmem:[%s926_s1 + $0xd0] sm:$0xff]  }
   0x3   :  { %v671_v2 = vld [vmem:[%s926_s1] sm:$0xff]   ;;  %629 = vmatprep.subr.bf16.mxu1 %v670_v1  ;;  %v675_v6 = vld [vmem:[%s926_s1 + $0x8] sm:$0xff]   ;;  %v679_v10 = vld [vmem:[%s926_s1 + $0x10] sm:$0xff]  }
   0x4   :  { %v672_v3 = vld [vmem:[%s926_s1 + $0x80] sm:$0xff]   ;;  %590 = vmatpush3.bf16.msra.mxu0 %v671_v2  ;;  %v676_v7 = vld [vmem:[%s926_s1 + $0x88] sm:$0xff]   ;;  %v680_v11 = vld [vmem:[%s926_s1 + $0x90] sm:$0xff]  }
   0x5   :  { %630 = vmatpush3.bf16.msra.mxu1 %v672_v3  ;;  %591 = vmatprep.subr.bf16.mxu0 %v673_v4  ;;  %v681_v12 = vld [vmem:[%s926_s1 + $0x58] sm:$0xff]   ;;  %v685_v16 = vld [vmem:[%s926_s1 + $0x60] sm:$0xff]   ;;  %v689_v20 = vld [vmem:[%s926_s1 + $0x68] sm:$0xff]  }
   0x6   :  { %631 = vmatprep.subr.bf16.mxu1 %v674_v5  ;;  %v682_v13 = vld [vmem:[%s926_s1 + $0xd8] sm:$0xff]   ;;  %v686_v17 = vld [vmem:[%s926_s1 + $0xe0] sm:$0xff]   ;;  %v690_v21 = vld [vmem:[%s926_s1 + $0xe8] sm:$0xff]  }
   0x7   :  { %v683_v14 = vld [vmem:[%s926_s1 + $0x18] sm:$0xff]   ;;  %v687_v18 = vld [vmem:[%s926_s1 + $0x20] sm:$0xff]   ;;  %v691_v22 = vld [vmem:[%s926_s1 + $0x28] sm:$0xff]  }
   0x8   :  { %592 = vmatpush3.bf16.msra.mxu0 %v675_v6  ;;  %v684_v15 = vld [vmem:[%s926_s1 + $0x98] sm:$0xff]   ;;  %v688_v19 = vld [vmem:[%s926_s1 + $0xa0] sm:$0xff]   ;;  %v692_v23 = vld [vmem:[%s926_s1 + $0xa8] sm:$0xff]  }
   0x9   :  { %632 = vmatpush3.bf16.msra.mxu1 %v676_v7  ;;  %593 = vmatprep.subr.bf16.mxu0 %v677_v8  ;;  %v693_v24 = vld [vmem:[%s926_s1 + $0x70] sm:$0xff]   ;;  %v697_v28 = vld [vmem:[%s926_s1 + $0x78] sm:$0xff]   ;;  %v892_v50 = vld [vmem:[%s928_s2] ss:$0 sm:$0xff] }
   0xa   :  { %633 = vmatprep.subr.bf16.mxu1 %v678_v9  ;;  %v694_v25 = vld [vmem:[%s926_s1 + $0xf0] sm:$0xff]   ;;  %v698_v29 = vld [vmem:[%s926_s1 + $0xf8] sm:$0xff]  }
   0xb   :  { %v695_v26 = vld [vmem:[%s926_s1 + $0x30] sm:$0xff]   ;;  %v699_v30 = vld [vmem:[%s926_s1 + $0x38] sm:$0xff]  }
   0xc   :  { %594 = vmatpush3.bf16.msra.mxu0 %v679_v10  ;;  %v696_v27 = vld [vmem:[%s926_s1 + $0xb0] sm:$0xff]   ;;  %v700_v31 = vld [vmem:[%s926_s1 + $0xb8] sm:$0xff]  }
   0xd   :  { %634 = vmatpush3.bf16.msra.mxu1 %v680_v11  ;;  %595 = vmatprep.subr.bf16.mxu0 %v681_v12  ;;  %v701_v32 = vld [vmem:[%s927_s0] ss:$16 sps:$4 sm:$0xff]   ;;  %v703_v33 = vld [vmem:[%s927_s0 + $0x4] ss:$16 sps:$4 sm:$0xff]   ;;  %v704_v34 = vld [vmem:[%s927_s0 + $0x8] ss:$16 sps:$4 sm:$0xff]  }
   0xe   :  { %635 = vmatprep.subr.bf16.mxu1 %v682_v13  ;;  %v706_v35 = vld [vmem:[%s927_s0 + $0xc] ss:$16 sps:$4 sm:$0xff]   ;;  %406 = vmatprep.mubr.bf16.mxu0 %v703_v33  ;;  %v707_v36 = vld [vmem:[%s927_s0 + $0x24] ss:$16 sps:$4 sm:$0xff]   ;;  %v711_v38 = vld [vmem:[%s927_s0 + $0x20] ss:$16 sps:$4 sm:$0xff]  }
   0xf   :  { %471 = vmatprep.mubr.bf16.mxu1 %v706_v35  ;;  %v709_v37 = vld [vmem:[%s927_s0 + $0x2c] ss:$16 sps:$4 sm:$0xff]   ;;  %v712_v39 = vld [vmem:[%s927_s0 + $0x28] ss:$16 sps:$4 sm:$0xff]   ;;  %v713_v40 = vld [vmem:[%s927_s0 + $0x44] ss:$16 sps:$4 sm:$0xff]  }
  0x10   :  { %596 = vmatpush3.bf16.msra.mxu0 %v683_v14  ;;  %v715_v41 = vld [vmem:[%s927_s0 + $0x4c] ss:$16 sps:$4 sm:$0xff]   ;;  %v717_v42 = vld [vmem:[%s927_s0 + $0x40] ss:$16 sps:$4 sm:$0xff]   ;;  %v718_v43 = vld [vmem:[%s927_s0 + $0x48] ss:$16 sps:$4 sm:$0xff]  }
  0x11   :  { %636 = vmatpush3.bf16.msra.mxu1 %v684_v15  ;;  %597 = vmatprep.subr.bf16.mxu0 %v685_v16  ;;  %v719_v44 = vld [vmem:[%s927_s0 + $0x64] ss:$16 sps:$4 sm:$0xff]   ;;  %v721_v45 = vld [vmem:[%s927_s0 + $0x6c] ss:$16 sps:$4 sm:$0xff]   ;;  %v723_v46 = vld [vmem:[%s927_s0 + $0x60] ss:$16 sps:$4 sm:$0xff]  }
  0x12   :  { %637 = vmatprep.subr.bf16.mxu1 %v686_v17  ;;  %v724_v47 = vld [vmem:[%s927_s0 + $0x68] ss:$16 sps:$4 sm:$0xff]  }
  0x14   :  { %598 = vmatpush3.bf16.msra.mxu0 %v687_v18 }
  0x15   :  { %638 = vmatpush3.bf16.msra.mxu1 %v688_v19  ;;  %599 = vmatprep.subr.bf16.mxu0 %v689_v20 }
  0x16   :  { %639 = vmatprep.subr.bf16.mxu1 %v690_v21 }
  0x18   :  { %600 = vmatpush3.bf16.msra.mxu0 %v691_v22 }
  0x19   :  { %640 = vmatpush3.bf16.msra.mxu1 %v692_v23  ;;  %601 = vmatprep.subr.bf16.mxu0 %v693_v24 }
  0x1a   :  { %641 = vmatprep.subr.bf16.mxu1 %v694_v25 }
  0x1c   :  { %602 = vmatpush3.bf16.msra.mxu0 %v695_v26 }
  0x1d   :  { %642 = vmatpush3.bf16.msra.mxu1 %v696_v27  ;;  %603 = vmatprep.subr.bf16.mxu0 %v697_v28 }
  0x1e   :  { %643 = vmatprep.subr.bf16.mxu1 %v698_v29 }
  0x20   :  { %604 = vmatpush3.bf16.msra.mxu0 %v699_v30 }
  0x21   :  { %644 = vmatpush3.bf16.msra.mxu1 %v700_v31 }
  0x23   :  { %407 = vmatmul.mubr.bf16.vlgmr.msra.gmra.mrb[0].mxu0 %v701_v32 }
  0x24   :  { %472 = vmatmul.mubr.bf16.vlgmr.msra.gmra.mrb[0].mxu1 %v704_v34  ;;  %414 = vmatprep.mubr.bf16.mxu0 %v707_v36 }
  0x25   :  { %479 = vmatprep.mubr.bf16.mxu1 %v709_v37 }
  0x2b   :  { %415 = vmatmul.mubr.bf16.gmra.mrb[4].mxu0 %v711_v38 }
  0x2c   :  { %480 = vmatmul.mubr.bf16.gmra.mrb[4].mxu1 %v712_v39  ;;  %422 = vmatprep.mubr.bf16.mxu0 %v713_v40 }
  0x2d   :  { %487 = vmatprep.mubr.bf16.mxu1 %v715_v41 }
  0x33   :  { %423 = vmatmul.mubr.bf16.gmra.mrb[8].mxu0 %v717_v42 }
  0x34   :  { %488 = vmatmul.mubr.bf16.gmra.mrb[8].mxu1 %v718_v43  ;;  %430 = vmatprep.mubr.bf16.mxu0 %v719_v44 }
  0x35   :  { %495 = vmatprep.mubr.bf16.mxu1 %v721_v45 }
  0x3b   :  { %431 = vmatmul.mubr.bf16.gmra.mrb[12].mxu0 %v723_v46 }
  0x3c   :  { %496 = vmatmul.mubr.bf16.gmra.mrb[12].mxu1 %v724_v47 }
  0xf6   :  { %v605_v48 = vpop.f32.mrb[0].mxu0 }
  0xf7   :  { %v645_v49 = vpop.f32.mrb[0].mxu1  ;;  %v606_v51 = vpop.f32.mrb[1].mxu0 }
  0xf8   :  { %v607_v52 = vadd.f32 %v606_v51, %v605_v48  ;;  %v646_v53 = vpop.f32.mrb[1].mxu1  ;;  %v608_v54 = vpop.f32.mrb[2].mxu0 }
  0xf9   :  { %v647_v55 = vadd.f32 %v646_v53, %v645_v49  ;;  %v648_v56 = vpop.f32.mrb[2].mxu1  ;;  %v609_v57 = vpop.f32.mrb[3].mxu0 }
  0xfa   :  { %v409_v58 = vadd.f32 %v607_v52, %v892_v50  ;;  %v610_v59 = vadd.f32 %v609_v57, %v608_v54  ;;  %v649_v60 = vpop.f32.mrb[3].mxu1 }
  0xfb   :  { %v650_v61 = vadd.f32 %v649_v60, %v648_v56 }
  0xfc   :  { %v474_v62 = vadd.f32 %v647_v55, %v409_v58  ;;  %v412_v63 = vadd.f32 %v610_v59, %v892_v50 }
  0xfe   :  { %vm504_vm0 = vcmp.gt.f32.partialorder %v474_v62, 0.0  ;;  %v512_v0 = vmul.f32 0.01, %v474_v62  ;;  %v477_v1 = vadd.f32 %v650_v61, %v412_v63  ;;  %v611_v2 = vpop.f32.mrb[4].mxu0 }
  0xff   :  { %v651_v3 = vpop.f32.mrb[4].mxu1  ;;  %v612_v4 = vpop.f32.mrb[5].mxu0 }
 0x100   :  { %v520_v5 = vsel %vm504_vm0, %v474_v62, %v512_v0  ;;  %vm505_vm1 = vcmp.gt.f32.partialorder %v477_v1, 0.0  ;;  %v513_v6 = vmul.f32 0.01, %v477_v1  ;;  %v613_v7 = vadd.f32 %v612_v4, %v611_v2  ;;  %v652_v8 = vpop.f32.mrb[5].mxu1  ;;  %v614_v9 = vpop.f32.mrb[6].mxu0 }
 0x101   :  { %528 = vst [vmem:[%s929_s3] sm:$0xff] %v520_v5  ;;  %v653_v10 = vadd.f32 %v652_v8, %v651_v3  ;;  %v654_v11 = vpop.f32.mrb[6].mxu1  ;;  %v615_v12 = vpop.f32.mrb[7].mxu0 }
 0x102   :  { %v521_v13 = vsel %vm505_vm1, %v477_v1, %v513_v6  ;;  %v417_v14 = vadd.f32 %v613_v7, %v892_v50  ;;  %v616_v15 = vadd.f32 %v615_v12, %v614_v9  ;;  %v655_v16 = vpop.f32.mrb[7].mxu1 }
 0x103   :  { %529 = vst [vmem:[%s929_s3 + $0x8] sm:$0xff] %v521_v13  ;;  %v656_v17 = vadd.f32 %v655_v16, %v654_v11 }
 0x104   :  { %v482_v18 = vadd.f32 %v653_v10, %v417_v14  ;;  %v420_v19 = vadd.f32 %v616_v15, %v892_v50 }
 0x106   :  { %vm506_vm2 = vcmp.gt.f32.partialorder %v482_v18, 0.0  ;;  %v514_v20 = vmul.f32 0.01, %v482_v18  ;;  %v485_v21 = vadd.f32 %v656_v17, %v420_v19  ;;  %v617_v22 = vpop.f32.mrb[8].mxu0 }
 0x107   :  { %v657_v23 = vpop.f32.mrb[8].mxu1  ;;  %v618_v24 = vpop.f32.mrb[9].mxu0 }
 0x108   :  { %v522_v25 = vsel %vm506_vm2, %v482_v18, %v514_v20  ;;  %vm507_vm3 = vcmp.gt.f32.partialorder %v485_v21, 0.0  ;;  %v515_v26 = vmul.f32 0.01, %v485_v21  ;;  %v619_v27 = vadd.f32 %v618_v24, %v617_v22  ;;  %v658_v28 = vpop.f32.mrb[9].mxu1  ;;  %v620_v29 = vpop.f32.mrb[10].mxu0 }
 0x109   :  { %530 = vst [vmem:[%s929_s3 + $0x10] sm:$0xff] %v522_v25  ;;  %v659_v30 = vadd.f32 %v658_v28, %v657_v23  ;;  %v660_v31 = vpop.f32.mrb[10].mxu1  ;;  %v621_v32 = vpop.f32.mrb[11].mxu0 }
 0x10a   :  { %v523_v33 = vsel %vm507_vm3, %v485_v21, %v515_v26  ;;  %v425_v34 = vadd.f32 %v619_v27, %v892_v50  ;;  %v622_v35 = vadd.f32 %v621_v32, %v620_v29  ;;  %v661_v36 = vpop.f32.mrb[11].mxu1 }
 0x10b   :  { %531 = vst [vmem:[%s929_s3 + $0x18] sm:$0xff] %v523_v33  ;;  %v662_v37 = vadd.f32 %v661_v36, %v660_v31 }
 0x10c   :  { %v490_v38 = vadd.f32 %v659_v30, %v425_v34  ;;  %v428_v39 = vadd.f32 %v622_v35, %v892_v50 }
 0x10e   :  { %vm508_vm4 = vcmp.gt.f32.partialorder %v490_v38, 0.0  ;;  %v516_v40 = vmul.f32 0.01, %v490_v38  ;;  %v493_v41 = vadd.f32 %v662_v37, %v428_v39  ;;  %v623_v42 = vpop.f32.mrb[12].mxu0 }
 0x10f   :  { %v663_v43 = vpop.f32.mrb[12].mxu1  ;;  %v624_v44 = vpop.f32.mrb[13].mxu0 }
 0x110   :  { %v524_v45 = vsel %vm508_vm4, %v490_v38, %v516_v40  ;;  %vm509_vm5 = vcmp.gt.f32.partialorder %v493_v41, 0.0  ;;  %v517_v46 = vmul.f32 0.01, %v493_v41  ;;  %v625_v47 = vadd.f32 %v624_v44, %v623_v42  ;;  %v664_v48 = vpop.f32.mrb[13].mxu1  ;;  %v626_v49 = vpop.f32.mrb[14].mxu0 }
 0x111   :  { %532 = vst [vmem:[%s929_s3 + $0x20] sm:$0xff] %v524_v45  ;;  %v665_v51 = vadd.f32 %v664_v48, %v663_v43  ;;  %v666_v52 = vpop.f32.mrb[14].mxu1  ;;  %v627_v53 = vpop.f32.mrb[15].mxu0 }
 0x112   :  { %v525_v54 = vsel %vm509_vm5, %v493_v41, %v517_v46  ;;  %v433_v55 = vadd.f32 %v625_v47, %v892_v50  ;;  %v628_v56 = vadd.f32 %v627_v53, %v626_v49  ;;  %v667_v57 = vpop.f32.mrb[15].mxu1 }
 0x113   :  { %533 = vst [vmem:[%s929_s3 + $0x28] sm:$0xff] %v525_v54  ;;  %v668_v58 = vadd.f32 %v667_v57, %v666_v52 }
 0x114   :  { %v498_v59 = vadd.f32 %v665_v51, %v433_v55  ;;  %v436_v60 = vadd.f32 %v628_v56, %v892_v50 }
 0x116   :  { %vm510_vm6 = vcmp.gt.f32.partialorder %v498_v59, 0.0  ;;  %v518_v61 = vmul.f32 0.01, %v498_v59  ;;  %v501_v62 = vadd.f32 %v668_v58, %v436_v60 }
 0x118   :  { %v526_v63 = vsel %vm510_vm6, %v498_v59, %v518_v61  ;;  %vm511_vm7 = vcmp.gt.f32.partialorder %v501_v62, 0.0  ;;  %v519_v0 = vmul.f32 0.01, %v501_v62 }
 0x119   :  { %534 = vst [vmem:[%s929_s3 + $0x30] sm:$0xff] %v526_v63 }
 0x11a   :  { %v527_v1 = vsel %vm511_vm7, %v501_v62, %v519_v0 }
 0x11b   :  { %535 = vst [vmem:[%s929_s3 + $0x38] sm:$0xff] %v527_v1 }

// kernel: forward.9
= control target key start
LH: loop header
LB: loop body
LE: loop exit
PB: predicated region body
PF: predicated region fallthrough
CT: control target
= control target key end

     0   :  { %s1222_s1 = inlined_call_operand.vmem [shape: bf16[1024,128], index: 1, kind: input, shape index: {}]   ;;  %s1223_s0 = inlined_call_operand.vmem [shape: bf16[16,1024], index: 0, kind: input, shape index: {}]   ;;  %s1224_s2 = inlined_call_operand.vmem [shape: f32[1,128], index: 2, kind: input, shape index: {}]   ;;  %s1225_s3 = inlined_call_operand.vmem [shape: f32[16,128], index: 3, kind: output, shape index: {}]  }
   0x1   :  { %v913_v0 = vld [vmem:[%s1222_s1 + $0x40] sm:$0xff]   ;;  %v917_v4 = vld [vmem:[%s1222_s1 + $0x48] sm:$0xff]   ;;  %v921_v8 = vld [vmem:[%s1222_s1 + $0x50] sm:$0xff]  }
   0x2   :  { %v914_v1 = vld [vmem:[%s1222_s1 + $0xc0] sm:$0xff]   ;;  %825 = vmatprep.subr.bf16.mxu0 %v913_v0  ;;  %v918_v5 = vld [vmem:[%s1222_s1 + $0xc8] sm:$0xff]   ;;  %v922_v9 = vld [vmem:[%s1222_s1 + $0xd0] sm:$0xff]  }
   0x3   :  { %v915_v2 = vld [vmem:[%s1222_s1] sm:$0xff]   ;;  %847 = vmatprep.subr.bf16.mxu1 %v914_v1  ;;  %v919_v6 = vld [vmem:[%s1222_s1 + $0x8] sm:$0xff]   ;;  %v923_v10 = vld [vmem:[%s1222_s1 + $0x10] sm:$0xff]  }
   0x4   :  { %v916_v3 = vld [vmem:[%s1222_s1 + $0x80] sm:$0xff]   ;;  %826 = vmatpush3.bf16.msra.mxu0 %v915_v2  ;;  %v920_v7 = vld [vmem:[%s1222_s1 + $0x88] sm:$0xff]   ;;  %v924_v11 = vld [vmem:[%s1222_s1 + $0x90] sm:$0xff]  }
   0x5   :  { %848 = vmatpush3.bf16.msra.mxu1 %v916_v3  ;;  %827 = vmatprep.subr.bf16.mxu0 %v917_v4  ;;  %v925_v12 = vld [vmem:[%s1222_s1 + $0x58] sm:$0xff]   ;;  %v929_v16 = vld [vmem:[%s1222_s1 + $0x60] sm:$0xff]   ;;  %v933_v20 = vld [vmem:[%s1222_s1 + $0x68] sm:$0xff]  }
   0x6   :  { %849 = vmatprep.subr.bf16.mxu1 %v918_v5  ;;  %v926_v13 = vld [vmem:[%s1222_s1 + $0xd8] sm:$0xff]   ;;  %v930_v17 = vld [vmem:[%s1222_s1 + $0xe0] sm:$0xff]   ;;  %v934_v21 = vld [vmem:[%s1222_s1 + $0xe8] sm:$0xff]  }
   0x7   :  { %v927_v14 = vld [vmem:[%s1222_s1 + $0x18] sm:$0xff]   ;;  %v931_v18 = vld [vmem:[%s1222_s1 + $0x20] sm:$0xff]   ;;  %v935_v22 = vld [vmem:[%s1222_s1 + $0x28] sm:$0xff]  }
   0x8   :  { %828 = vmatpush3.bf16.msra.mxu0 %v919_v6  ;;  %v928_v15 = vld [vmem:[%s1222_s1 + $0x98] sm:$0xff]   ;;  %v932_v19 = vld [vmem:[%s1222_s1 + $0xa0] sm:$0xff]   ;;  %v936_v23 = vld [vmem:[%s1222_s1 + $0xa8] sm:$0xff]  }
   0x9   :  { %850 = vmatpush3.bf16.msra.mxu1 %v920_v7  ;;  %829 = vmatprep.subr.bf16.mxu0 %v921_v8  ;;  %v937_v24 = vld [vmem:[%s1222_s1 + $0x70] sm:$0xff]   ;;  %v941_v28 = vld [vmem:[%s1222_s1 + $0x78] sm:$0xff]   ;;  %v15_v32 = vld [vmem:[%s1223_s0] sm:$0xff] }
   0xa   :  { %851 = vmatprep.subr.bf16.mxu1 %v922_v9  ;;  %v938_v25 = vld [vmem:[%s1222_s1 + $0xf0] sm:$0xff]   ;;  %v942_v29 = vld [vmem:[%s1222_s1 + $0xf8] sm:$0xff]   ;;  %v19_v33 = vld [vmem:[%s1223_s0 + $0x20] sm:$0xff] }
   0xb   :  { %v939_v26 = vld [vmem:[%s1222_s1 + $0x30] sm:$0xff]   ;;  %v943_v30 = vld [vmem:[%s1222_s1 + $0x38] sm:$0xff]   ;;  %v16_v34 = vld [vmem:[%s1223_s0 + $0x8] sm:$0xff]  ;;  %v753_v35 = vcombine.low %v15_v32, %v19_v33  ;;  %v754_v36 = vcombine.high %v15_v32, %v19_v33 }
   0xc   :  { %830 = vmatpush3.bf16.msra.mxu0 %v923_v10  ;;  %v940_v27 = vld [vmem:[%s1222_s1 + $0xb0] sm:$0xff]   ;;  %v944_v31 = vld [vmem:[%s1222_s1 + $0xb8] sm:$0xff]   ;;  %v20_v37 = vld [vmem:[%s1223_s0 + $0x28] sm:$0xff] }
   0xd   :  { %852 = vmatpush3.bf16.msra.mxu1 %v924_v11  ;;  %831 = vmatprep.subr.bf16.mxu0 %v925_v12  ;;  %v755_v38 = vcombine.low %v16_v34, %v20_v37  ;;  %v756_v39 = vcombine.high %v16_v34, %v20_v37  ;;  %v945_v40 = vld [vmem:[%s1222_s1 + $0x140] sm:$0xff]   ;;  %v949_v44 = vld [vmem:[%s1222_s1 + $0x148] sm:$0xff]   ;;  %v953_v48 = vld [vmem:[%s1222_s1 + $0x150] sm:$0xff]  }
   0xe   :  { %853 = vmatprep.subr.bf16.mxu1 %v926_v13  ;;  %614 = vmatprep.mubr.bf16.mxu0 %v754_v36  ;;  %v946_v41 = vld [vmem:[%s1222_s1 + $0x1c0] sm:$0xff]   ;;  %v950_v45 = vld [vmem:[%s1222_s1 + $0x1c8] sm:$0xff]   ;;  %v954_v49 = vld [vmem:[%s1222_s1 + $0x1d0] sm:$0xff]  }
   0xf   :  { %655 = vmatprep.mubr.bf16.mxu1 %v756_v39  ;;  %v947_v42 = vld [vmem:[%s1222_s1 + $0x100] sm:$0xff]   ;;  %v951_v46 = vld [vmem:[%s1222_s1 + $0x108] sm:$0xff]   ;;  %v955_v50 = vld [vmem:[%s1222_s1 + $0x110] sm:$0xff]  }
  0x10   :  { %832 = vmatpush3.bf16.msra.mxu0 %v927_v14  ;;  %v948_v43 = vld [vmem:[%s1222_s1 + $0x180] sm:$0xff]   ;;  %v952_v47 = vld [vmem:[%s1222_s1 + $0x188] sm:$0xff]   ;;  %v956_v51 = vld [vmem:[%s1222_s1 + $0x190] sm:$0xff]  }
  0x11   :  { %854 = vmatpush3.bf16.msra.mxu1 %v928_v15  ;;  %833 = vmatprep.subr.bf16.mxu0 %v929_v16  ;;  %v957_v52 = vld [vmem:[%s1222_s1 + $0x158] sm:$0xff]   ;;  %v961_v56 = vld [vmem:[%s1222_s1 + $0x160] sm:$0xff]   ;;  %v965_v60 = vld [vmem:[%s1222_s1 + $0x168] sm:$0xff]  }
  0x12   :  { %855 = vmatprep.subr.bf16.mxu1 %v930_v17  ;;  %v958_v53 = vld [vmem:[%s1222_s1 + $0x1d8] sm:$0xff]   ;;  %v962_v57 = vld [vmem:[%s1222_s1 + $0x1e0] sm:$0xff]   ;;  %v966_v61 = vld [vmem:[%s1222_s1 + $0x1e8] sm:$0xff]  }
  0x13   :  { %v959_v54 = vld [vmem:[%s1222_s1 + $0x118] sm:$0xff]   ;;  %v963_v58 = vld [vmem:[%s1222_s1 + $0x120] sm:$0xff]   ;;  %v967_v62 = vld [vmem:[%s1222_s1 + $0x128] sm:$0xff]  }
  0x14   :  { %834 = vmatpush3.bf16.msra.mxu0 %v931_v18  ;;  %v960_v55 = vld [vmem:[%s1222_s1 + $0x198] sm:$0xff]   ;;  %v964_v59 = vld [vmem:[%s1222_s1 + $0x1a0] sm:$0xff]   ;;  %v968_v63 = vld [vmem:[%s1222_s1 + $0x1a8] sm:$0xff]  }
  0x15   :  { %856 = vmatpush3.bf16.msra.mxu1 %v932_v19  ;;  %835 = vmatprep.subr.bf16.mxu0 %v933_v20  ;;  %v969_v0 = vld [vmem:[%s1222_s1 + $0x170] sm:$0xff]   ;;  %v973_v4 = vld [vmem:[%s1222_s1 + $0x178] sm:$0xff]   ;;  %v752_v18 = vld [vmem:[%s1224_s2] ss:$0 sm:$0xff] }
  0x16   :  { %857 = vmatprep.subr.bf16.mxu1 %v934_v21  ;;  %v970_v1 = vld [vmem:[%s1222_s1 + $0x1f0] sm:$0xff]   ;;  %v974_v5 = vld [vmem:[%s1222_s1 + $0x1f8] sm:$0xff]  }
  0x17   :  { %v971_v2 = vld [vmem:[%s1222_s1 + $0x130] sm:$0xff]   ;;  %v975_v6 = vld [vmem:[%s1222_s1 + $0x138] sm:$0xff]  }
  0x18   :  { %836 = vmatpush3.bf16.msra.mxu0 %v935_v22  ;;  %v972_v3 = vld [vmem:[%s1222_s1 + $0x1b0] sm:$0xff]   ;;  %v976_v7 = vld [vmem:[%s1222_s1 + $0x1b8] sm:$0xff]  }
  0x19   :  { %858 = vmatpush3.bf16.msra.mxu1 %v936_v23  ;;  %837 = vmatprep.subr.bf16.mxu0 %v937_v24  ;;  %v17_v8 = vld [vmem:[%s1223_s0 + $0x10] sm:$0xff]  ;;  %v18_v12 = vld [vmem:[%s1223_s0 + $0x18] sm:$0xff] }
  0x1a   :  { %859 = vmatprep.subr.bf16.mxu1 %v938_v25  ;;  %v21_v9 = vld [vmem:[%s1223_s0 + $0x30] sm:$0xff]  ;;  %v22_v13 = vld [vmem:[%s1223_s0 + $0x38] sm:$0xff] }
  0x1b   :  { %v757_v10 = vcombine.low %v17_v8, %v21_v9  ;;  %v758_v11 = vcombine.high %v17_v8, %v21_v9  ;;  %v759_v14 = vcombine.low %v18_v12, %v22_v13  ;;  %v760_v15 = vcombine.high %v18_v12, %v22_v13 }
  0x1c   :  { %838 = vmatpush3.bf16.msra.mxu0 %v939_v26 }
  0x1d   :  { %860 = vmatpush3.bf16.msra.mxu1 %v940_v27  ;;  %839 = vmatprep.subr.bf16.mxu0 %v941_v28 }
  0x1e   :  { %861 = vmatprep.subr.bf16.mxu1 %v942_v29 }
  0x20   :  { %840 = vmatpush3.bf16.msra.mxu0 %v943_v30 }
  0x21   :  { %862 = vmatpush3.bf16.msra.mxu1 %v944_v31  ;;  %869 = vmatprep.subr.bf16.mxu0 %v945_v40 }
  0x22   :  { %891 = vmatprep.subr.bf16.mxu1 %v946_v41 }
  0x23   :  { %615 = vmatmul.mubr.bf16.vlgmr.msra.gmra.mrb[0].mxu0 %v753_v35 }
  0x24   :  { %656 = vmatmul.mubr.bf16.vlgmr.msra.gmra.mrb[0].mxu1 %v755_v38  ;;  %870 = vmatpush3.bf16.msra.mxu0 %v947_v42 }
  0x25   :  { %892 = vmatpush3.bf16.msra.mxu1 %v948_v43  ;;  %871 = vmatprep.subr.bf16.mxu0 %v949_v44 }
  0x26   :  { %893 = vmatprep.subr.bf16.mxu1 %v950_v45  ;;  %696 = vmatprep.mubr.bf16.mxu0 %v758_v11 }
  0x27   :  { %737 = vmatprep.mubr.bf16.mxu1 %v760_v15 }
  0x28   :  { %872 = vmatpush3.bf16.msra.mxu0 %v951_v46 }
  0x29   :  { %894 = vmatpush3.bf16.msra.mxu1 %v952_v47  ;;  %873 = vmatprep.subr.bf16.mxu0 %v953_v48 }
  0x2a   :  { %895 = vmatprep.subr.bf16.mxu1 %v954_v49 }
  0x2c   :  { %874 = vmatpush3.bf16.msra.mxu0 %v955_v50 }
  0x2d   :  { %896 = vmatpush3.bf16.msra.mxu1 %v956_v51  ;;  %875 = vmatprep.subr.bf16.mxu0 %v957_v52 }
  0x2e   :  { %897 = vmatprep.subr.bf16.mxu1 %v958_v53 }
  0x30   :  { %876 = vmatpush3.bf16.msra.mxu0 %v959_v54 }
  0x31   :  { %898 = vmatpush3.bf16.msra.mxu1 %v960_v55  ;;  %877 = vmatprep.subr.bf16.mxu0 %v961_v56 }
  0x32   :  { %899 = vmatprep.subr.bf16.mxu1 %v962_v57 }
  0x34   :  { %878 = vmatpush3.bf16.msra.mxu0 %v963_v58 }
  0x35   :  { %900 = vmatpush3.bf16.msra.mxu1 %v964_v59  ;;  %879 = vmatprep.subr.bf16.mxu0 %v965_v60 }
  0x36   :  { %901 = vmatprep.subr.bf16.mxu1 %v966_v61 }
  0x38   :  { %880 = vmatpush3.bf16.msra.mxu0 %v967_v62 }
  0x39   :  { %902 = vmatpush3.bf16.msra.mxu1 %v968_v63  ;;  %881 = vmatprep.subr.bf16.mxu0 %v969_v0 }
  0x3a   :  { %903 = vmatprep.subr.bf16.mxu1 %v970_v1 }
  0x3c   :  { %882 = vmatpush3.bf16.msra.mxu0 %v971_v2 }
  0x3d   :  { %904 = vmatpush3.bf16.msra.mxu1 %v972_v3  ;;  %883 = vmatprep.subr.bf16.mxu0 %v973_v4 }
  0x3e   :  { %905 = vmatprep.subr.bf16.mxu1 %v974_v5 }
  0x40   :  { %884 = vmatpush3.bf16.msra.mxu0 %v975_v6 }
  0x41   :  { %906 = vmatpush3.bf16.msra.mxu1 %v976_v7 }
  0x43   :  { %697 = vmatmul.mubr.bf16.vlgmr.msra.gmra.mrb[4].mxu0 %v757_v10 }
  0x44   :  { %738 = vmatmul.mubr.bf16.vlgmr.msra.gmra.mrb[4].mxu1 %v759_v14 }
  0xf6   :  { %v841_v16 = vpop.f32.mrb[0].mxu0 }
  0xf7   :  { %v863_v17 = vpop.f32.mrb[0].mxu1  ;;  %v842_v19 = vpop.f32.mrb[1].mxu0 }
  0xf8   :  { %v843_v20 = vadd.f32 %v842_v19, %v841_v16  ;;  %v864_v21 = vpop.f32.mrb[1].mxu1  ;;  %v844_v22 = vpop.f32.mrb[2].mxu0 }
  0xf9   :  { %v865_v23 = vadd.f32 %v864_v21, %v863_v17  ;;  %v866_v24 = vpop.f32.mrb[2].mxu1  ;;  %v845_v25 = vpop.f32.mrb[3].mxu0 }
  0xfa   :  { %v617_v26 = vadd.f32 %v843_v20, %v752_v18  ;;  %v846_v27 = vadd.f32 %v845_v25, %v844_v22  ;;  %v867_v28 = vpop.f32.mrb[3].mxu1 }
  0xfb   :  { %v868_v29 = vadd.f32 %v867_v28, %v866_v24 }
  0xfc   :  { %v658_v30 = vadd.f32 %v865_v23, %v617_v26  ;;  %v620_v31 = vadd.f32 %v846_v27, %v752_v18 }
  0xfe   :  { %v661_v32 = vadd.f32 %v868_v29, %v620_v31 }
 0x116   :  { %v885_v33 = vpop.f32.mrb[4].mxu0 }
 0x117   :  { %v907_v34 = vpop.f32.mrb[4].mxu1  ;;  %v886_v35 = vpop.f32.mrb[5].mxu0 }
 0x118   :  { %v887_v36 = vadd.f32 %v886_v35, %v885_v33  ;;  %v908_v37 = vpop.f32.mrb[5].mxu1  ;;  %v888_v38 = vpop.f32.mrb[6].mxu0 }
 0x119   :  { %v909_v39 = vadd.f32 %v908_v37, %v907_v34  ;;  %v910_v40 = vpop.f32.mrb[6].mxu1  ;;  %v889_v41 = vpop.f32.mrb[7].mxu0 }
 0x11a   :  { %v699_v42 = vadd.f32 %v887_v36, %v658_v30  ;;  %v890_v43 = vadd.f32 %v889_v41, %v888_v38  ;;  %v911_v44 = vpop.f32.mrb[7].mxu1 }
 0x11b   :  { %v912_v45 = vadd.f32 %v911_v44, %v910_v40 }
 0x11c   :  { %v740_v46 = vadd.f32 %v909_v39, %v699_v42  ;;  %v702_v47 = vadd.f32 %v890_v43, %v661_v32 }
 0x11e   :  { %746 = vst [vmem:[%s1225_s3] sm:$0xff] %v740_v46  ;;  %v743_v48 = vadd.f32 %v912_v45, %v702_v47 }
 0x120   :  { %747 = vst [vmem:[%s1225_s3 + $0x8] sm:$0xff] %v743_v48 }

</bundles_post_ra>
